<compile_context>
chip_gen: v7x
topology: tpu7x:2x2x1
jax: 0.10.0
libtpu: 0.0.40
codegen_flags: <defaults>
</compile_context>

<pallas_src>
import jax
import jax.numpy as jnp
from jax.experimental import pallas as pl
from jax.experimental.pallas import tpu as pltpu

# Architecture constants implied by the PyTorch module.
C_IN = 3
C_OUT = 16
KSIZE = 12
STRIDE = 4
POOL_K = 2
POOL_S = 4
IMG = 224                                      # Linear(3136,6) => conv out 54 => input 224
CONV_OUT = (IMG - KSIZE) // STRIDE + 1         # 54
POOL_OUT = (CONV_OUT - POOL_K) // POOL_S + 1   # 14
P = POOL_OUT * POOL_OUT                        # 196 pooled pixels
P_PAD = 200                                    # 196 padded to a multiple of 8
KDIM = C_IN * KSIZE * KSIZE                    # 432
FC_IN = C_OUT * P                              # 3136
FC_OUT = 6

_VMEM = pl.BlockSpec(memory_space=pltpu.MemorySpace.VMEM)


# ---------------------------------------------------------------------------
# Pallas kernels
# ---------------------------------------------------------------------------
def _conv_pool_kernel(x_ref, w_ref, b_ref, o_ref):
    """Fused conv(12x12/s4) GEMM + bias + ReLU + MaxPool(2/s4) for one image.

    x_ref: (1, 4*P_PAD, KDIM)  pool-aware im2col patches, pool-corner major.
    w_ref: (KDIM, C_OUT)       conv weight as a GEMM operand ((c,kh,kw) rows).
    b_ref: (1, C_OUT)          conv bias.
    o_ref: (1, P, C_OUT)       pooled activations, (p, c) order.
    """
    w = w_ref[...]

    def corner(i):
        patches = x_ref[0, i * P_PAD:(i + 1) * P_PAD, :]          # (P_PAD, KDIM)
        return jnp.dot(patches, w, preferred_element_type=jnp.float32)

    # Max over the four 2x2 pool-window corners; bias + ReLU commute with max.
    m = jnp.maximum(jnp.maximum(corner(0), corner(1)),
                    jnp.maximum(corner(2), corner(3)))            # (P_PAD, C_OUT)
    pooled = jnp.maximum(m[:P, :] + b_ref[...], 0.0)              # (P, C_OUT)
    o_ref[...] = pooled[None, :, :]


def _fc_kernel(x_ref, w_ref, b_ref, o_ref):
    """o = x @ w + b  (Linear 3136 -> 6)."""
    o_ref[...] = (
        jnp.dot(x_ref[...], w_ref[...], preferred_element_type=jnp.float32)
        + b_ref[...]
    )


# ---------------------------------------------------------------------------
# XLA glue + wrappers
# ---------------------------------------------------------------------------
def _pool_aware_im2col(x):
    """(N,3,224,224) NCHW -> (N, 4*P_PAD, KDIM) conv patches.

    Row r = corner*P_PAD + (pi*14 + pj), corner = 2*a + b, holds the 12x12x3
    patch feeding conv output (4*pi+a, 4*pj+b) -- exactly the four positions
    MaxPool2d(2, stride=4) reads for pooled pixel (pi, pj).  Feature order is
    (c, kh, kw), matching the OIHW weight flatten.
    """
    n = x.shape[0]
    blk = STRIDE * POOL_S                                       # 16
    x6 = x.reshape(n, C_IN, POOL_OUT, blk, POOL_OUT, blk)       # (n,c,pi,rh,pj,rw)
    corners = [
        x6[:, :, :, 4 * a:4 * a + KSIZE, :, 4 * b:4 * b + KSIZE]
        for a in (0, 1) for b in (0, 1)
    ]                                                           # 4 x (n,c,14,12,14,12)
    xs = jnp.stack(corners, axis=1)                             # (n,4,c,14,12,14,12)
    xs = xs.transpose(0, 1, 3, 5, 2, 4, 6)                      # (n,4,14,14,c,12,12)
    xs = xs.reshape(n, 4, P, KDIM)
    xs = jnp.pad(xs, ((0, 0), (0, 0), (0, P_PAD - P), (0, 0)))
    return xs.reshape(n, 4 * P_PAD, KDIM)


def cnn_jammer_forward(kp, x):
    """kp = prepare_params(...) output, x = (N,3,224,224) f32 NCHW."""
    n = x.shape[0]
    xcol = _pool_aware_im2col(x)

    pooled = pl.pallas_call(
        _conv_pool_kernel,
        out_shape=jax.ShapeDtypeStruct((n, P, C_OUT), jnp.float32),
        grid=(n,),
        in_specs=[
            pl.BlockSpec((1, 4 * P_PAD, KDIM), lambda i: (i, 0, 0)),
            pl.BlockSpec((KDIM, C_OUT), lambda i: (0, 0)),
            pl.BlockSpec((1, C_OUT), lambda i: (0, 0)),
        ],
        out_specs=pl.BlockSpec((1, P, C_OUT), lambda i: (i, 0, 0)),
        compiler_params=pltpu.CompilerParams(
            dimension_semantics=("parallel",)),
    )(xcol, kp["conv_wmat"], kp["conv_b"])

    # Free row-major view (N,196,16)->(N,3136); fc weight was permuted at init
    # so this (p,c) flatten reproduces PyTorch's NCHW flatten exactly.
    xf = pooled.reshape(n, FC_IN)

    out = pl.pallas_call(
        _fc_kernel,
        out_shape=jax.ShapeDtypeStruct((n, FC_OUT), jnp.float32),
        in_specs=[_VMEM, _VMEM, _VMEM],
        out_specs=_VMEM,
    )(xf, kp["fc_wmat"], kp["fc_b"])
    return out


# ---------------------------------------------------------------------------
# Parameters (PyTorch layout) + one-time kernel-ready prep
# ---------------------------------------------------------------------------
def init_params(key):
    kw, kb, kfw, kfb = jax.random.split(key, 4)
    return {
        "conv_w": 0.1 * jax.random.normal(kw, (C_OUT, C_IN, KSIZE, KSIZE), jnp.float32),
        "conv_b": 0.1 * jax.random.normal(kb, (C_OUT,), jnp.float32),
        "fc_w": 0.1 * jax.random.normal(kfw, (FC_OUT, FC_IN), jnp.float32),
        "fc_b": 0.1 * jax.random.normal(kfb, (FC_OUT,), jnp.float32),
    }


def prepare_params(p):
    """Pre-reshape / pre-permute weights once (no per-forward transposes)."""
    conv_wmat = p["conv_w"].reshape(C_OUT, KDIM).T            # (432,16), (c,kh,kw) rows
    conv_b = p["conv_b"].reshape(1, C_OUT)
    # PyTorch flatten index = c*196 + p; our flatten index = p*16 + c.
    fc_wmat = (p["fc_w"].reshape(FC_OUT, C_OUT, P)
               .transpose(2, 1, 0)
               .reshape(FC_IN, FC_OUT))                        # (3136, 6)
    fc_b = p["fc_b"].reshape(1, FC_OUT)
    return {"conv_wmat": conv_wmat, "conv_b": conv_b,
            "fc_wmat": fc_wmat, "fc_b": fc_b}


# ---------------------------------------------------------------------------
# Pure-JAX reference (matches the PyTorch module)
# ---------------------------------------------------------------------------
def reference_forward(p, x):
    y = jax.lax.conv_general_dilated(
        x, p["conv_w"], window_strides=(STRIDE, STRIDE), padding="VALID",
        dimension_numbers=("NCHW", "OIHW", "NCHW"),
        precision=jax.lax.Precision.HIGHEST)
    y = jnp.maximum(y + p["conv_b"].reshape(1, C_OUT, 1, 1), 0.0)  # (N,16,54,54)
    # MaxPool2d(kernel=2, stride=4): windows start at rows/cols 0,4,...,52.
    y = jnp.maximum(jnp.maximum(y[:, :, 0::4, 0::4], y[:, :, 0::4, 1::4]),
                    jnp.maximum(y[:, :, 1::4, 0::4], y[:, :, 1::4, 1::4]))
    y = y.reshape(x.shape[0], -1)                                  # NCHW flatten
    return jnp.dot(y, p["fc_w"].T, precision=jax.lax.Precision.HIGHEST) + p["fc_b"]


if __name__ == "__main__":
    key = jax.random.PRNGKey(0)
    k_param, k_input = jax.random.split(key)
    params = init_params(k_param)
    prepared = prepare_params(params)

    # 224x224 is the spatial size implied by Linear(3136, 6); batch = 2.
    x = jax.random.normal(k_input, (2, C_IN, IMG, IMG), jnp.float32)

    fwd = jax.jit(cnn_jammer_forward)
    out = jax.block_until_ready(fwd(prepared, x))
    assert out.shape == (2, FC_OUT), out.shape
    assert bool(jnp.all(jnp.isfinite(out)))

    ref = jax.block_until_ready(jax.jit(reference_forward)(params, x))
    max_err = float(jnp.max(jnp.abs(out - ref)))
    assert jnp.allclose(out, ref, rtol=2e-2, atol=2e-1), max_err

    print("KERNEL_OK")
</pallas_src>

<mosaic_0001>
module attributes {stable_mosaic.version = 11 : i64} {
  func.func @_conv_pool_kernel(%arg0: i32, %arg1: memref<1x800x432xf32, #tpu.memory_space<vmem>>, %arg2: memref<432x16xf32, #tpu.memory_space<vmem>>, %arg3: memref<1x16xf32, #tpu.memory_space<vmem>>, %arg4: memref<1x196x16xf32, #tpu.memory_space<vmem>>) attributes {dimension_semantics = [#tpu.dimension_semantics<parallel>], iteration_bounds = array<i64: 2>, scalar_prefetch = 0 : i64, scratch_operands = 0 : i64, tpu.core_type = #tpu.core_type<tc>, window_params = [{transform_indices = @transform_0, window_bounds = array<i64: 1, 800, 432>}, {pipeline_mode = #tpu.pipeline_mode<synchronous>, transform_indices = @transform_1, window_bounds = array<i64: 432, 16>}, {pipeline_mode = #tpu.pipeline_mode<synchronous>, transform_indices = @transform_2, window_bounds = array<i64: 1, 16>}, {transform_indices = @transform_3, window_bounds = array<i64: 1, 196, 16>}]} {
    %c0 = arith.constant 0 : index
    %c0_0 = arith.constant 0 : index
    %0 = vector.load %arg2[%c0, %c0_0] : memref<432x16xf32, #tpu.memory_space<vmem>>, vector<432x16xf32>
    %c0_1 = arith.constant 0 : index
    %c0_2 = arith.constant 0 : index
    %c0_3 = arith.constant 0 : index
    %1 = vector.load %arg1[%c0_1, %c0_2, %c0_3] : memref<1x800x432xf32, #tpu.memory_space<vmem>>, vector<1x200x432xf32>
    %2 = vector.shape_cast %1 : vector<1x200x432xf32> to vector<200x432xf32>
    %cst = arith.constant dense<0.000000e+00> : vector<200x16xf32>
    %3 = tpu.matmul %2, %0, %cst {dimension_numbers = #tpu.dot_dimension_numbers<[1], [0], [0], [1], [0, 0, 1, 1], [], []>} : vector<200x432xf32>, vector<432x16xf32>, vector<200x16xf32> -> vector<200x16xf32>
    %c0_4 = arith.constant 0 : index
    %c200 = arith.constant 200 : index
    %c0_5 = arith.constant 0 : index
    %4 = vector.load %arg1[%c0_4, %c200, %c0_5] : memref<1x800x432xf32, #tpu.memory_space<vmem>>, vector<1x200x432xf32>
    %5 = vector.shape_cast %4 : vector<1x200x432xf32> to vector<200x432xf32>
    %cst_6 = arith.constant dense<0.000000e+00> : vector<200x16xf32>
    %6 = tpu.matmul %5, %0, %cst_6 {dimension_numbers = #tpu.dot_dimension_numbers<[1], [0], [0], [1], [0, 0, 1, 1], [], []>} : vector<200x432xf32>, vector<432x16xf32>, vector<200x16xf32> -> vector<200x16xf32>
    %7 = arith.maximumf %3, %6 : vector<200x16xf32>
    %c0_7 = arith.constant 0 : index
    %c400 = arith.constant 400 : index
    %c0_8 = arith.constant 0 : index
    %8 = vector.load %arg1[%c0_7, %c400, %c0_8] : memref<1x800x432xf32, #tpu.memory_space<vmem>>, vector<1x200x432xf32>
    %9 = vector.shape_cast %8 : vector<1x200x432xf32> to vector<200x432xf32>
    %cst_9 = arith.constant dense<0.000000e+00> : vector<200x16xf32>
    %10 = tpu.matmul %9, %0, %cst_9 {dimension_numbers = #tpu.dot_dimension_numbers<[1], [0], [0], [1], [0, 0, 1, 1], [], []>} : vector<200x432xf32>, vector<432x16xf32>, vector<200x16xf32> -> vector<200x16xf32>
    %c0_10 = arith.constant 0 : index
    %c600 = arith.constant 600 : index
    %c0_11 = arith.constant 0 : index
    %11 = vector.load %arg1[%c0_10, %c600, %c0_11] : memref<1x800x432xf32, #tpu.memory_space<vmem>>, vector<1x200x432xf32>
    %12 = vector.shape_cast %11 : vector<1x200x432xf32> to vector<200x432xf32>
    %cst_12 = arith.constant dense<0.000000e+00> : vector<200x16xf32>
    %13 = tpu.matmul %12, %0, %cst_12 {dimension_numbers = #tpu.dot_dimension_numbers<[1], [0], [0], [1], [0, 0, 1, 1], [], []>} : vector<200x432xf32>, vector<432x16xf32>, vector<200x16xf32> -> vector<200x16xf32>
    %14 = arith.maximumf %10, %13 : vector<200x16xf32>
    %15 = arith.maximumf %7, %14 : vector<200x16xf32>
    %16 = vector.extract_strided_slice %15 {offsets = [0, 0], sizes = [196, 16], strides = [1, 1]} : vector<200x16xf32> to vector<196x16xf32>
    %c0_13 = arith.constant 0 : index
    %c0_14 = arith.constant 0 : index
    %17 = vector.load %arg3[%c0_13, %c0_14] : memref<1x16xf32, #tpu.memory_space<vmem>>, vector<1x16xf32>
    %18 = vector.broadcast %17 : vector<1x16xf32> to vector<196x16xf32>
    %19 = arith.addf %16, %18 : vector<196x16xf32>
    %cst_15 = arith.constant 0.000000e+00 : f32
    %20 = vector.broadcast %cst_15 : f32 to vector<196x16xf32>
    %21 = arith.maximumf %19, %20 : vector<196x16xf32>
    %22 = vector.shape_cast %21 : vector<196x16xf32> to vector<1x196x16xf32>
    %c0_16 = arith.constant 0 : index
    %c0_17 = arith.constant 0 : index
    %c0_18 = arith.constant 0 : index
    %23 = vector.load %arg4[%c0_16, %c0_17, %c0_18] : memref<1x196x16xf32, #tpu.memory_space<vmem>>, vector<1x196x16xf32>
    tpu.vector_store %arg4[%c0_16, %c0_17, %c0_18], %22 {strides = array<i32>} : memref<1x196x16xf32, #tpu.memory_space<vmem>>, vector<1x196x16xf32>,
    return
  }
  func.func @transform_0(%arg0: i32) -> (i32, i32, i32) {
    %c0_i32 = arith.constant 0 : i32
    %c0_i32_0 = arith.constant 0 : i32
    %c0_i32_1 = arith.constant 0 : i32
    return %arg0, %c0_i32, %c0_i32_0 : i32, i32, i32
  }
  func.func @transform_1(%arg0: i32) -> (i32, i32) {
    %c0_i32 = arith.constant 0 : i32
    %c0_i32_0 = arith.constant 0 : i32
    %c0_i32_1 = arith.constant 0 : i32
    return %c0_i32, %c0_i32_0 : i32, i32
  }
  func.func @transform_2(%arg0: i32) -> (i32, i32) {
    %c0_i32 = arith.constant 0 : i32
    %c0_i32_0 = arith.constant 0 : i32
    %c0_i32_1 = arith.constant 0 : i32
    return %c0_i32, %c0_i32_0 : i32, i32
  }
  func.func @transform_3(%arg0: i32) -> (i32, i32, i32) {
    %c0_i32 = arith.constant 0 : i32
    %c0_i32_0 = arith.constant 0 : i32
    %c0_i32_1 = arith.constant 0 : i32
    return %arg0, %c0_i32, %c0_i32_0 : i32, i32, i32
  }
}

module attributes {stable_mosaic.version = 11 : i64} {
  func.func @_fc_kernel(%arg0: memref<2x3136xf32, #tpu.memory_space<vmem>>, %arg1: memref<3136x6xf32, #tpu.memory_space<vmem>>, %arg2: memref<1x6xf32, #tpu.memory_space<vmem>>, %arg3: memref<2x6xf32, #tpu.memory_space<vmem>>) attributes {dimension_semantics = [], scalar_prefetch = 0 : i64, scratch_operands = 0 : i64, tpu.core_type = #tpu.core_type<tc>} {
    %c0 = arith.constant 0 : index
    %c0_0 = arith.constant 0 : index
    %0 = vector.load %arg0[%c0, %c0_0] : memref<2x3136xf32, #tpu.memory_space<vmem>>, vector<2x3136xf32>
    %c0_1 = arith.constant 0 : index
    %c0_2 = arith.constant 0 : index
    %1 = vector.load %arg1[%c0_1, %c0_2] : memref<3136x6xf32, #tpu.memory_space<vmem>>, vector<3136x6xf32>
    %cst = arith.constant dense<0.000000e+00> : vector<2x6xf32>
    %2 = tpu.matmul %0, %1, %cst {dimension_numbers = #tpu.dot_dimension_numbers<[1], [0], [0], [1], [0, 0, 1, 1], [], []>} : vector<2x3136xf32>, vector<3136x6xf32>, vector<2x6xf32> -> vector<2x6xf32>
    %c0_3 = arith.constant 0 : index
    %c0_4 = arith.constant 0 : index
    %3 = vector.load %arg2[%c0_3, %c0_4] : memref<1x6xf32, #tpu.memory_space<vmem>>, vector<1x6xf32>
    %4 = vector.broadcast %3 : vector<1x6xf32> to vector<2x6xf32>
    %5 = arith.addf %2, %4 : vector<2x6xf32>
    %c0_5 = arith.constant 0 : index
    %c0_6 = arith.constant 0 : index
    %6 = vector.load %arg3[%c0_5, %c0_6] : memref<2x6xf32, #tpu.memory_space<vmem>>, vector<2x6xf32>
    tpu.vector_store %arg3[%c0_5, %c0_6], %5 {strides = array<i32>} : memref<2x6xf32, #tpu.memory_space<vmem>>, vector<2x6xf32>,
    return
  }
}

</mosaic_0001>

<bundles_post_ra>
// kernel: cnn_jammer_forward.2
= control target key start
LH: loop header
LB: loop body
LE: loop exit
PB: predicated region body
PF: predicated region fallthrough
CT: control target
= control target key end

     0   :  { %s3334_s12 = smov 0   ;;  %s4595_s0 = inlined_call_operand.vmem [shape: f32[2,800,432], index: 0, kind: input, shape index: {}]   ;;  %s4596_s1 = inlined_call_operand.vmem [shape: f32[432,16], index: 1, kind: input, shape index: {}]   ;;  %s4597_s2 = inlined_call_operand.vmem [shape: f32[1,16], index: 2, kind: input, shape index: {}]   ;;  %s4598_s3 = inlined_call_operand.vmem [shape: f32[2,196,16], index: 3, kind: output, shape index: {}]  }
   0x1 LB: > { %s2660_s13 = sadd.s32 4294967295, %s3311_s12   ;;  %p2664_p0 = scmp.ge.s32.totalorder %s3311_s12, 1  ;;  %s3311_s12 = sphi %s3334_s12, %s13_s12  }
   0x2   : > { %p137_p1 = scmp.lt.s32.totalorder %s3311_s12, 3 }
   0x4   : > { %p138_p2 = pnand %p2664_p0, %p137_p1 }
   0x5   : > { %v171_v0 = vld [vmem:[%s4596_s1] sm:$0xff] (!%p138_p2)  ;;  %v172_v1 = vld [vmem:[%s4596_s1 + $0x8] sm:$0xff] (!%p138_p2)  ;;  %v173_v2 = vld [vmem:[%s4596_s1 + $0x10] sm:$0xff] (!%p138_p2)  ;;  %p161_p3 = scmp.lt.s32.totalorder (!%p138_p2), %s2660_s13, 1  ;;  %v3313_v3 = vmov (!%p138_p2), 0.0|0.0   ;;  %vm325_vm0 = vcmask (!%p138_p2), 392192  }
   0x6   : > { %141 = sbr.rel (%p138_p2) target bundleno = 688 (0x2b0), region = 32  ;;  %2770 = vmatprep.subr.bf16.mxu0 (!%p138_p2), %v3313_v3  ;;  %2851 = vmatprep.subr.bf16.mxu1 (!%p138_p2), %v3313_v3  ;;  %v3353_v4 = vpack.c.bf16 (!%p138_p2), %v172_v1, %v171_v0  ;;  %v174_v5 = vld [vmem:[%s4596_s1 + $0x18] sm:$0xff] (!%p138_p2)  ;;  %v175_v7 = vld [vmem:[%s4596_s1 + $0x20] sm:$0xff] (!%p138_p2)  ;;  %v176_v8 = vld [vmem:[%s4596_s1 + $0x28] sm:$0xff] (!%p138_p2)  ;;  %vm2578_vm1 = vcmask (!%p138_p2), 130048   ;;  %vm2603_vm2 = vcmask (!%p138_p2), 125952  }
   0x7   : > { %v3362_v6 = vpack.c.bf16 (!%p138_p2), %v174_v5, %v173_v2  ;;  %v3375_v9 = vpack.c.bf16 (!%p138_p2), %v176_v8, %v175_v7  ;;  %v177_v10 = vld [vmem:[%s4596_s1 + $0x30] sm:$0xff] (!%p138_p2)  ;;  %v178_v11 = vld [vmem:[%s4596_s1 + $0x38] sm:$0xff] (!%p138_p2)  ;;  %v179_v15 = vld [vmem:[%s4596_s1 + $0x40] sm:$0xff] (!%p138_p2) }
   0x8   : > { %2772 = vmatpush1.bf16.msra.mxu0 (!%p138_p2), %v3353_v4  ;;  %2853 = vmatpush1.bf16.msra.mxu1 (!%p138_p2), %v3353_v4  ;;  %v3393_v13 = vpack.c.bf16 (!%p138_p2), %v178_v11, %v177_v10  ;;  %v180_v16 = vld [vmem:[%s4596_s1 + $0x48] sm:$0xff] (!%p138_p2)  ;;  %v181_v18 = vld [vmem:[%s4596_s1 + $0x50] sm:$0xff] (!%p138_p2)  ;;  %v182_v19 = vld [vmem:[%s4596_s1 + $0x58] sm:$0xff] (!%p138_p2) }
   0x9   : > { %2773 = vmatprep.subr.bf16.mxu0 (!%p138_p2), %v3313_v3  ;;  %2854 = vmatprep.subr.bf16.mxu1 (!%p138_p2), %v3313_v3  ;;  %v3406_v17 = vpack.c.bf16 (!%p138_p2), %v180_v16, %v179_v15  ;;  %v3418_v20 = vpack.c.bf16 (!%p138_p2), %v182_v19, %v181_v18  ;;  %v183_v21 = vld [vmem:[%s4596_s1 + $0x60] sm:$0xff] (!%p138_p2)  ;;  %v184_v22 = vld [vmem:[%s4596_s1 + $0x68] sm:$0xff] (!%p138_p2)  ;;  %v185_v24 = vld [vmem:[%s4596_s1 + $0x70] sm:$0xff] (!%p138_p2) }
   0xa   : > { %v3430_v23 = vpack.c.bf16 (!%p138_p2), %v184_v22, %v183_v21  ;;  %v186_v25 = vld [vmem:[%s4596_s1 + $0x78] sm:$0xff] (!%p138_p2)  ;;  %v187_v27 = vld [vmem:[%s4596_s1 + $0x80] sm:$0xff] (!%p138_p2)  ;;  %v188_v28 = vld [vmem:[%s4596_s1 + $0x88] sm:$0xff] (!%p138_p2) }
   0xb   : > { %v3442_v26 = vpack.c.bf16 (!%p138_p2), %v186_v25, %v185_v24  ;;  %v3454_v29 = vpack.c.bf16 (!%p138_p2), %v188_v28, %v187_v27  ;;  %v189_v30 = vld [vmem:[%s4596_s1 + $0x90] sm:$0xff] (!%p138_p2)  ;;  %v190_v31 = vld [vmem:[%s4596_s1 + $0x98] sm:$0xff] (!%p138_p2)  ;;  %v191_v33 = vld [vmem:[%s4596_s1 + $0xa0] sm:$0xff] (!%p138_p2) }
   0xc   : > { %2775 = vmatpush1.bf16.msra.mxu0 (!%p138_p2), %v3362_v6  ;;  %2856 = vmatpush1.bf16.msra.mxu1 (!%p138_p2), %v3362_v6  ;;  %v3466_v32 = vpack.c.bf16 (!%p138_p2), %v190_v31, %v189_v30  ;;  %v192_v34 = vld [vmem:[%s4596_s1 + $0xa8] sm:$0xff] (!%p138_p2)  ;;  %v193_v36 = vld [vmem:[%s4596_s1 + $0xb0] sm:$0xff] (!%p138_p2)  ;;  %v194_v37 = vld [vmem:[%s4596_s1 + $0xb8] sm:$0xff] (!%p138_p2) }
   0xd   : > { %s4624_s13 = smov (!%p161_p3, %s2660_s13), 1  ;;  %2776 = vmatprep.subr.bf16.mxu0 %v3313_v3  ;;  %2857 = vmatprep.subr.bf16.mxu1 %v3313_v3  ;;  %v3478_v35 = vpack.c.bf16 %v192_v34, %v191_v33  ;;  %v3490_v38 = vpack.c.bf16 %v194_v37, %v193_v36  ;;  %v195_v39 = vld [vmem:[%s4596_s1 + $0xc0] sm:$0xff]  ;;  %v196_v40 = vld [vmem:[%s4596_s1 + $0xc8] sm:$0xff]  ;;  %v197_v42 = vld [vmem:[%s4596_s1 + $0xd0] sm:$0xff] }
   0xe   : > { %s3294_s26 = smul.u32 3200, %s4624_s13  ;;  %v3502_v41 = vpack.c.bf16 %v196_v40, %v195_v39  ;;  %v198_v43 = vld [vmem:[%s4596_s1 + $0xd8] sm:$0xff]  ;;  %v199_v45 = vld [vmem:[%s4596_s1 + $0xe0] sm:$0xff]  ;;  %v200_v46 = vld [vmem:[%s4596_s1 + $0xe8] sm:$0xff] }
   0xf   : > { %v3514_v44 = vpack.c.bf16 %v198_v43, %v197_v42  ;;  %v3526_v47 = vpack.c.bf16 %v200_v46, %v199_v45  ;;  %v201_v48 = vld [vmem:[%s4596_s1 + $0xf0] sm:$0xff]  ;;  %v202_v49 = vld [vmem:[%s4596_s1 + $0xf8] sm:$0xff]  ;;  %v203_v51 = vld [vmem:[%s4596_s1 + $0x100] sm:$0xff] }
  0x10   : > { %s3380_s29 = scalar_lea.vmem %s4595_s0, %s3294_s26  ;;  %2778 = vmatpush1.bf16.msra.mxu0 %v3375_v9  ;;  %2859 = vmatpush1.bf16.msra.mxu1 %v3375_v9  ;;  %v3538_v50 = vpack.c.bf16 %v202_v49, %v201_v48  ;;  %v204_v52 = vld [vmem:[%s4596_s1 + $0x108] sm:$0xff]  ;;  %v205_v58 = vld [vmem:[%s4596_s1 + $0x110] sm:$0xff]  ;;  %v206_v59 = vld [vmem:[%s4596_s1 + $0x118] sm:$0xff] }
  0x11   : > { %v226_v12 = vld [vmem:[%s3380_s29 + $0x8] sm:$0xff]  ;;  %2779 = vmatprep.subr.bf16.mxu0 %v3313_v3  ;;  %2860 = vmatprep.subr.bf16.mxu1 %v3313_v3  ;;  %v225_v53 = vld [vmem:[%s3380_s29] sm:$0xff]  ;;  %v3552_v55 = vpack.c.bf16 %v204_v52, %v203_v51  ;;  %v3570_v0 = vpack.c.bf16 %v206_v59, %v205_v58  ;;  %v213_v33 = vld [vmem:[%s4596_s1 + $0x150] sm:$0xff] }
  0x12   : > { %v782_v14 = vld [vmem:[%s3380_s29 + $0x328] sm:$0xff]  ;;  %465 = vmatprep.mubr.f32.mxu0 %v226_v12  ;;  %v781_v54 = vld [vmem:[%s3380_s29 + $0x320] sm:$0xff]  ;;  %v209_v12 = vld [vmem:[%s4596_s1 + $0x130] sm:$0xff] }
  0x13   : > { %1020 = vmatprep.mubr.f32.mxu1 %v782_v14  ;;  %v230_v56 = vld [vmem:[%s3380_s29 + $0x28] sm:$0xff]  ;;  %v229_v60 = vld [vmem:[%s3380_s29 + $0x20] sm:$0xff]  ;;  %v210_v14 = vld [vmem:[%s4596_s1 + $0x138] sm:$0xff] }
  0x14   : > { %2781 = vmatpush1.bf16.msra.mxu0 %v3393_v13  ;;  %2862 = vmatpush1.bf16.msra.mxu1 %v3393_v13  ;;  %v786_v57 = vld [vmem:[%s3380_s29 + $0x348] sm:$0xff]  ;;  %v785_v61 = vld [vmem:[%s3380_s29 + $0x340] sm:$0xff]  ;;  %v3602_v21 = vpack.c.bf16 %v210_v14, %v209_v12  ;;  %v214_v34 = vld [vmem:[%s4596_s1 + $0x158] sm:$0xff] }
  0x15   : > { %2782 = vmatprep.subr.bf16.mxu0 %v3313_v3  ;;  %2863 = vmatprep.subr.bf16.mxu1 %v3313_v3  ;;  %v234_v62 = vld [vmem:[%s3380_s29 + $0x48] sm:$0xff]  ;;  %v207_v1 = vld [vmem:[%s4596_s1 + $0x120] sm:$0xff]  ;;  %v3634_v42 = vpack.c.bf16 %v214_v34, %v213_v33 }
  0x16   : > { %v790_v63 = vld [vmem:[%s3380_s29 + $0x368] sm:$0xff]  ;;  %v233_v5 = vld [vmem:[%s3380_s29 + $0x40] sm:$0xff] }
  0x17   : > { %v208_v2 = vld [vmem:[%s4596_s1 + $0x128] sm:$0xff]  ;;  %v789_v7 = vld [vmem:[%s3380_s29 + $0x360] sm:$0xff] }
  0x18   : > { %2784 = vmatpush1.bf16.msra.mxu0 %v3406_v17  ;;  %2865 = vmatpush1.bf16.msra.mxu1 %v3406_v17  ;;  %v238_v8 = vld [vmem:[%s3380_s29 + $0x68] sm:$0xff]  ;;  %v3586_v11 = vpack.c.bf16 %v208_v2, %v207_v1  ;;  %v237_v15 = vld [vmem:[%s3380_s29 + $0x60] sm:$0xff] }
  0x19   : > { %2785 = vmatprep.subr.bf16.mxu0 %v3313_v3  ;;  %2866 = vmatprep.subr.bf16.mxu1 %v3313_v3  ;;  %v794_v10 = vld [vmem:[%s3380_s29 + $0x388] sm:$0xff]  ;;  %v793_v16 = vld [vmem:[%s3380_s29 + $0x380] sm:$0xff] }
  0x1a   : > { %v242_v18 = vld [vmem:[%s3380_s29 + $0x88] sm:$0xff]  ;;  %v211_v22 = vld [vmem:[%s4596_s1 + $0x140] sm:$0xff] }
  0x1b   : > { %v798_v19 = vld [vmem:[%s3380_s29 + $0x3a8] sm:$0xff]  ;;  %v241_v25 = vld [vmem:[%s3380_s29 + $0x80] sm:$0xff] }
  0x1c   : > { %2787 = vmatpush1.bf16.msra.mxu0 %v3418_v20  ;;  %2868 = vmatpush1.bf16.msra.mxu1 %v3418_v20  ;;  %v212_v24 = vld [vmem:[%s4596_s1 + $0x148] sm:$0xff]  ;;  %v797_v27 = vld [vmem:[%s3380_s29 + $0x3a0] sm:$0xff] }
  0x1d   : > { %2788 = vmatprep.subr.bf16.mxu0 %v3313_v3  ;;  %2869 = vmatprep.subr.bf16.mxu1 %v3313_v3  ;;  %v246_v28 = vld [vmem:[%s3380_s29 + $0xa8] sm:$0xff]  ;;  %v3618_v31 = vpack.c.bf16 %v212_v24, %v211_v22  ;;  %v245_v36 = vld [vmem:[%s3380_s29 + $0xa0] sm:$0xff] }
  0x1e   : > { %v802_v30 = vld [vmem:[%s3380_s29 + $0x3c8] sm:$0xff]  ;;  %v801_v37 = vld [vmem:[%s3380_s29 + $0x3c0] sm:$0xff] }
  0x1f   : > { %v250_v39 = vld [vmem:[%s3380_s29 + $0xc8] sm:$0xff]  ;;  %v215_v43 = vld [vmem:[%s4596_s1 + $0x160] sm:$0xff] }
  0x20   : > { %2790 = vmatpush1.bf16.msra.mxu0 %v3430_v23  ;;  %2871 = vmatpush1.bf16.msra.mxu1 %v3430_v23  ;;  %v806_v40 = vld [vmem:[%s3380_s29 + $0x3e8] sm:$0xff]  ;;  %v249_v46 = vld [vmem:[%s3380_s29 + $0xc0] sm:$0xff] }
  0x21   : > { %2791 = vmatprep.subr.bf16.mxu0 %v3313_v3  ;;  %2872 = vmatprep.subr.bf16.mxu1 %v3313_v3  ;;  %v216_v45 = vld [vmem:[%s4596_s1 + $0x168] sm:$0xff]  ;;  %v805_v48 = vld [vmem:[%s3380_s29 + $0x3e0] sm:$0xff] }
  0x22   : > { %v254_v49 = vld [vmem:[%s3380_s29 + $0xe8] sm:$0xff]  ;;  %v3650_v52 = vpack.c.bf16 %v216_v45, %v215_v43  ;;  %v813_v1 = vld [vmem:[%s3380_s29 + $0x420] sm:$0xff] }
  0x23   : > { %v810_v51 = vld [vmem:[%s3380_s29 + $0x408] sm:$0xff]  ;;  %v261_v12 = vld [vmem:[%s3380_s29 + $0x120] sm:$0xff] }
  0x24   : > { %2793 = vmatpush1.bf16.msra.mxu0 %v3442_v26  ;;  %2874 = vmatpush1.bf16.msra.mxu1 %v3442_v26  ;;  %v258_v58 = vld [vmem:[%s3380_s29 + $0x108] sm:$0xff]  ;;  %v817_v14 = vld [vmem:[%s3380_s29 + $0x440] sm:$0xff] }
  0x25   : > { %2794 = vmatprep.subr.bf16.mxu0 %v3313_v3  ;;  %2875 = vmatprep.subr.bf16.mxu1 %v3313_v3  ;;  %v814_v59 = vld [vmem:[%s3380_s29 + $0x428] sm:$0xff]  ;;  %v265_v24 = vld [vmem:[%s3380_s29 + $0x140] sm:$0xff] }
  0x26   : > { %v262_v2 = vld [vmem:[%s3380_s29 + $0x128] sm:$0xff]  ;;  %v269_v33 = vld [vmem:[%s3380_s29 + $0x160] sm:$0xff] }
  0x27   : > { %v224_v22 = vld [vmem:[%s4596_s1 + $0x1a8] sm:$0xff]  ;;  %v825_v34 = vld [vmem:[%s3380_s29 + $0x480] sm:$0xff] }
  0x28   : > { %2796 = vmatpush1.bf16.msra.mxu0 %v3454_v29  ;;  %2877 = vmatpush1.bf16.msra.mxu1 %v3454_v29  ;;  %v278_v43 = vld [vmem:[%s3380_s29 + $0x1a8] sm:$0xff] }
  0x29   : > { %2797 = vmatprep.subr.bf16.mxu0 %v3313_v3  ;;  %2878 = vmatprep.subr.bf16.mxu1 %v3313_v3  ;;  %v834_v45 = vld [vmem:[%s3380_s29 + $0x4c8] sm:$0xff] }
  0x2c   : > { %2799 = vmatpush1.bf16.msra.mxu0 %v3466_v32  ;;  %2880 = vmatpush1.bf16.msra.mxu1 %v3466_v32 }
  0x2d   : > { %2800 = vmatprep.subr.bf16.mxu0 %v3313_v3  ;;  %2881 = vmatprep.subr.bf16.mxu1 %v3313_v3 }
  0x30   : > { %2802 = vmatpush1.bf16.msra.mxu0 %v3478_v35  ;;  %2883 = vmatpush1.bf16.msra.mxu1 %v3478_v35 }
  0x31   : > { %2803 = vmatprep.subr.bf16.mxu0 %v3313_v3  ;;  %2884 = vmatprep.subr.bf16.mxu1 %v3313_v3 }
  0x34   : > { %2805 = vmatpush1.bf16.msra.mxu0 %v3490_v38  ;;  %2886 = vmatpush1.bf16.msra.mxu1 %v3490_v38 }
  0x35   : > { %2806 = vmatprep.subr.bf16.mxu0 %v3313_v3  ;;  %2887 = vmatprep.subr.bf16.mxu1 %v3313_v3 }
  0x38   : > { %2808 = vmatpush1.bf16.msra.mxu0 %v3502_v41  ;;  %2889 = vmatpush1.bf16.msra.mxu1 %v3502_v41 }
  0x39   : > { %2809 = vmatprep.subr.bf16.mxu0 %v3313_v3  ;;  %2890 = vmatprep.subr.bf16.mxu1 %v3313_v3 }
  0x3c   : > { %2811 = vmatpush1.bf16.msra.mxu0 %v3514_v44  ;;  %2892 = vmatpush1.bf16.msra.mxu1 %v3514_v44 }
  0x3d   : > { %2812 = vmatprep.subr.bf16.mxu0 %v3313_v3  ;;  %2893 = vmatprep.subr.bf16.mxu1 %v3313_v3 }
  0x40   : > { %2814 = vmatpush1.bf16.msra.mxu0 %v3526_v47  ;;  %2895 = vmatpush1.bf16.msra.mxu1 %v3526_v47 }
  0x41   : > { %2815 = vmatprep.subr.bf16.mxu0 %v3313_v3  ;;  %2896 = vmatprep.subr.bf16.mxu1 %v3313_v3 }
  0x44   : > { %2817 = vmatpush1.bf16.msra.mxu0 %v3538_v50  ;;  %2898 = vmatpush1.bf16.msra.mxu1 %v3538_v50 }
  0x45   : > { %2818 = vmatprep.subr.bf16.mxu0 %v3313_v3  ;;  %2899 = vmatprep.subr.bf16.mxu1 %v3313_v3 }
  0x47   : > { %466 = vmatmul.mubr.f32.vlgmr.msra.gmra.mrb[0].mxu0 %v225_v53  ;;  %1021 = vmatmul.mubr.f32.vlgmr.msra.gmra.mrb[0].mxu1 %v781_v54  ;;  %v217_v53 = vld [vmem:[%s4596_s1 + $0x170] sm:$0xff]  ;;  %v218_v54 = vld [vmem:[%s4596_s1 + $0x178] sm:$0xff] }
  0x48   : > { %2820 = vmatpush1.bf16.msra.mxu0 %v3552_v55  ;;  %2901 = vmatpush1.bf16.msra.mxu1 %v3552_v55 }
  0x49   : > { %470 = vmatprep.mubr.f32.mxu0 %v230_v56  ;;  %1025 = vmatprep.mubr.f32.mxu1 %v786_v57  ;;  %v253_v56 = vld [vmem:[%s3380_s29 + $0xe0] sm:$0xff] }
  0x4a   : > { %2821 = vmatprep.subr.bf16.mxu0 %v3313_v3  ;;  %2902 = vmatprep.subr.bf16.mxu1 %v3313_v3  ;;  %v809_v57 = vld [vmem:[%s3380_s29 + $0x400] sm:$0xff] }
  0x4b   : > { %471 = vmatmul.mubr.f32.gmra.mrb[2].mxu0 %v229_v60  ;;  %1026 = vmatmul.mubr.f32.gmra.mrb[2].mxu1 %v785_v61  ;;  %v3666_v60 = vpack.c.bf16 %v218_v54, %v217_v53  ;;  %v219_v61 = vld [vmem:[%s4596_s1 + $0x180] sm:$0xff] }
  0x4c   : > { %475 = vmatprep.mubr.f32.mxu0 %v234_v62  ;;  %1030 = vmatprep.mubr.f32.mxu1 %v790_v63  ;;  %v220_v62 = vld [vmem:[%s4596_s1 + $0x188] sm:$0xff]  ;;  %v257_v63 = vld [vmem:[%s3380_s29 + $0x100] sm:$0xff] }
  0x4d   : > { %2823 = vmatpush1.bf16.msra.mxu0 %v3570_v0  ;;  %2904 = vmatpush1.bf16.msra.mxu1 %v3570_v0  ;;  %v281_v53 = vld [vmem:[%s3380_s29 + $0x1c0] sm:$0xff] }
  0x4e   : > { %2824 = vmatprep.subr.bf16.mxu0 %v3313_v3  ;;  %2905 = vmatprep.subr.bf16.mxu1 %v3313_v3  ;;  %v837_v54 = vld [vmem:[%s3380_s29 + $0x4e0] sm:$0xff] }
  0x4f   : > { %476 = vmatmul.mubr.f32.gmra.mrb[4].mxu0 %v233_v5  ;;  %1031 = vmatmul.mubr.f32.gmra.mrb[4].mxu1 %v789_v7  ;;  %v818_v5 = vld [vmem:[%s3380_s29 + $0x448] sm:$0xff]  ;;  %v3682_v7 = vpack.c.bf16 %v220_v62, %v219_v61 }
  0x50   : > { %480 = vmatprep.mubr.f32.mxu0 %v238_v8  ;;  %1035 = vmatprep.mubr.f32.mxu1 %v794_v10  ;;  %v221_v8 = vld [vmem:[%s4596_s1 + $0x190] sm:$0xff]  ;;  %v222_v10 = vld [vmem:[%s4596_s1 + $0x198] sm:$0xff]  ;;  %v290_v61 = vld [vmem:[%s3380_s29 + $0x208] sm:$0xff] }
  0x51   : > { %2826 = vmatpush1.bf16.msra.mxu0 %v3586_v11  ;;  %2907 = vmatpush1.bf16.msra.mxu1 %v3586_v11  ;;  %v846_v62 = vld [vmem:[%s3380_s29 + $0x528] sm:$0xff] }
  0x52   : > { %2827 = vmatprep.subr.bf16.mxu0 %v3313_v3  ;;  %2908 = vmatprep.subr.bf16.mxu1 %v3313_v3 }
  0x53   : > { %481 = vmatmul.mubr.f32.gmra.mrb[6].mxu0 %v237_v15  ;;  %1036 = vmatmul.mubr.f32.gmra.mrb[6].mxu1 %v793_v16  ;;  %v266_v15 = vld [vmem:[%s3380_s29 + $0x148] sm:$0xff] }
  0x54   : > { %485 = vmatprep.mubr.f32.mxu0 %v242_v18  ;;  %1040 = vmatprep.mubr.f32.mxu1 %v798_v19  ;;  %v822_v16 = vld [vmem:[%s3380_s29 + $0x468] sm:$0xff]  ;;  %v3698_v18 = vpack.c.bf16 %v222_v10, %v221_v8  ;;  %v223_v19 = vld [vmem:[%s4596_s1 + $0x1a0] sm:$0xff] }
  0x55   : > { %2829 = vmatpush1.bf16.msra.mxu0 %v3602_v21  ;;  %2910 = vmatpush1.bf16.msra.mxu1 %v3602_v21  ;;  %v293_v8 = vld [vmem:[%s3380_s29 + $0x220] sm:$0xff] }
  0x56   : > { %2830 = vmatprep.subr.bf16.mxu0 %v3313_v3  ;;  %2911 = vmatprep.subr.bf16.mxu1 %v3313_v3  ;;  %v849_v10 = vld [vmem:[%s3380_s29 + $0x540] sm:$0xff] }
  0x57   : > { %486 = vmatmul.mubr.f32.gmra.mrb[8].mxu0 %v241_v25  ;;  %1041 = vmatmul.mubr.f32.gmra.mrb[8].mxu1 %v797_v27  ;;  %v821_v25 = vld [vmem:[%s3380_s29 + $0x460] sm:$0xff]  ;;  %v270_v27 = vld [vmem:[%s3380_s29 + $0x168] sm:$0xff] }
  0x58   : > { %490 = vmatprep.mubr.f32.mxu0 %v246_v28  ;;  %1045 = vmatprep.mubr.f32.mxu1 %v802_v30  ;;  %v826_v28 = vld [vmem:[%s3380_s29 + $0x488] sm:$0xff]  ;;  %v3714_v30 = vpack.c.bf16 %v224_v22, %v223_v19 }
  0x59   : > { %2832 = vmatpush1.bf16.msra.mxu0 %v3618_v31  ;;  %2913 = vmatpush1.bf16.msra.mxu1 %v3618_v31  ;;  %v302_v19 = vld [vmem:[%s3380_s29 + $0x268] sm:$0xff] }
  0x5a   : > { %2833 = vmatprep.subr.bf16.mxu0 %v3313_v3  ;;  %2914 = vmatprep.subr.bf16.mxu1 %v3313_v3  ;;  %v858_v22 = vld [vmem:[%s3380_s29 + $0x588] sm:$0xff] }
  0x5b   : > { %491 = vmatmul.mubr.f32.gmra.mrb[10].mxu0 %v245_v36  ;;  %1046 = vmatmul.mubr.f32.gmra.mrb[10].mxu1 %v801_v37  ;;  %v274_v36 = vld [vmem:[%s3380_s29 + $0x188] sm:$0xff] }
  0x5c   : > { %495 = vmatprep.mubr.f32.mxu0 %v250_v39  ;;  %1050 = vmatprep.mubr.f32.mxu1 %v806_v40  ;;  %v830_v37 = vld [vmem:[%s3380_s29 + $0x4a8] sm:$0xff]  ;;  %v273_v39 = vld [vmem:[%s3380_s29 + $0x180] sm:$0xff] }
  0x5d   : > { %2835 = vmatpush1.bf16.msra.mxu0 %v3634_v42  ;;  %2916 = vmatpush1.bf16.msra.mxu1 %v3634_v42  ;;  %v829_v40 = vld [vmem:[%s3380_s29 + $0x4a0] sm:$0xff] }
  0x5e   : > { %2836 = vmatprep.subr.bf16.mxu0 %v3313_v3  ;;  %2917 = vmatprep.subr.bf16.mxu1 %v3313_v3 }
  0x5f   : > { %496 = vmatmul.mubr.f32.gmra.mrb[12].mxu0 %v249_v46  ;;  %1051 = vmatmul.mubr.f32.gmra.mrb[12].mxu1 %v805_v48  ;;  %v277_v46 = vld [vmem:[%s3380_s29 + $0x1a0] sm:$0xff] }
  0x60   : > { %500 = vmatprep.mubr.f32.mxu0 %v254_v49  ;;  %1055 = vmatprep.mubr.f32.mxu1 %v810_v51  ;;  %v833_v48 = vld [vmem:[%s3380_s29 + $0x4c0] sm:$0xff]  ;;  %v282_v49 = vld [vmem:[%s3380_s29 + $0x1c8] sm:$0xff] }
  0x61   : > { %2838 = vmatpush1.bf16.msra.mxu0 %v3650_v52  ;;  %2919 = vmatpush1.bf16.msra.mxu1 %v3650_v52  ;;  %v838_v51 = vld [vmem:[%s3380_s29 + $0x4e8] sm:$0xff] }
  0x62   : > { %2839 = vmatprep.subr.bf16.mxu0 %v3313_v3  ;;  %2920 = vmatprep.subr.bf16.mxu1 %v3313_v3 }
  0x63   : > { %501 = vmatmul.mubr.f32.gmra.mrb[14].mxu0 %v253_v56  ;;  %1056 = vmatmul.mubr.f32.gmra.mrb[14].mxu1 %v809_v57  ;;  %v286_v56 = vld [vmem:[%s3380_s29 + $0x1e8] sm:$0xff] }
  0x64   : > { %505 = vmatprep.mubr.f32.mxu0 %v258_v58  ;;  %1060 = vmatprep.mubr.f32.mxu1 %v814_v59  ;;  %v842_v57 = vld [vmem:[%s3380_s29 + $0x508] sm:$0xff]  ;;  %v285_v58 = vld [vmem:[%s3380_s29 + $0x1e0] sm:$0xff] }
  0x65   : > { %2841 = vmatpush1.bf16.msra.mxu0 %v3666_v60  ;;  %2922 = vmatpush1.bf16.msra.mxu1 %v3666_v60  ;;  %v841_v59 = vld [vmem:[%s3380_s29 + $0x500] sm:$0xff] }
  0x66   : > { %2842 = vmatprep.subr.bf16.mxu0 %v3313_v3  ;;  %2923 = vmatprep.subr.bf16.mxu1 %v3313_v3 }
  0x67   : > { %506 = vmatmul.mubr.f32.gmra.mrb[16].mxu0 %v257_v63  ;;  %1061 = vmatmul.mubr.f32.gmra.mrb[16].mxu1 %v813_v1  ;;  %v289_v63 = vld [vmem:[%s3380_s29 + $0x200] sm:$0xff] }
  0x68   : > { %510 = vmatprep.mubr.f32.mxu0 %v262_v2  ;;  %1065 = vmatprep.mubr.f32.mxu1 %v818_v5  ;;  %v845_v1 = vld [vmem:[%s3380_s29 + $0x520] sm:$0xff]  ;;  %v294_v2 = vld [vmem:[%s3380_s29 + $0x228] sm:$0xff] }
  0x69   : > { %2844 = vmatpush1.bf16.msra.mxu0 %v3682_v7  ;;  %2925 = vmatpush1.bf16.msra.mxu1 %v3682_v7  ;;  %v850_v5 = vld [vmem:[%s3380_s29 + $0x548] sm:$0xff] }
  0x6a   : > { %2845 = vmatprep.subr.bf16.mxu0 %v3313_v3  ;;  %2926 = vmatprep.subr.bf16.mxu1 %v3313_v3 }
  0x6b   : > { %511 = vmatmul.mubr.f32.gmra.mrb[18].mxu0 %v261_v12  ;;  %1066 = vmatmul.mubr.f32.gmra.mrb[18].mxu1 %v817_v14  ;;  %v298_v12 = vld [vmem:[%s3380_s29 + $0x248] sm:$0xff] }
  0x6c   : > { %515 = vmatprep.mubr.f32.mxu0 %v266_v15  ;;  %1070 = vmatprep.mubr.f32.mxu1 %v822_v16  ;;  %v854_v14 = vld [vmem:[%s3380_s29 + $0x568] sm:$0xff]  ;;  %v297_v15 = vld [vmem:[%s3380_s29 + $0x240] sm:$0xff] }
  0x6d   : > { %2847 = vmatpush1.bf16.msra.mxu0 %v3698_v18  ;;  %2928 = vmatpush1.bf16.msra.mxu1 %v3698_v18  ;;  %v853_v16 = vld [vmem:[%s3380_s29 + $0x560] sm:$0xff] }
  0x6e   : > { %2848 = vmatprep.subr.bf16.mxu0 %v3313_v3  ;;  %2929 = vmatprep.subr.bf16.mxu1 %v3313_v3 }
  0x6f   : > { %516 = vmatmul.mubr.f32.gmra.mrb[20].mxu0 %v265_v24  ;;  %1071 = vmatmul.mubr.f32.gmra.mrb[20].mxu1 %v821_v25  ;;  %v301_v24 = vld [vmem:[%s3380_s29 + $0x260] sm:$0xff] }
  0x70   : > { %520 = vmatprep.mubr.f32.mxu0 %v270_v27  ;;  %1075 = vmatprep.mubr.f32.mxu1 %v826_v28  ;;  %v857_v25 = vld [vmem:[%s3380_s29 + $0x580] sm:$0xff]  ;;  %v306_v27 = vld [vmem:[%s3380_s29 + $0x288] sm:$0xff] }
  0x71   : > { %2850 = vmatpush1.bf16.msra.mxu0 %v3714_v30  ;;  %2931 = vmatpush1.bf16.msra.mxu1 %v3714_v30  ;;  %v862_v28 = vld [vmem:[%s3380_s29 + $0x5a8] sm:$0xff] }
  0x72   : > { %2932 = vmatprep.subr.bf16.mxu0 %v3313_v3  ;;  %3013 = vmatprep.subr.bf16.mxu1 %v3313_v3 }
  0x73   : > { %521 = vmatmul.mubr.f32.gmra.mrb[22].mxu0 %v269_v33  ;;  %1076 = vmatmul.mubr.f32.gmra.mrb[22].mxu1 %v825_v34  ;;  %v305_v33 = vld [vmem:[%s3380_s29 + $0x280] sm:$0xff] }
  0x74   : > { %525 = vmatprep.mubr.f32.mxu0 %v274_v36  ;;  %1080 = vmatprep.mubr.f32.mxu1 %v830_v37  ;;  %v861_v34 = vld [vmem:[%s3380_s29 + $0x5a0] sm:$0xff]  ;;  %v310_v36 = vld [vmem:[%s3380_s29 + $0x2a8] sm:$0xff] }
  0x75   : > { %v866_v37 = vld [vmem:[%s3380_s29 + $0x5c8] sm:$0xff] }
  0x77   : > { %526 = vmatmul.mubr.f32.gmra.mrb[24].mxu0 %v273_v39  ;;  %1081 = vmatmul.mubr.f32.gmra.mrb[24].mxu1 %v829_v40  ;;  %v309_v39 = vld [vmem:[%s3380_s29 + $0x2a0] sm:$0xff] }
  0x78   : > { %530 = vmatprep.mubr.f32.mxu0 %v278_v43  ;;  %1085 = vmatprep.mubr.f32.mxu1 %v834_v45  ;;  %v865_v40 = vld [vmem:[%s3380_s29 + $0x5c0] sm:$0xff]  ;;  %v314_v43 = vld [vmem:[%s3380_s29 + $0x2c8] sm:$0xff] }
  0x79   : > { %v870_v45 = vld [vmem:[%s3380_s29 + $0x5e8] sm:$0xff] }
  0x7b   : > { %531 = vmatmul.mubr.f32.gmra.mrb[26].mxu0 %v277_v46  ;;  %1086 = vmatmul.mubr.f32.gmra.mrb[26].mxu1 %v833_v48  ;;  %v313_v46 = vld [vmem:[%s3380_s29 + $0x2c0] sm:$0xff] }
  0x7c   : > { %535 = vmatprep.mubr.f32.mxu0 %v282_v49  ;;  %1090 = vmatprep.mubr.f32.mxu1 %v838_v51  ;;  %v869_v48 = vld [vmem:[%s3380_s29 + $0x5e0] sm:$0xff]  ;;  %v318_v49 = vld [vmem:[%s3380_s29 + $0x2e8] sm:$0xff] }
  0x7d   : > { %v874_v51 = vld [vmem:[%s3380_s29 + $0x608] sm:$0xff] }
  0x7f   : > { %536 = vmatmul.mubr.f32.gmra.mrb[28].mxu0 %v281_v53  ;;  %1091 = vmatmul.mubr.f32.gmra.mrb[28].mxu1 %v837_v54  ;;  %v317_v53 = vld [vmem:[%s3380_s29 + $0x2e0] sm:$0xff] }
  0x80   : > { %540 = vmatprep.mubr.f32.mxu0 %v286_v56  ;;  %1095 = vmatprep.mubr.f32.mxu1 %v842_v57  ;;  %v873_v54 = vld [vmem:[%s3380_s29 + $0x600] sm:$0xff]  ;;  %v322_v56 = vld [vmem:[%s3380_s29 + $0x308] sm:$0xff] }
  0x81   : > { %v878_v57 = vld [vmem:[%s3380_s29 + $0x628] sm:$0xff] }
  0x83   : > { %541 = vmatmul.mubr.f32.gmra.mrb[30].mxu0 %v285_v58  ;;  %1096 = vmatmul.mubr.f32.gmra.mrb[30].mxu1 %v841_v59  ;;  %v321_v58 = vld [vmem:[%s3380_s29 + $0x300] sm:$0xff] }
  0x84   : > { %545 = vmatprep.mubr.f32.mxu0 %v290_v61  ;;  %1100 = vmatprep.mubr.f32.mxu1 %v846_v62  ;;  %v877_v59 = vld [vmem:[%s3380_s29 + $0x620] sm:$0xff]  ;;  %v228_v61 = vld [vmem:[%s3380_s29 + $0x18] sm:$0xff] }
  0x85   : > { %v784_v62 = vld [vmem:[%s3380_s29 + $0x338] sm:$0xff] }
  0x87   : > { %546 = vmatmul.mubr.f32.gmra.mrb[32].mxu0 %v289_v63  ;;  %1101 = vmatmul.mubr.f32.gmra.mrb[32].mxu1 %v845_v1  ;;  %v227_v63 = vld [vmem:[%s3380_s29 + $0x10] sm:$0xff] }
  0x88   : > { %550 = vmatprep.mubr.f32.mxu0 %v294_v2  ;;  %1105 = vmatprep.mubr.f32.mxu1 %v850_v5  ;;  %v783_v1 = vld [vmem:[%s3380_s29 + $0x330] sm:$0xff]  ;;  %v232_v2 = vld [vmem:[%s3380_s29 + $0x38] sm:$0xff] }
  0x89   : > { %v788_v5 = vld [vmem:[%s3380_s29 + $0x358] sm:$0xff] }
  0x8b   : > { %551 = vmatmul.mubr.f32.gmra.mrb[34].mxu0 %v293_v8  ;;  %1106 = vmatmul.mubr.f32.gmra.mrb[34].mxu1 %v849_v10  ;;  %v231_v8 = vld [vmem:[%s3380_s29 + $0x30] sm:$0xff] }
  0x8c   : > { %555 = vmatprep.mubr.f32.mxu0 %v298_v12  ;;  %1110 = vmatprep.mubr.f32.mxu1 %v854_v14  ;;  %v787_v10 = vld [vmem:[%s3380_s29 + $0x350] sm:$0xff]  ;;  %v236_v12 = vld [vmem:[%s3380_s29 + $0x58] sm:$0xff] }
  0x8d   : > { %v792_v14 = vld [vmem:[%s3380_s29 + $0x378] sm:$0xff] }
  0x8f   : > { %556 = vmatmul.mubr.f32.gmra.mrb[36].mxu0 %v297_v15  ;;  %1111 = vmatmul.mubr.f32.gmra.mrb[36].mxu1 %v853_v16  ;;  %v791_v15 = vld [vmem:[%s3380_s29 + $0x370] sm:$0xff]  ;;  %v240_v16 = vld [vmem:[%s3380_s29 + $0x78] sm:$0xff] }
  0x90   : > { %560 = vmatprep.mubr.f32.mxu0 %v302_v19  ;;  %1115 = vmatprep.mubr.f32.mxu1 %v858_v22  ;;  %v796_v19 = vld [vmem:[%s3380_s29 + $0x398] sm:$0xff]  ;;  %v239_v22 = vld [vmem:[%s3380_s29 + $0x70] sm:$0xff] }
  0x93   : > { %561 = vmatmul.mubr.f32.gmra.mrb[38].mxu0 %v301_v24  ;;  %1116 = vmatmul.mubr.f32.gmra.mrb[38].mxu1 %v857_v25  ;;  %v795_v24 = vld [vmem:[%s3380_s29 + $0x390] sm:$0xff]  ;;  %v800_v25 = vld [vmem:[%s3380_s29 + $0x3b8] sm:$0xff] }
  0x94   : > { %565 = vmatprep.mubr.f32.mxu0 %v306_v27  ;;  %1120 = vmatprep.mubr.f32.mxu1 %v862_v28  ;;  %v243_v27 = vld [vmem:[%s3380_s29 + $0x90] sm:$0xff] }
  0x95   : > { %v799_v28 = vld [vmem:[%s3380_s29 + $0x3b0] sm:$0xff] }
  0x97   : > { %566 = vmatmul.mubr.f32.gmra.mrb[40].mxu0 %v305_v33  ;;  %1121 = vmatmul.mubr.f32.gmra.mrb[40].mxu1 %v861_v34  ;;  %v248_v33 = vld [vmem:[%s3380_s29 + $0xb8] sm:$0xff]  ;;  %v247_v34 = vld [vmem:[%s3380_s29 + $0xb0] sm:$0xff] }
  0x98   : > { %570 = vmatprep.mubr.f32.mxu0 %v310_v36  ;;  %1125 = vmatprep.mubr.f32.mxu1 %v866_v37  ;;  %v803_v36 = vld [vmem:[%s3380_s29 + $0x3d0] sm:$0xff]  ;;  %v252_v37 = vld [vmem:[%s3380_s29 + $0xd8] sm:$0xff] }
  0x9b   : > { %571 = vmatmul.mubr.f32.gmra.mrb[42].mxu0 %v309_v39  ;;  %1126 = vmatmul.mubr.f32.gmra.mrb[42].mxu1 %v865_v40  ;;  %v808_v39 = vld [vmem:[%s3380_s29 + $0x3f8] sm:$0xff]  ;;  %v807_v40 = vld [vmem:[%s3380_s29 + $0x3f0] sm:$0xff] }
  0x9c   : > { %575 = vmatprep.mubr.f32.mxu0 %v314_v43  ;;  %1130 = vmatprep.mubr.f32.mxu1 %v870_v45  ;;  %v256_v43 = vld [vmem:[%s3380_s29 + $0xf8] sm:$0xff] }
  0x9d   : > { %v812_v45 = vld [vmem:[%s3380_s29 + $0x418] sm:$0xff] }
  0x9f   : > { %576 = vmatmul.mubr.f32.gmra.mrb[44].mxu0 %v313_v46  ;;  %1131 = vmatmul.mubr.f32.gmra.mrb[44].mxu1 %v869_v48  ;;  %v811_v46 = vld [vmem:[%s3380_s29 + $0x410] sm:$0xff]  ;;  %v260_v48 = vld [vmem:[%s3380_s29 + $0x118] sm:$0xff] }
  0xa0   : > { %580 = vmatprep.mubr.f32.mxu0 %v318_v49  ;;  %1135 = vmatprep.mubr.f32.mxu1 %v874_v51  ;;  %v816_v49 = vld [vmem:[%s3380_s29 + $0x438] sm:$0xff]  ;;  %v815_v51 = vld [vmem:[%s3380_s29 + $0x430] sm:$0xff] }
  0xa3   : > { %581 = vmatmul.mubr.f32.gmra.mrb[46].mxu0 %v317_v53  ;;  %1136 = vmatmul.mubr.f32.gmra.mrb[46].mxu1 %v873_v54  ;;  %v264_v53 = vld [vmem:[%s3380_s29 + $0x138] sm:$0xff] }
  0xa4   : > { %585 = vmatprep.mubr.f32.mxu0 %v322_v56  ;;  %1140 = vmatprep.mubr.f32.mxu1 %v878_v57  ;;  %v820_v54 = vld [vmem:[%s3380_s29 + $0x458] sm:$0xff]  ;;  %v819_v56 = vld [vmem:[%s3380_s29 + $0x450] sm:$0xff] }
  0xa5   : > { %v268_v57 = vld [vmem:[%s3380_s29 + $0x158] sm:$0xff] }
  0xa7   : > { %586 = vmatmul.mubr.f32.gmra.mrb[48].mxu0 %v321_v58  ;;  %1141 = vmatmul.mubr.f32.gmra.mrb[48].mxu1 %v877_v59  ;;  %v824_v58 = vld [vmem:[%s3380_s29 + $0x478] sm:$0xff]  ;;  %v823_v59 = vld [vmem:[%s3380_s29 + $0x470] sm:$0xff] }
  0xa8   : > { %2667 = vmatprep.mubr.msk.f32.mxu0 %vm325_vm0, %v228_v61  ;;  %2692 = vmatprep.mubr.msk.f32.mxu1 %vm325_vm0, %v784_v62  ;;  %v272_v61 = vld [vmem:[%s3380_s29 + $0x178] sm:$0xff] }
  0xa9   : > { %v828_v62 = vld [vmem:[%s3380_s29 + $0x498] sm:$0xff] }
  0xab   : > { %656 = vmatmul.mubr.f32.vlgmr.msra.gmra.mrb[0].mxu0 %v227_v63  ;;  %1211 = vmatmul.mubr.f32.vlgmr.msra.gmra.mrb[0].mxu1 %v783_v1  ;;  %v827_v63 = vld [vmem:[%s3380_s29 + $0x490] sm:$0xff]  ;;  %v276_v1 = vld [vmem:[%s3380_s29 + $0x198] sm:$0xff] }
  0xac   : > { %2934 = vmatpush1.bf16.msra.mxu0 %v3353_v4  ;;  %3015 = vmatpush1.bf16.msra.mxu1 %v3353_v4  ;;  %v235_v4 = vld [vmem:[%s3380_s29 + $0x50] sm:$0xff] }
  0xad   : > { %2668 = vmatprep.mubr.msk.f32.mxu0 %vm325_vm0, %v232_v2  ;;  %2693 = vmatprep.mubr.msk.f32.mxu1 %vm325_vm0, %v788_v5  ;;  %v832_v2 = vld [vmem:[%s3380_s29 + $0x4b8] sm:$0xff]  ;;  %v831_v5 = vld [vmem:[%s3380_s29 + $0x4b0] sm:$0xff] }
  0xae   : > { %2935 = vmatprep.subr.bf16.mxu0 %v3313_v3  ;;  %3016 = vmatprep.subr.bf16.mxu1 %v3313_v3 }
  0xaf   : > { %661 = vmatmul.mubr.f32.gmra.mrb[2].mxu0 %v231_v8  ;;  %1216 = vmatmul.mubr.f32.gmra.mrb[2].mxu1 %v787_v10  ;;  %v280_v8 = vld [vmem:[%s3380_s29 + $0x1b8] sm:$0xff] }
  0xb0   : > { %2669 = vmatprep.mubr.msk.f32.mxu0 %vm325_vm0, %v236_v12  ;;  %2694 = vmatprep.mubr.msk.f32.mxu1 %vm325_vm0, %v792_v14  ;;  %v836_v10 = vld [vmem:[%s3380_s29 + $0x4d8] sm:$0xff]  ;;  %v835_v12 = vld [vmem:[%s3380_s29 + $0x4d0] sm:$0xff] }
  0xb1   : > { %2937 = vmatpush1.bf16.msra.mxu0 %v3362_v6  ;;  %3018 = vmatpush1.bf16.msra.mxu1 %v3362_v6  ;;  %v244_v6 = vld [vmem:[%s3380_s29 + $0x98] sm:$0xff] }
  0xb2   : > { %2938 = vmatprep.subr.bf16.mxu0 %v3313_v3  ;;  %3019 = vmatprep.subr.bf16.mxu1 %v3313_v3  ;;  %v284_v14 = vld [vmem:[%s3380_s29 + $0x1d8] sm:$0xff] }
  0xb3   : > { %666 = vmatmul.mubr.f32.gmra.mrb[4].mxu0 %v235_v4  ;;  %1221 = vmatmul.mubr.f32.gmra.mrb[4].mxu1 %v791_v15  ;;  %v840_v4 = vld [vmem:[%s3380_s29 + $0x4f8] sm:$0xff]  ;;  %v839_v15 = vld [vmem:[%s3380_s29 + $0x4f0] sm:$0xff] }
  0xb4   : > { %2670 = vmatprep.mubr.msk.f32.mxu0 %vm325_vm0, %v240_v16  ;;  %2695 = vmatprep.mubr.msk.f32.mxu1 %vm325_vm0, %v796_v19  ;;  %v288_v16 = vld [vmem:[%s3380_s29 + $0x1f8] sm:$0xff] }
  0xb5   : > { %2940 = vmatpush1.bf16.msra.mxu0 %v3375_v9  ;;  %3021 = vmatpush1.bf16.msra.mxu1 %v3375_v9  ;;  %v804_v9 = vld [vmem:[%s3380_s29 + $0x3d8] sm:$0xff] }
  0xb6   : > { %2941 = vmatprep.subr.bf16.mxu0 %v3313_v3  ;;  %3022 = vmatprep.subr.bf16.mxu1 %v3313_v3  ;;  %v844_v19 = vld [vmem:[%s3380_s29 + $0x518] sm:$0xff] }
  0xb7   : > { %671 = vmatmul.mubr.f32.gmra.mrb[6].mxu0 %v239_v22  ;;  %1226 = vmatmul.mubr.f32.gmra.mrb[6].mxu1 %v795_v24  ;;  %v843_v22 = vld [vmem:[%s3380_s29 + $0x510] sm:$0xff]  ;;  %v292_v24 = vld [vmem:[%s3380_s29 + $0x218] sm:$0xff] }
  0xb8   : > { %2671 = vmatprep.mubr.msk.f32.mxu0 %vm325_vm0, %v244_v6  ;;  %2696 = vmatprep.mubr.msk.f32.mxu1 %vm325_vm0, %v800_v25  ;;  %v848_v6 = vld [vmem:[%s3380_s29 + $0x538] sm:$0xff]  ;;  %v847_v25 = vld [vmem:[%s3380_s29 + $0x530] sm:$0xff] }
  0xb9   : > { %2943 = vmatpush1.bf16.msra.mxu0 %v3393_v13  ;;  %3024 = vmatpush1.bf16.msra.mxu1 %v3393_v13  ;;  %v251_v13 = vld [vmem:[%s3380_s29 + $0xd0] sm:$0xff] }
  0xba   : > { %2944 = vmatprep.subr.bf16.mxu0 %v3313_v3  ;;  %3025 = vmatprep.subr.bf16.mxu1 %v3313_v3 }
  0xbb   : > { %676 = vmatmul.mubr.f32.gmra.mrb[8].mxu0 %v243_v27  ;;  %1231 = vmatmul.mubr.f32.gmra.mrb[8].mxu1 %v799_v28  ;;  %v296_v27 = vld [vmem:[%s3380_s29 + $0x238] sm:$0xff] }
  0xbc   : > { %2672 = vmatprep.mubr.msk.f32.mxu0 %vm325_vm0, %v248_v33  ;;  %2697 = vmatprep.mubr.msk.f32.mxu1 %vm325_vm0, %v804_v9  ;;  %v852_v28 = vld [vmem:[%s3380_s29 + $0x558] sm:$0xff]  ;;  %v851_v33 = vld [vmem:[%s3380_s29 + $0x550] sm:$0xff] }
  0xbd   : > { %2946 = vmatpush1.bf16.msra.mxu0 %v3406_v17  ;;  %3027 = vmatpush1.bf16.msra.mxu1 %v3406_v17  ;;  %v255_v17 = vld [vmem:[%s3380_s29 + $0xf0] sm:$0xff]  ;;  %v300_v9 = vld [vmem:[%s3380_s29 + $0x258] sm:$0xff] }
  0xbe   : > { %2947 = vmatprep.subr.bf16.mxu0 %v3313_v3  ;;  %3028 = vmatprep.subr.bf16.mxu1 %v3313_v3 }
  0xbf   : > { %681 = vmatmul.mubr.f32.gmra.mrb[10].mxu0 %v247_v34  ;;  %1236 = vmatmul.mubr.f32.gmra.mrb[10].mxu1 %v803_v36  ;;  %v299_v34 = vld [vmem:[%s3380_s29 + $0x250] sm:$0xff] }
  0xc0   : > { %2673 = vmatprep.mubr.msk.f32.mxu0 %vm325_vm0, %v252_v37  ;;  %2698 = vmatprep.mubr.msk.f32.mxu1 %vm325_vm0, %v808_v39  ;;  %v855_v36 = vld [vmem:[%s3380_s29 + $0x570] sm:$0xff]  ;;  %v304_v37 = vld [vmem:[%s3380_s29 + $0x278] sm:$0xff] }
  0xc1   : > { %2949 = vmatpush1.bf16.msra.mxu0 %v3418_v20  ;;  %3030 = vmatpush1.bf16.msra.mxu1 %v3418_v20  ;;  %v259_v20 = vld [vmem:[%s3380_s29 + $0x110] sm:$0xff]  ;;  %v860_v39 = vld [vmem:[%s3380_s29 + $0x598] sm:$0xff] }
  0xc2   : > { %2950 = vmatprep.subr.bf16.mxu0 %v3313_v3  ;;  %3031 = vmatprep.subr.bf16.mxu1 %v3313_v3 }
  0xc3   : > { %686 = vmatmul.mubr.f32.gmra.mrb[12].mxu0 %v251_v13  ;;  %1241 = vmatmul.mubr.f32.gmra.mrb[12].mxu1 %v807_v40  ;;  %v303_v13 = vld [vmem:[%s3380_s29 + $0x270] sm:$0xff] }
  0xc4   : > { %2674 = vmatprep.mubr.msk.f32.mxu0 %vm325_vm0, %v256_v43  ;;  %2699 = vmatprep.mubr.msk.f32.mxu1 %vm325_vm0, %v812_v45  ;;  %v859_v40 = vld [vmem:[%s3380_s29 + $0x590] sm:$0xff]  ;;  %v308_v43 = vld [vmem:[%s3380_s29 + $0x298] sm:$0xff] }
  0xc5   : > { %2952 = vmatpush1.bf16.msra.mxu0 %v3430_v23  ;;  %3033 = vmatpush1.bf16.msra.mxu1 %v3430_v23  ;;  %v263_v23 = vld [vmem:[%s3380_s29 + $0x130] sm:$0xff]  ;;  %v864_v45 = vld [vmem:[%s3380_s29 + $0x5b8] sm:$0xff] }
  0xc6   : > { %2953 = vmatprep.subr.bf16.mxu0 %v3313_v3  ;;  %3034 = vmatprep.subr.bf16.mxu1 %v3313_v3 }
  0xc7   : > { %691 = vmatmul.mubr.f32.gmra.mrb[14].mxu0 %v255_v17  ;;  %1246 = vmatmul.mubr.f32.gmra.mrb[14].mxu1 %v811_v46  ;;  %v307_v17 = vld [vmem:[%s3380_s29 + $0x290] sm:$0xff] }
  0xc8   : > { %2675 = vmatprep.mubr.msk.f32.mxu0 %vm325_vm0, %v260_v48  ;;  %2700 = vmatprep.mubr.msk.f32.mxu1 %vm325_vm0, %v816_v49  ;;  %v863_v46 = vld [vmem:[%s3380_s29 + $0x5b0] sm:$0xff]  ;;  %v312_v48 = vld [vmem:[%s3380_s29 + $0x2b8] sm:$0xff] }
  0xc9   : > { %2955 = vmatpush1.bf16.msra.mxu0 %v3442_v26  ;;  %3036 = vmatpush1.bf16.msra.mxu1 %v3442_v26  ;;  %v267_v26 = vld [vmem:[%s3380_s29 + $0x150] sm:$0xff]  ;;  %v868_v49 = vld [vmem:[%s3380_s29 + $0x5d8] sm:$0xff] }
  0xca   : > { %2956 = vmatprep.subr.bf16.mxu0 %v3313_v3  ;;  %3037 = vmatprep.subr.bf16.mxu1 %v3313_v3 }
  0xcb   : > { %696 = vmatmul.mubr.f32.gmra.mrb[16].mxu0 %v259_v20  ;;  %1251 = vmatmul.mubr.f32.gmra.mrb[16].mxu1 %v815_v51  ;;  %v311_v20 = vld [vmem:[%s3380_s29 + $0x2b0] sm:$0xff] }
  0xcc   : > { %2676 = vmatprep.mubr.msk.f32.mxu0 %vm325_vm0, %v264_v53  ;;  %2701 = vmatprep.mubr.msk.f32.mxu1 %vm325_vm0, %v820_v54  ;;  %v867_v51 = vld [vmem:[%s3380_s29 + $0x5d0] sm:$0xff]  ;;  %v316_v53 = vld [vmem:[%s3380_s29 + $0x2d8] sm:$0xff] }
  0xcd   : > { %2958 = vmatpush1.bf16.msra.mxu0 %v3454_v29  ;;  %3039 = vmatpush1.bf16.msra.mxu1 %v3454_v29  ;;  %v271_v29 = vld [vmem:[%s3380_s29 + $0x170] sm:$0xff]  ;;  %v872_v54 = vld [vmem:[%s3380_s29 + $0x5f8] sm:$0xff] }
  0xce   : > { %2959 = vmatprep.subr.bf16.mxu0 %v3313_v3  ;;  %3040 = vmatprep.subr.bf16.mxu1 %v3313_v3 }
  0xcf   : > { %701 = vmatmul.mubr.f32.gmra.mrb[18].mxu0 %v263_v23  ;;  %1256 = vmatmul.mubr.f32.gmra.mrb[18].mxu1 %v819_v56  ;;  %v315_v23 = vld [vmem:[%s3380_s29 + $0x2d0] sm:$0xff] }
  0xd0   : > { %2677 = vmatprep.mubr.msk.f32.mxu0 %vm325_vm0, %v268_v57  ;;  %2702 = vmatprep.mubr.msk.f32.mxu1 %vm325_vm0, %v824_v58  ;;  %v871_v56 = vld [vmem:[%s3380_s29 + $0x5f0] sm:$0xff]  ;;  %v320_v57 = vld [vmem:[%s3380_s29 + $0x2f8] sm:$0xff] }
  0xd1   : > { %2961 = vmatpush1.bf16.msra.mxu0 %v3466_v32  ;;  %3042 = vmatpush1.bf16.msra.mxu1 %v3466_v32  ;;  %v275_v32 = vld [vmem:[%s3380_s29 + $0x190] sm:$0xff]  ;;  %v876_v58 = vld [vmem:[%s3380_s29 + $0x618] sm:$0xff] }
  0xd2   : > { %2962 = vmatprep.subr.bf16.mxu0 %v3313_v3  ;;  %3043 = vmatprep.subr.bf16.mxu1 %v3313_v3 }
  0xd3   : > { %706 = vmatmul.mubr.f32.gmra.mrb[20].mxu0 %v267_v26  ;;  %1261 = vmatmul.mubr.f32.gmra.mrb[20].mxu1 %v823_v59  ;;  %v319_v26 = vld [vmem:[%s3380_s29 + $0x2f0] sm:$0xff] }
  0xd4   : > { %2678 = vmatprep.mubr.msk.f32.mxu0 %vm325_vm0, %v272_v61  ;;  %2703 = vmatprep.mubr.msk.f32.mxu1 %vm325_vm0, %v828_v62  ;;  %v875_v59 = vld [vmem:[%s3380_s29 + $0x610] sm:$0xff]  ;;  %v324_v61 = vld [vmem:[%s3380_s29 + $0x318] sm:$0xff] }
  0xd5   : > { %2964 = vmatpush1.bf16.msra.mxu0 %v3478_v35  ;;  %3045 = vmatpush1.bf16.msra.mxu1 %v3478_v35  ;;  %v279_v35 = vld [vmem:[%s3380_s29 + $0x1b0] sm:$0xff]  ;;  %v880_v62 = vld [vmem:[%s3380_s29 + $0x638] sm:$0xff] }
  0xd6   : > { %2965 = vmatprep.subr.bf16.mxu0 %v3313_v3  ;;  %3046 = vmatprep.subr.bf16.mxu1 %v3313_v3 }
  0xd7   : > { %711 = vmatmul.mubr.f32.gmra.mrb[22].mxu0 %v271_v29  ;;  %1266 = vmatmul.mubr.f32.gmra.mrb[22].mxu1 %v827_v63  ;;  %v323_v29 = vld [vmem:[%s3380_s29 + $0x310] sm:$0xff] }
  0xd8   : > { %2679 = vmatprep.mubr.msk.f32.mxu0 %vm325_vm0, %v276_v1  ;;  %2704 = vmatprep.mubr.msk.f32.mxu1 %vm325_vm0, %v832_v2  ;;  %v879_v63 = vld [vmem:[%s3380_s29 + $0x630] sm:$0xff]  ;;  %v1362_v1 = vld [vmem:[%s3380_s29 + $0x648] sm:$0xff] }
  0xd9   : > { %2967 = vmatpush1.bf16.msra.mxu0 %v3490_v38  ;;  %3048 = vmatpush1.bf16.msra.mxu1 %v3490_v38  ;;  %v283_v38 = vld [vmem:[%s3380_s29 + $0x1d0] sm:$0xff]  ;;  %v1917_v2 = vld [vmem:[%s3380_s29 + $0x968] sm:$0xff] }
  0xda   : > { %2968 = vmatprep.subr.bf16.mxu0 %v3313_v3  ;;  %3049 = vmatprep.subr.bf16.mxu1 %v3313_v3 }
  0xdb   : > { %716 = vmatmul.mubr.f32.gmra.mrb[24].mxu0 %v275_v32  ;;  %1271 = vmatmul.mubr.f32.gmra.mrb[24].mxu1 %v831_v5  ;;  %v1361_v32 = vld [vmem:[%s3380_s29 + $0x640] sm:$0xff] }
  0xdc   : > { %2680 = vmatprep.mubr.msk.f32.mxu0 %vm325_vm0, %v280_v8  ;;  %2705 = vmatprep.mubr.msk.f32.mxu1 %vm325_vm0, %v836_v10  ;;  %v1916_v5 = vld [vmem:[%s3380_s29 + $0x960] sm:$0xff]  ;;  %v1366_v8 = vld [vmem:[%s3380_s29 + $0x668] sm:$0xff] }
  0xdd   : > { %2970 = vmatpush1.bf16.msra.mxu0 %v3502_v41  ;;  %3051 = vmatpush1.bf16.msra.mxu1 %v3502_v41  ;;  %v287_v41 = vld [vmem:[%s3380_s29 + $0x1f0] sm:$0xff]  ;;  %v1921_v10 = vld [vmem:[%s3380_s29 + $0x988] sm:$0xff] }
  0xde   : > { %2971 = vmatprep.subr.bf16.mxu0 %v3313_v3  ;;  %3052 = vmatprep.subr.bf16.mxu1 %v3313_v3 }
  0xdf   : > { %721 = vmatmul.mubr.f32.gmra.mrb[26].mxu0 %v279_v35  ;;  %1276 = vmatmul.mubr.f32.gmra.mrb[26].mxu1 %v835_v12  ;;  %v1365_v35 = vld [vmem:[%s3380_s29 + $0x660] sm:$0xff] }
  0xe0   : > { %2681 = vmatprep.mubr.msk.f32.mxu0 %vm325_vm0, %v284_v14  ;;  %2706 = vmatprep.mubr.msk.f32.mxu1 %vm325_vm0, %v840_v4  ;;  %v1920_v12 = vld [vmem:[%s3380_s29 + $0x980] sm:$0xff]  ;;  %v1370_v14 = vld [vmem:[%s3380_s29 + $0x688] sm:$0xff] }
  0xe1   : > { %2973 = vmatpush1.bf16.msra.mxu0 %v3514_v44  ;;  %3054 = vmatpush1.bf16.msra.mxu1 %v3514_v44  ;;  %v291_v44 = vld [vmem:[%s3380_s29 + $0x210] sm:$0xff]  ;;  %v1925_v4 = vld [vmem:[%s3380_s29 + $0x9a8] sm:$0xff] }
  0xe2   : > { %2974 = vmatprep.subr.bf16.mxu0 %v3313_v3  ;;  %3055 = vmatprep.subr.bf16.mxu1 %v3313_v3 }
  0xe3   : > { %726 = vmatmul.mubr.f32.gmra.mrb[28].mxu0 %v283_v38  ;;  %1281 = vmatmul.mubr.f32.gmra.mrb[28].mxu1 %v839_v15  ;;  %v1924_v38 = vld [vmem:[%s3380_s29 + $0x9a0] sm:$0xff]  ;;  %v1374_v15 = vld [vmem:[%s3380_s29 + $0x6a8] sm:$0xff] }
  0xe4   : > { %2682 = vmatprep.mubr.msk.f32.mxu0 %vm325_vm0, %v288_v16  ;;  %2707 = vmatprep.mubr.msk.f32.mxu1 %vm325_vm0, %v844_v19  ;;  %v1929_v16 = vld [vmem:[%s3380_s29 + $0x9c8] sm:$0xff]  ;;  %v1373_v19 = vld [vmem:[%s3380_s29 + $0x6a0] sm:$0xff] }
  0xe5   : > { %2976 = vmatpush1.bf16.msra.mxu0 %v3526_v47  ;;  %3057 = vmatpush1.bf16.msra.mxu1 %v3526_v47  ;;  %v295_v47 = vld [vmem:[%s3380_s29 + $0x230] sm:$0xff] }
  0xe6   : > { %2977 = vmatprep.subr.bf16.mxu0 %v3313_v3  ;;  %3058 = vmatprep.subr.bf16.mxu1 %v3313_v3 }
  0xe7   : > { %731 = vmatmul.mubr.f32.gmra.mrb[30].mxu0 %v287_v41  ;;  %1286 = vmatmul.mubr.f32.gmra.mrb[30].mxu1 %v843_v22  ;;  %v1928_v41 = vld [vmem:[%s3380_s29 + $0x9c0] sm:$0xff]  ;;  %v1378_v22 = vld [vmem:[%s3380_s29 + $0x6c8] sm:$0xff] }
  0xe8   : > { %2683 = vmatprep.mubr.msk.f32.mxu0 %vm325_vm0, %v292_v24  ;;  %2708 = vmatprep.mubr.msk.f32.mxu1 %vm325_vm0, %v848_v6  ;;  %v1933_v24 = vld [vmem:[%s3380_s29 + $0x9e8] sm:$0xff]  ;;  %v1932_v6 = vld [vmem:[%s3380_s29 + $0x9e0] sm:$0xff] }
  0xe9   : > { %2979 = vmatpush1.bf16.msra.mxu0 %v3538_v50  ;;  %3060 = vmatpush1.bf16.msra.mxu1 %v3538_v50  ;;  %v856_v50 = vld [vmem:[%s3380_s29 + $0x578] sm:$0xff] }
  0xea   : > { %2980 = vmatprep.subr.bf16.mxu0 %v3313_v3  ;;  %3061 = vmatprep.subr.bf16.mxu1 %v3313_v3 }
  0xeb   : > { %736 = vmatmul.mubr.f32.gmra.mrb[32].mxu0 %v291_v44  ;;  %1291 = vmatmul.mubr.f32.gmra.mrb[32].mxu1 %v847_v25  ;;  %v1382_v44 = vld [vmem:[%s3380_s29 + $0x6e8] sm:$0xff] }
  0xec   : > { %2684 = vmatprep.mubr.msk.f32.mxu0 %vm325_vm0, %v296_v27  ;;  %2709 = vmatprep.mubr.msk.f32.mxu1 %vm325_vm0, %v852_v28  ;;  %v1937_v25 = vld [vmem:[%s3380_s29 + $0xa08] sm:$0xff]  ;;  %v1936_v27 = vld [vmem:[%s3380_s29 + $0xa00] sm:$0xff] }
  0xed   : > { %v1386_v28 = vld [vmem:[%s3380_s29 + $0x708] sm:$0xff] }
  0xef   : > { %741 = vmatmul.mubr.f32.gmra.mrb[34].mxu0 %v295_v47  ;;  %1296 = vmatmul.mubr.f32.gmra.mrb[34].mxu1 %v851_v33  ;;  %v1941_v47 = vld [vmem:[%s3380_s29 + $0xa28] sm:$0xff]  ;;  %v1940_v33 = vld [vmem:[%s3380_s29 + $0xa20] sm:$0xff] }
  0xf0   : > { %2685 = vmatprep.mubr.msk.f32.mxu0 %vm325_vm0, %v300_v9  ;;  %2710 = vmatprep.mubr.msk.f32.mxu1 %vm325_vm0, %v856_v50  ;;  %v1390_v9 = vld [vmem:[%s3380_s29 + $0x728] sm:$0xff] }
  0xf1   : > { %v1945_v50 = vld [vmem:[%s3380_s29 + $0xa48] sm:$0xff] }
  0xf3   : > { %746 = vmatmul.mubr.f32.gmra.mrb[36].mxu0 %v299_v34  ;;  %1301 = vmatmul.mubr.f32.gmra.mrb[36].mxu1 %v855_v36  ;;  %v1944_v34 = vld [vmem:[%s3380_s29 + $0xa40] sm:$0xff]  ;;  %v1394_v36 = vld [vmem:[%s3380_s29 + $0x748] sm:$0xff] }
  0xf4   : > { %2686 = vmatprep.mubr.msk.f32.mxu0 %vm325_vm0, %v304_v37  ;;  %2711 = vmatprep.mubr.msk.f32.mxu1 %vm325_vm0, %v860_v39  ;;  %v1949_v37 = vld [vmem:[%s3380_s29 + $0xa68] sm:$0xff]  ;;  %v1948_v39 = vld [vmem:[%s3380_s29 + $0xa60] sm:$0xff] }
  0xf7   : > { %751 = vmatmul.mubr.f32.gmra.mrb[38].mxu0 %v303_v13  ;;  %1306 = vmatmul.mubr.f32.gmra.mrb[38].mxu1 %v859_v40  ;;  %v1398_v13 = vld [vmem:[%s3380_s29 + $0x768] sm:$0xff] }
  0xf8   : > { %2687 = vmatprep.mubr.msk.f32.mxu0 %vm325_vm0, %v308_v43  ;;  %2712 = vmatprep.mubr.msk.f32.mxu1 %vm325_vm0, %v864_v45  ;;  %v1953_v40 = vld [vmem:[%s3380_s29 + $0xa88] sm:$0xff]  ;;  %v1952_v43 = vld [vmem:[%s3380_s29 + $0xa80] sm:$0xff] }
  0xf9   : > { %v1402_v45 = vld [vmem:[%s3380_s29 + $0x788] sm:$0xff] }
  0xfb   : > { %756 = vmatmul.mubr.f32.gmra.mrb[40].mxu0 %v307_v17  ;;  %1311 = vmatmul.mubr.f32.gmra.mrb[40].mxu1 %v863_v46  ;;  %v1957_v17 = vld [vmem:[%s3380_s29 + $0xaa8] sm:$0xff]  ;;  %v1956_v46 = vld [vmem:[%s3380_s29 + $0xaa0] sm:$0xff] }
  0xfc   : > { %2688 = vmatprep.mubr.msk.f32.mxu0 %vm325_vm0, %v312_v48  ;;  %2713 = vmatprep.mubr.msk.f32.mxu1 %vm325_vm0, %v868_v49  ;;  %v1406_v48 = vld [vmem:[%s3380_s29 + $0x7a8] sm:$0xff] }
  0xfd   : > { %v1961_v49 = vld [vmem:[%s3380_s29 + $0xac8] sm:$0xff] }
  0xff   : > { %761 = vmatmul.mubr.f32.gmra.mrb[42].mxu0 %v311_v20  ;;  %1316 = vmatmul.mubr.f32.gmra.mrb[42].mxu1 %v867_v51  ;;  %v1960_v20 = vld [vmem:[%s3380_s29 + $0xac0] sm:$0xff]  ;;  %v1410_v51 = vld [vmem:[%s3380_s29 + $0x7c8] sm:$0xff] }
 0x100   : > { %2689 = vmatprep.mubr.msk.f32.mxu0 %vm325_vm0, %v316_v53  ;;  %2714 = vmatprep.mubr.msk.f32.mxu1 %vm325_vm0, %v872_v54  ;;  %v1965_v53 = vld [vmem:[%s3380_s29 + $0xae8] sm:$0xff] }
 0x101   : > { %v1414_v54 = vld [vmem:[%s3380_s29 + $0x7e8] sm:$0xff] }
 0x103   : > { %766 = vmatmul.mubr.f32.gmra.mrb[44].mxu0 %v315_v23  ;;  %1321 = vmatmul.mubr.f32.gmra.mrb[44].mxu1 %v871_v56  ;;  %v1969_v23 = vld [vmem:[%s3380_s29 + $0xb08] sm:$0xff]  ;;  %v1413_v56 = vld [vmem:[%s3380_s29 + $0x7e0] sm:$0xff] }
 0x104   : > { %2690 = vmatprep.mubr.msk.f32.mxu0 %vm325_vm0, %v320_v57  ;;  %2715 = vmatprep.mubr.msk.f32.mxu1 %vm325_vm0, %v876_v58  ;;  %v1418_v57 = vld [vmem:[%s3380_s29 + $0x808] sm:$0xff] }
 0x105   : > { %v1973_v58 = vld [vmem:[%s3380_s29 + $0xb28] sm:$0xff] }
 0x107   : > { %771 = vmatmul.mubr.f32.gmra.mrb[46].mxu0 %v319_v26  ;;  %1326 = vmatmul.mubr.f32.gmra.mrb[46].mxu1 %v875_v59  ;;  %v1417_v26 = vld [vmem:[%s3380_s29 + $0x800] sm:$0xff] }
 0x108   : > { %2691 = vmatprep.mubr.msk.f32.mxu0 %vm325_vm0, %v324_v61  ;;  %2716 = vmatprep.mubr.msk.f32.mxu1 %vm325_vm0, %v880_v62  ;;  %v1972_v59 = vld [vmem:[%s3380_s29 + $0xb20] sm:$0xff]  ;;  %v1422_v61 = vld [vmem:[%s3380_s29 + $0x828] sm:$0xff] }
 0x109   : > { %v1977_v62 = vld [vmem:[%s3380_s29 + $0xb48] sm:$0xff] }
 0x10b   : > { %776 = vmatmul.mubr.f32.gmra.mrb[48].mxu0 %v323_v29  ;;  %1331 = vmatmul.mubr.f32.gmra.mrb[48].mxu1 %v879_v63  ;;  %v1421_v29 = vld [vmem:[%s3380_s29 + $0x820] sm:$0xff] }
 0x10c   : > { %1600 = vmatprep.mubr.f32.mxu0 %v1362_v1  ;;  %2155 = vmatprep.mubr.f32.mxu1 %v1917_v2  ;;  %v1976_v63 = vld [vmem:[%s3380_s29 + $0xb40] sm:$0xff]  ;;  %v1426_v1 = vld [vmem:[%s3380_s29 + $0x848] sm:$0xff] }
 0x10d   : > { %v1981_v2 = vld [vmem:[%s3380_s29 + $0xb68] sm:$0xff] }
 0x10f   : > { %1601 = vmatmul.mubr.f32.vlgmr.msra.gmra.mrb[50].mxu0 %v1361_v32  ;;  %2156 = vmatmul.mubr.f32.vlgmr.msra.gmra.mrb[50].mxu1 %v1916_v5  ;;  %v1425_v32 = vld [vmem:[%s3380_s29 + $0x840] sm:$0xff] }
 0x110   : > { %2982 = vmatpush1.bf16.msra.mxu0 %v3552_v55  ;;  %3063 = vmatpush1.bf16.msra.mxu1 %v3552_v55  ;;  %v1369_v55 = vld [vmem:[%s3380_s29 + $0x680] sm:$0xff] }
 0x111   : > { %1605 = vmatprep.mubr.f32.mxu0 %v1366_v8  ;;  %2160 = vmatprep.mubr.f32.mxu1 %v1921_v10  ;;  %v1980_v5 = vld [vmem:[%s3380_s29 + $0xb60] sm:$0xff]  ;;  %v1430_v8 = vld [vmem:[%s3380_s29 + $0x868] sm:$0xff] }
 0x112   : > { %2983 = vmatprep.subr.bf16.mxu0 %v3313_v3  ;;  %3064 = vmatprep.subr.bf16.mxu1 %v3313_v3  ;;  %v1985_v10 = vld [vmem:[%s3380_s29 + $0xb88] sm:$0xff] }
 0x113   : > { %1606 = vmatmul.mubr.f32.gmra.mrb[52].mxu0 %v1365_v35  ;;  %2161 = vmatmul.mubr.f32.gmra.mrb[52].mxu1 %v1920_v12  ;;  %v1429_v35 = vld [vmem:[%s3380_s29 + $0x860] sm:$0xff] }
 0x114   : > { %1610 = vmatprep.mubr.f32.mxu0 %v1370_v14  ;;  %2165 = vmatprep.mubr.f32.mxu1 %v1925_v4  ;;  %v1984_v12 = vld [vmem:[%s3380_s29 + $0xb80] sm:$0xff]  ;;  %v1434_v14 = vld [vmem:[%s3380_s29 + $0x888] sm:$0xff] }
 0x115   : > { %2985 = vmatpush1.bf16.msra.mxu0 %v3570_v0  ;;  %3066 = vmatpush1.bf16.msra.mxu1 %v3570_v0  ;;  %v1377_v0 = vld [vmem:[%s3380_s29 + $0x6c0] sm:$0xff]  ;;  %v1989_v4 = vld [vmem:[%s3380_s29 + $0xba8] sm:$0xff] }
 0x116   : > { %2986 = vmatprep.subr.bf16.mxu0 %v3313_v3  ;;  %3067 = vmatprep.subr.bf16.mxu1 %v3313_v3 }
 0x117   : > { %1611 = vmatmul.mubr.f32.gmra.mrb[54].mxu0 %v1369_v55  ;;  %2166 = vmatmul.mubr.f32.gmra.mrb[54].mxu1 %v1924_v38  ;;  %v1433_v55 = vld [vmem:[%s3380_s29 + $0x880] sm:$0xff] }
 0x118   : > { %1615 = vmatprep.mubr.f32.mxu0 %v1374_v15  ;;  %2170 = vmatprep.mubr.f32.mxu1 %v1929_v16  ;;  %v1988_v38 = vld [vmem:[%s3380_s29 + $0xba0] sm:$0xff]  ;;  %v1438_v15 = vld [vmem:[%s3380_s29 + $0x8a8] sm:$0xff] }
 0x119   : > { %2988 = vmatpush1.bf16.msra.mxu0 %v3586_v11  ;;  %3069 = vmatpush1.bf16.msra.mxu1 %v3586_v11  ;;  %v1381_v11 = vld [vmem:[%s3380_s29 + $0x6e0] sm:$0xff]  ;;  %v1993_v16 = vld [vmem:[%s3380_s29 + $0xbc8] sm:$0xff] }
 0x11a   : > { %2989 = vmatprep.subr.bf16.mxu0 %v3313_v3  ;;  %3070 = vmatprep.subr.bf16.mxu1 %v3313_v3 }
 0x11b   : > { %1616 = vmatmul.mubr.f32.gmra.mrb[56].mxu0 %v1373_v19  ;;  %2171 = vmatmul.mubr.f32.gmra.mrb[56].mxu1 %v1928_v41  ;;  %v1437_v19 = vld [vmem:[%s3380_s29 + $0x8a0] sm:$0xff] }
 0x11c   : > { %1620 = vmatprep.mubr.f32.mxu0 %v1378_v22  ;;  %2175 = vmatprep.mubr.f32.mxu1 %v1933_v24  ;;  %v1992_v41 = vld [vmem:[%s3380_s29 + $0xbc0] sm:$0xff]  ;;  %v1442_v22 = vld [vmem:[%s3380_s29 + $0x8c8] sm:$0xff] }
 0x11d   : > { %2991 = vmatpush1.bf16.msra.mxu0 %v3602_v21  ;;  %3072 = vmatpush1.bf16.msra.mxu1 %v3602_v21  ;;  %v1385_v21 = vld [vmem:[%s3380_s29 + $0x700] sm:$0xff]  ;;  %v1997_v24 = vld [vmem:[%s3380_s29 + $0xbe8] sm:$0xff] }
 0x11e   : > { %2992 = vmatprep.subr.bf16.mxu0 %v3313_v3  ;;  %3073 = vmatprep.subr.bf16.mxu1 %v3313_v3 }
 0x11f   : > { %1621 = vmatmul.mubr.f32.gmra.mrb[58].mxu0 %v1377_v0  ;;  %2176 = vmatmul.mubr.f32.gmra.mrb[58].mxu1 %v1932_v6  ;;  %v1441_v0 = vld [vmem:[%s3380_s29 + $0x8c0] sm:$0xff] }
 0x120   : > { %1625 = vmatprep.mubr.f32.mxu0 %v1382_v44  ;;  %2180 = vmatprep.mubr.f32.mxu1 %v1937_v25  ;;  %v1996_v6 = vld [vmem:[%s3380_s29 + $0xbe0] sm:$0xff]  ;;  %v1446_v44 = vld [vmem:[%s3380_s29 + $0x8e8] sm:$0xff] }
 0x121   : > { %2994 = vmatpush1.bf16.msra.mxu0 %v3618_v31  ;;  %3075 = vmatpush1.bf16.msra.mxu1 %v3618_v31  ;;  %v1389_v31 = vld [vmem:[%s3380_s29 + $0x720] sm:$0xff]  ;;  %v2001_v25 = vld [vmem:[%s3380_s29 + $0xc08] sm:$0xff] }
 0x122   : > { %2995 = vmatprep.subr.bf16.mxu0 %v3313_v3  ;;  %3076 = vmatprep.subr.bf16.mxu1 %v3313_v3 }
 0x123   : > { %1626 = vmatmul.mubr.f32.gmra.mrb[60].mxu0 %v1381_v11  ;;  %2181 = vmatmul.mubr.f32.gmra.mrb[60].mxu1 %v1936_v27  ;;  %v1445_v11 = vld [vmem:[%s3380_s29 + $0x8e0] sm:$0xff] }
 0x124   : > { %1630 = vmatprep.mubr.f32.mxu0 %v1386_v28  ;;  %2185 = vmatprep.mubr.f32.mxu1 %v1941_v47  ;;  %v2000_v27 = vld [vmem:[%s3380_s29 + $0xc00] sm:$0xff]  ;;  %v1450_v28 = vld [vmem:[%s3380_s29 + $0x908] sm:$0xff] }
 0x125   : > { %2997 = vmatpush1.bf16.msra.mxu0 %v3634_v42  ;;  %3078 = vmatpush1.bf16.msra.mxu1 %v3634_v42  ;;  %v1393_v42 = vld [vmem:[%s3380_s29 + $0x740] sm:$0xff]  ;;  %v2005_v47 = vld [vmem:[%s3380_s29 + $0xc28] sm:$0xff] }
 0x126   : > { %2998 = vmatprep.subr.bf16.mxu0 %v3313_v3  ;;  %3079 = vmatprep.subr.bf16.mxu1 %v3313_v3 }
 0x127   : > { %1631 = vmatmul.mubr.f32.gmra.mrb[62].mxu0 %v1385_v21  ;;  %2186 = vmatmul.mubr.f32.gmra.mrb[62].mxu1 %v1940_v33  ;;  %v1449_v21 = vld [vmem:[%s3380_s29 + $0x900] sm:$0xff] }
 0x128   : > { %1635 = vmatprep.mubr.f32.mxu0 %v1390_v9  ;;  %2190 = vmatprep.mubr.f32.mxu1 %v1945_v50  ;;  %v2004_v33 = vld [vmem:[%s3380_s29 + $0xc20] sm:$0xff]  ;;  %v1454_v9 = vld [vmem:[%s3380_s29 + $0x928] sm:$0xff] }
 0x129   : > { %3000 = vmatpush1.bf16.msra.mxu0 %v3650_v52  ;;  %3081 = vmatpush1.bf16.msra.mxu1 %v3650_v52  ;;  %v1397_v52 = vld [vmem:[%s3380_s29 + $0x760] sm:$0xff]  ;;  %v2009_v50 = vld [vmem:[%s3380_s29 + $0xc48] sm:$0xff] }
 0x12a   : > { %3001 = vmatprep.subr.bf16.mxu0 %v3313_v3  ;;  %3082 = vmatprep.subr.bf16.mxu1 %v3313_v3 }
 0x12b   : > { %1636 = vmatmul.mubr.f32.gmra.mrb[64].mxu0 %v1389_v31  ;;  %2191 = vmatmul.mubr.f32.gmra.mrb[64].mxu1 %v1944_v34  ;;  %v1453_v31 = vld [vmem:[%s3380_s29 + $0x920] sm:$0xff] }
 0x12c   : > { %1640 = vmatprep.mubr.f32.mxu0 %v1394_v36  ;;  %2195 = vmatprep.mubr.f32.mxu1 %v1949_v37  ;;  %v2008_v34 = vld [vmem:[%s3380_s29 + $0xc40] sm:$0xff]  ;;  %v1458_v36 = vld [vmem:[%s3380_s29 + $0x948] sm:$0xff] }
 0x12d   : > { %3003 = vmatpush1.bf16.msra.mxu0 %v3666_v60  ;;  %3084 = vmatpush1.bf16.msra.mxu1 %v3666_v60  ;;  %v1401_v60 = vld [vmem:[%s3380_s29 + $0x780] sm:$0xff]  ;;  %v2013_v37 = vld [vmem:[%s3380_s29 + $0xc68] sm:$0xff] }
 0x12e   : > { %3004 = vmatprep.subr.bf16.mxu0 %v3313_v3  ;;  %3085 = vmatprep.subr.bf16.mxu1 %v3313_v3 }
 0x12f   : > { %1641 = vmatmul.mubr.f32.gmra.mrb[66].mxu0 %v1393_v42  ;;  %2196 = vmatmul.mubr.f32.gmra.mrb[66].mxu1 %v1948_v39  ;;  %v1457_v42 = vld [vmem:[%s3380_s29 + $0x940] sm:$0xff] }
 0x130   : > { %1645 = vmatprep.mubr.f32.mxu0 %v1398_v13  ;;  %2200 = vmatprep.mubr.f32.mxu1 %v1953_v40  ;;  %v2012_v39 = vld [vmem:[%s3380_s29 + $0xc60] sm:$0xff]  ;;  %v1364_v13 = vld [vmem:[%s3380_s29 + $0x658] sm:$0xff] }
 0x131   : > { %3006 = vmatpush1.bf16.msra.mxu0 %v3682_v7  ;;  %3087 = vmatpush1.bf16.msra.mxu1 %v3682_v7  ;;  %v1405_v7 = vld [vmem:[%s3380_s29 + $0x7a0] sm:$0xff]  ;;  %v1919_v40 = vld [vmem:[%s3380_s29 + $0x978] sm:$0xff] }
 0x132   : > { %3007 = vmatprep.subr.bf16.mxu0 %v3313_v3  ;;  %3088 = vmatprep.subr.bf16.mxu1 %v3313_v3 }
 0x133   : > { %1646 = vmatmul.mubr.f32.gmra.mrb[68].mxu0 %v1397_v52  ;;  %2201 = vmatmul.mubr.f32.gmra.mrb[68].mxu1 %v1952_v43  ;;  %v1363_v52 = vld [vmem:[%s3380_s29 + $0x650] sm:$0xff] }
 0x134   : > { %1650 = vmatprep.mubr.f32.mxu0 %v1402_v45  ;;  %2205 = vmatprep.mubr.f32.mxu1 %v1957_v17  ;;  %v1918_v43 = vld [vmem:[%s3380_s29 + $0x970] sm:$0xff]  ;;  %v1368_v45 = vld [vmem:[%s3380_s29 + $0x678] sm:$0xff] }
 0x135   : > { %3009 = vmatpush1.bf16.msra.mxu0 %v3698_v18  ;;  %3090 = vmatpush1.bf16.msra.mxu1 %v3698_v18  ;;  %v1964_v18 = vld [vmem:[%s3380_s29 + $0xae0] sm:$0xff]  ;;  %v1923_v17 = vld [vmem:[%s3380_s29 + $0x998] sm:$0xff] }
 0x136   : > { %3010 = vmatprep.subr.bf16.mxu0 %v3313_v3  ;;  %3091 = vmatprep.subr.bf16.mxu1 %v3313_v3  ;;  %v1409_v3 = vld [vmem:[%s3380_s29 + $0x7c0] sm:$0xff] }
 0x137   : > { %1651 = vmatmul.mubr.f32.gmra.mrb[70].mxu0 %v1401_v60  ;;  %2206 = vmatmul.mubr.f32.gmra.mrb[70].mxu1 %v1956_v46  ;;  %v1367_v60 = vld [vmem:[%s3380_s29 + $0x670] sm:$0xff] }
 0x138   : > { %1655 = vmatprep.mubr.f32.mxu0 %v1406_v48  ;;  %2210 = vmatprep.mubr.f32.mxu1 %v1961_v49  ;;  %v1922_v46 = vld [vmem:[%s3380_s29 + $0x990] sm:$0xff]  ;;  %v1372_v48 = vld [vmem:[%s3380_s29 + $0x698] sm:$0xff] }
 0x139   : > { %3012 = vmatpush1.bf16.msra.mxu0 %v3714_v30  ;;  %3093 = vmatpush1.bf16.msra.mxu1 %v3714_v30  ;;  %v1968_v30 = vld [vmem:[%s3380_s29 + $0xb00] sm:$0xff]  ;;  %v1927_v49 = vld [vmem:[%s3380_s29 + $0x9b8] sm:$0xff] }
 0x13b   : > { %1656 = vmatmul.mubr.f32.gmra.mrb[72].mxu0 %v1405_v7  ;;  %2211 = vmatmul.mubr.f32.gmra.mrb[72].mxu1 %v1960_v20  ;;  %v1371_v7 = vld [vmem:[%s3380_s29 + $0x690] sm:$0xff] }
 0x13c   : > { %1660 = vmatprep.mubr.f32.mxu0 %v1410_v51  ;;  %2215 = vmatprep.mubr.f32.mxu1 %v1965_v53  ;;  %v1926_v20 = vld [vmem:[%s3380_s29 + $0x9b0] sm:$0xff]  ;;  %v1376_v51 = vld [vmem:[%s3380_s29 + $0x6b8] sm:$0xff] }
 0x13d   : > { %v1931_v53 = vld [vmem:[%s3380_s29 + $0x9d8] sm:$0xff] }
 0x13f   : > { %1661 = vmatmul.mubr.f32.gmra.mrb[74].mxu0 %v1409_v3  ;;  %2216 = vmatmul.mubr.f32.gmra.mrb[74].mxu1 %v1964_v18  ;;  %v1375_v3 = vld [vmem:[%s3380_s29 + $0x6b0] sm:$0xff] }
 0x140   : > { %1665 = vmatprep.mubr.f32.mxu0 %v1414_v54  ;;  %2220 = vmatprep.mubr.f32.mxu1 %v1969_v23  ;;  %v1930_v18 = vld [vmem:[%s3380_s29 + $0x9d0] sm:$0xff]  ;;  %v1380_v54 = vld [vmem:[%s3380_s29 + $0x6d8] sm:$0xff] }
 0x141   : > { %v1935_v23 = vld [vmem:[%s3380_s29 + $0x9f8] sm:$0xff] }
 0x143   : > { %1666 = vmatmul.mubr.f32.gmra.mrb[76].mxu0 %v1413_v56  ;;  %2221 = vmatmul.mubr.f32.gmra.mrb[76].mxu1 %v1968_v30 }
 0x144   : > { %1670 = vmatprep.mubr.f32.mxu0 %v1418_v57  ;;  %2225 = vmatprep.mubr.f32.mxu1 %v1973_v58 }
 0x147   : > { %1671 = vmatmul.mubr.f32.gmra.mrb[78].mxu0 %v1417_v26  ;;  %2226 = vmatmul.mubr.f32.gmra.mrb[78].mxu1 %v1972_v59  ;;  %v1379_v59 = vld [vmem:[%s3380_s29 + $0x6d0] sm:$0xff] }
 0x148   : > { %1675 = vmatprep.mubr.f32.mxu0 %v1422_v61  ;;  %2230 = vmatprep.mubr.f32.mxu1 %v1977_v62  ;;  %v1934_v61 = vld [vmem:[%s3380_s29 + $0x9f0] sm:$0xff]  ;;  %v1384_v62 = vld [vmem:[%s3380_s29 + $0x6f8] sm:$0xff] }
 0x14b   : > { %1676 = vmatmul.mubr.f32.gmra.mrb[80].mxu0 %v1421_v29  ;;  %2231 = vmatmul.mubr.f32.gmra.mrb[80].mxu1 %v1976_v63  ;;  %v1939_v29 = vld [vmem:[%s3380_s29 + $0xa18] sm:$0xff] }
 0x14c   : > { %1680 = vmatprep.mubr.f32.mxu0 %v1426_v1  ;;  %2235 = vmatprep.mubr.f32.mxu1 %v1981_v2 }
 0x14f   : > { %1681 = vmatmul.mubr.f32.gmra.mrb[82].mxu0 %v1425_v32  ;;  %2236 = vmatmul.mubr.f32.gmra.mrb[82].mxu1 %v1980_v5 }
 0x150   : > { %1685 = vmatprep.mubr.f32.mxu0 %v1430_v8  ;;  %2240 = vmatprep.mubr.f32.mxu1 %v1985_v10  ;;  %v1383_v8 = vld [vmem:[%s3380_s29 + $0x6f0] sm:$0xff] }
 0x151   : > { %v1938_v10 = vld [vmem:[%s3380_s29 + $0xa10] sm:$0xff] }
 0x153   : > { %1686 = vmatmul.mubr.f32.gmra.mrb[84].mxu0 %v1429_v35  ;;  %2241 = vmatmul.mubr.f32.gmra.mrb[84].mxu1 %v1984_v12  ;;  %v1388_v35 = vld [vmem:[%s3380_s29 + $0x718] sm:$0xff] }
 0x154   : > { %1690 = vmatprep.mubr.f32.mxu0 %v1434_v14  ;;  %2245 = vmatprep.mubr.f32.mxu1 %v1989_v4  ;;  %v1943_v12 = vld [vmem:[%s3380_s29 + $0xa38] sm:$0xff] }
 0x157   : > { %1691 = vmatmul.mubr.f32.gmra.mrb[86].mxu0 %v1433_v55  ;;  %2246 = vmatmul.mubr.f32.gmra.mrb[86].mxu1 %v1988_v38 }
 0x158   : > { %1695 = vmatprep.mubr.f32.mxu0 %v1438_v15  ;;  %2250 = vmatprep.mubr.f32.mxu1 %v1993_v16  ;;  %v1387_v16 = vld [vmem:[%s3380_s29 + $0x710] sm:$0xff] }
 0x15b   : > { %1696 = vmatmul.mubr.f32.gmra.mrb[88].mxu0 %v1437_v19  ;;  %2251 = vmatmul.mubr.f32.gmra.mrb[88].mxu1 %v1992_v41  ;;  %v1942_v19 = vld [vmem:[%s3380_s29 + $0xa30] sm:$0xff]  ;;  %v1392_v41 = vld [vmem:[%s3380_s29 + $0x738] sm:$0xff] }
 0x15c   : > { %1700 = vmatprep.mubr.f32.mxu0 %v1442_v22  ;;  %2255 = vmatprep.mubr.f32.mxu1 %v1997_v24  ;;  %v1947_v22 = vld [vmem:[%s3380_s29 + $0xa58] sm:$0xff] }
 0x15f   : > { %1701 = vmatmul.mubr.f32.gmra.mrb[90].mxu0 %v1441_v0  ;;  %2256 = vmatmul.mubr.f32.gmra.mrb[90].mxu1 %v1996_v6 }
 0x160   : > { %1705 = vmatprep.mubr.f32.mxu0 %v1446_v44  ;;  %2260 = vmatprep.mubr.f32.mxu1 %v2001_v25 }
 0x163   : > { %1706 = vmatmul.mubr.f32.gmra.mrb[92].mxu0 %v1445_v11  ;;  %2261 = vmatmul.mubr.f32.gmra.mrb[92].mxu1 %v2000_v27  ;;  %v1391_v11 = vld [vmem:[%s3380_s29 + $0x730] sm:$0xff] }
 0x164   : > { %1710 = vmatprep.mubr.f32.mxu0 %v1450_v28  ;;  %2265 = vmatprep.mubr.f32.mxu1 %v2005_v47  ;;  %v1946_v27 = vld [vmem:[%s3380_s29 + $0xa50] sm:$0xff]  ;;  %v1396_v28 = vld [vmem:[%s3380_s29 + $0x758] sm:$0xff] }
 0x165   : > { %v1951_v47 = vld [vmem:[%s3380_s29 + $0xa78] sm:$0xff] }
 0x167   : > { %1711 = vmatmul.mubr.f32.gmra.mrb[94].mxu0 %v1449_v21  ;;  %2266 = vmatmul.mubr.f32.gmra.mrb[94].mxu1 %v2004_v33 }
 0x168   : > { %1715 = vmatprep.mubr.f32.mxu0 %v1454_v9  ;;  %2270 = vmatprep.mubr.f32.mxu1 %v2009_v50 }
 0x16b   : > { %1716 = vmatmul.mubr.f32.gmra.mrb[96].mxu0 %v1453_v31  ;;  %2271 = vmatmul.mubr.f32.gmra.mrb[96].mxu1 %v2008_v34  ;;  %v1395_v34 = vld [vmem:[%s3380_s29 + $0x750] sm:$0xff] }
 0x16c   : > { %1720 = vmatprep.mubr.f32.mxu0 %v1458_v36  ;;  %2275 = vmatprep.mubr.f32.mxu1 %v2013_v37  ;;  %v1950_v36 = vld [vmem:[%s3380_s29 + $0xa70] sm:$0xff]  ;;  %v1400_v37 = vld [vmem:[%s3380_s29 + $0x778] sm:$0xff] }
 0x16f   : > { %1721 = vmatmul.mubr.f32.gmra.mrb[98].mxu0 %v1457_v42  ;;  %2276 = vmatmul.mubr.f32.gmra.mrb[98].mxu1 %v2012_v39  ;;  %v1955_v42 = vld [vmem:[%s3380_s29 + $0xa98] sm:$0xff] }
 0x170   : > { %2717 = vmatprep.mubr.msk.f32.mxu0 %vm325_vm0, %v1364_v13  ;;  %2742 = vmatprep.mubr.msk.f32.mxu1 %vm325_vm0, %v1919_v40 }
 0x173   : > { %1791 = vmatmul.mubr.f32.vlgmr.msra.gmra.mrb[50].mxu0 %v1363_v52  ;;  %2346 = vmatmul.mubr.f32.vlgmr.msra.gmra.mrb[50].mxu1 %v1918_v43 }
 0x174   : > { %2718 = vmatprep.mubr.msk.f32.mxu0 %vm325_vm0, %v1368_v45  ;;  %2743 = vmatprep.mubr.msk.f32.mxu1 %vm325_vm0, %v1923_v17  ;;  %v1399_v45 = vld [vmem:[%s3380_s29 + $0x770] sm:$0xff] }
 0x175   : > { %v1954_v17 = vld [vmem:[%s3380_s29 + $0xa90] sm:$0xff] }
 0x177   : > { %1796 = vmatmul.mubr.f32.gmra.mrb[52].mxu0 %v1367_v60  ;;  %2351 = vmatmul.mubr.f32.gmra.mrb[52].mxu1 %v1922_v46  ;;  %v1404_v60 = vld [vmem:[%s3380_s29 + $0x798] sm:$0xff] }
 0x178   : > { %2719 = vmatprep.mubr.msk.f32.mxu0 %vm325_vm0, %v1372_v48  ;;  %2744 = vmatprep.mubr.msk.f32.mxu1 %vm325_vm0, %v1927_v49  ;;  %v1959_v46 = vld [vmem:[%s3380_s29 + $0xab8] sm:$0xff] }
 0x17b   : > { %1801 = vmatmul.mubr.f32.gmra.mrb[54].mxu0 %v1371_v7  ;;  %2356 = vmatmul.mubr.f32.gmra.mrb[54].mxu1 %v1926_v20 }
 0x17c   : > { %2720 = vmatprep.mubr.msk.f32.mxu0 %vm325_vm0, %v1376_v51  ;;  %2745 = vmatprep.mubr.msk.f32.mxu1 %vm325_vm0, %v1931_v53  ;;  %v1403_v53 = vld [vmem:[%s3380_s29 + $0x790] sm:$0xff] }
 0x17e   : > { %v4158_v56 = vpop.f32.mrb[0].mxu0  ;;  %v4160_v30 = vpop.f32.mrb[0].mxu1 }
 0x17f   : > { %v1336_v57 = vmax.f32 %v4158_v56, %v4160_v30  ;;  %v659_v58 = vpop.f32.mrb[1].mxu0  ;;  %v1214_v26 = vpop.f32.mrb[1].mxu1  ;;  %1806 = vmatmul.mubr.f32.gmra.mrb[56].mxu0 %v1375_v3  ;;  %2361 = vmatmul.mubr.f32.gmra.mrb[56].mxu1 %v1930_v18  ;;  %v1958_v3 = vld [vmem:[%s3380_s29 + $0xab0] sm:$0xff]  ;;  %v1408_v18 = vld [vmem:[%s3380_s29 + $0x7b8] sm:$0xff] }
 0x180   : > { %2721 = vmatprep.mubr.msk.f32.mxu0 %vm325_vm0, %v1380_v54  ;;  %2746 = vmatprep.mubr.msk.f32.mxu1 %vm325_vm0, %v1935_v23  ;;  %v1963_v54 = vld [vmem:[%s3380_s29 + $0xad8] sm:$0xff] }
 0x182   : > { %v4170_v63 = vpop.f32.mrb[2].mxu0  ;;  %v4172_v1 = vpop.f32.mrb[2].mxu1 }
 0x183   : > { %v664_v32 = vpop.f32.mrb[3].mxu0  ;;  %v1219_v5 = vpop.f32.mrb[3].mxu1  ;;  %1811 = vmatmul.mubr.f32.gmra.mrb[58].mxu0 %v1379_v59  ;;  %2366 = vmatmul.mubr.f32.gmra.mrb[58].mxu1 %v1934_v61  ;;  %v4599_v56 = vmax.f32 %v4170_v63, %v4172_v1 }
 0x184   : > { %2722 = vmatprep.mubr.msk.f32.mxu0 %vm325_vm0, %v1384_v62  ;;  %2747 = vmatprep.mubr.msk.f32.mxu1 %vm325_vm0, %v1939_v29  ;;  %v1407_v62 = vld [vmem:[%s3380_s29 + $0x7b0] sm:$0xff]  ;;  %v1412_v32 = vld [vmem:[%s3380_s29 + $0x7d8] sm:$0xff] }
 0x185   : > { %v1962_v29 = vld [vmem:[%s3380_s29 + $0xad0] sm:$0xff]  ;;  %v1967_v5 = vld [vmem:[%s3380_s29 + $0xaf8] sm:$0xff] }
 0x186   : > { %v4182_v14 = vpop.f32.mrb[4].mxu0  ;;  %v4184_v4 = vpop.f32.mrb[4].mxu1 }
 0x187   : > { %v669_v38 = vpop.f32.mrb[5].mxu0  ;;  %v1224_v15 = vpop.f32.mrb[5].mxu1  ;;  %1816 = vmatmul.mubr.f32.gmra.mrb[60].mxu0 %v1383_v8  ;;  %2371 = vmatmul.mubr.f32.gmra.mrb[60].mxu1 %v1938_v10 }
 0x188   : > { %2723 = vmatprep.mubr.msk.f32.mxu0 %vm325_vm0, %v1388_v35  ;;  %2748 = vmatprep.mubr.msk.f32.mxu1 %vm325_vm0, %v1943_v12  ;;  %v1411_v15 = vld [vmem:[%s3380_s29 + $0x7d0] sm:$0xff] }
 0x18a   : > { %v4194_v24 = vpop.f32.mrb[6].mxu0  ;;  %v4196_v0 = vpop.f32.mrb[6].mxu1 }
 0x18b   : > { %v674_v44 = vpop.f32.mrb[7].mxu0  ;;  %v1229_v25 = vpop.f32.mrb[7].mxu1  ;;  %1821 = vmatmul.mubr.f32.gmra.mrb[62].mxu0 %v1387_v16  ;;  %2376 = vmatmul.mubr.f32.gmra.mrb[62].mxu1 %v1942_v19  ;;  %v1966_v16 = vld [vmem:[%s3380_s29 + $0xaf0] sm:$0xff]  ;;  %v1416_v19 = vld [vmem:[%s3380_s29 + $0x7f8] sm:$0xff] }
 0x18c   : > { %2724 = vmatprep.mubr.msk.f32.mxu0 %vm325_vm0, %v1392_v41  ;;  %2749 = vmatprep.mubr.msk.f32.mxu1 %vm325_vm0, %v1947_v22  ;;  %v1971_v41 = vld [vmem:[%s3380_s29 + $0xb18] sm:$0xff] }
 0x18e   : > { %v4206_v21 = vpop.f32.mrb[8].mxu0  ;;  %v4208_v33 = vpop.f32.mrb[8].mxu1 }
 0x18f   : > { %v679_v50 = vpop.f32.mrb[9].mxu0  ;;  %v1234_v31 = vpop.f32.mrb[9].mxu1  ;;  %1826 = vmatmul.mubr.f32.gmra.mrb[64].mxu0 %v1391_v11  ;;  %2381 = vmatmul.mubr.f32.gmra.mrb[64].mxu1 %v1946_v27 }
 0x190   : > { %2725 = vmatprep.mubr.msk.f32.mxu0 %vm325_vm0, %v1396_v28  ;;  %2750 = vmatprep.mubr.msk.f32.mxu1 %vm325_vm0, %v1951_v47  ;;  %v1415_v28 = vld [vmem:[%s3380_s29 + $0x7f0] sm:$0xff]  ;;  %v1420_v50 = vld [vmem:[%s3380_s29 + $0x818] sm:$0xff] }
 0x191   : > { %v1970_v47 = vld [vmem:[%s3380_s29 + $0xb10] sm:$0xff]  ;;  %v1975_v31 = vld [vmem:[%s3380_s29 + $0xb38] sm:$0xff] }
 0x192   : > { %v4218_v39 = vpop.f32.mrb[10].mxu0  ;;  %v4220_v13 = vpop.f32.mrb[10].mxu1 }
 0x193   : > { %v684_v52 = vpop.f32.mrb[11].mxu0  ;;  %v1239_v43 = vpop.f32.mrb[11].mxu1  ;;  %1831 = vmatmul.mubr.f32.gmra.mrb[66].mxu0 %v1395_v34  ;;  %2386 = vmatmul.mubr.f32.gmra.mrb[66].mxu1 %v1950_v36 }
 0x194   : > { %2726 = vmatprep.mubr.msk.f32.mxu0 %vm325_vm0, %v1400_v37  ;;  %2751 = vmatprep.mubr.msk.f32.mxu1 %vm325_vm0, %v1955_v42  ;;  %v1419_v43 = vld [vmem:[%s3380_s29 + $0x810] sm:$0xff] }
 0x196   : > { %v4230_v48 = vpop.f32.mrb[12].mxu0  ;;  %v4232_v49 = vpop.f32.mrb[12].mxu1 }
 0x197   : > { %v689_v20 = vpop.f32.mrb[13].mxu0  ;;  %v1244_v51 = vpop.f32.mrb[13].mxu1  ;;  %1836 = vmatmul.mubr.f32.gmra.mrb[68].mxu0 %v1399_v45  ;;  %2391 = vmatmul.mubr.f32.gmra.mrb[68].mxu1 %v1954_v17  ;;  %v1974_v45 = vld [vmem:[%s3380_s29 + $0xb30] sm:$0xff]  ;;  %v1424_v17 = vld [vmem:[%s3380_s29 + $0x838] sm:$0xff] }
 0x198   : > { %2727 = vmatprep.mubr.msk.f32.mxu0 %vm325_vm0, %v1404_v60  ;;  %2752 = vmatprep.mubr.msk.f32.mxu1 %vm325_vm0, %v1959_v46  ;;  %v1979_v60 = vld [vmem:[%s3380_s29 + $0xb58] sm:$0xff] }
 0x19a   : > { %v4242_v23 = vpop.f32.mrb[14].mxu0  ;;  %v4244_v58 = vpop.f32.mrb[14].mxu1 }
 0x19b   : > { %v694_v59 = vpop.f32.mrb[15].mxu0  ;;  %v1249_v61 = vpop.f32.mrb[15].mxu1  ;;  %1841 = vmatmul.mubr.f32.gmra.mrb[70].mxu0 %v1403_v53  ;;  %2396 = vmatmul.mubr.f32.gmra.mrb[70].mxu1 %v1958_v3 }
 0x19c   : > { %2728 = vmatprep.mubr.msk.f32.mxu0 %vm325_vm0, %v1408_v18  ;;  %2753 = vmatprep.mubr.msk.f32.mxu1 %vm325_vm0, %v1963_v54  ;;  %v1423_v18 = vld [vmem:[%s3380_s29 + $0x830] sm:$0xff]  ;;  %v1428_v59 = vld [vmem:[%s3380_s29 + $0x858] sm:$0xff] }
 0x19d   : > { %v1978_v54 = vld [vmem:[%s3380_s29 + $0xb50] sm:$0xff]  ;;  %v1983_v61 = vld [vmem:[%s3380_s29 + $0xb78] sm:$0xff] }
 0x19e   : > { %v4254_v8 = vpop.f32.mrb[16].mxu0  ;;  %v4256_v10 = vpop.f32.mrb[16].mxu1 }
 0x19f   : > { %v699_v12 = vpop.f32.mrb[17].mxu0  ;;  %v1254_v38 = vpop.f32.mrb[17].mxu1  ;;  %1846 = vmatmul.mubr.f32.gmra.mrb[72].mxu0 %v1407_v62  ;;  %2401 = vmatmul.mubr.f32.gmra.mrb[72].mxu1 %v1962_v29 }
 0x1a0   : > { %2729 = vmatprep.mubr.msk.f32.mxu0 %vm325_vm0, %v1412_v32  ;;  %2754 = vmatprep.mubr.msk.f32.mxu1 %vm325_vm0, %v1967_v5  ;;  %v1427_v38 = vld [vmem:[%s3380_s29 + $0x850] sm:$0xff] }
 0x1a2   : > { %v4266_v22 = vpop.f32.mrb[18].mxu0  ;;  %v4268_v44 = vpop.f32.mrb[18].mxu1 }
 0x1a3   : > { %v704_v11 = vpop.f32.mrb[19].mxu0  ;;  %v1259_v27 = vpop.f32.mrb[19].mxu1  ;;  %1851 = vmatmul.mubr.f32.gmra.mrb[74].mxu0 %v1411_v15  ;;  %2406 = vmatmul.mubr.f32.gmra.mrb[74].mxu1 %v1966_v16  ;;  %v1982_v15 = vld [vmem:[%s3380_s29 + $0xb70] sm:$0xff]  ;;  %v1432_v16 = vld [vmem:[%s3380_s29 + $0x878] sm:$0xff] }
 0x1a4   : > { %2730 = vmatprep.mubr.msk.f32.mxu0 %vm325_vm0, %v1416_v19  ;;  %2755 = vmatprep.mubr.msk.f32.mxu1 %vm325_vm0, %v1971_v41  ;;  %v1987_v19 = vld [vmem:[%s3380_s29 + $0xb98] sm:$0xff] }
 0x1a6   : > { %v4278_v34 = vpop.f32.mrb[20].mxu0  ;;  %v4280_v36 = vpop.f32.mrb[20].mxu1 }
 0x1a7   : > { %v709_v42 = vpop.f32.mrb[21].mxu0  ;;  %v1264_v52 = vpop.f32.mrb[21].mxu1  ;;  %1856 = vmatmul.mubr.f32.gmra.mrb[76].mxu0 %v1415_v28  ;;  %2411 = vmatmul.mubr.f32.gmra.mrb[76].mxu1 %v1970_v47 }
 0x1a8   : > { %2731 = vmatprep.mubr.msk.f32.mxu0 %vm325_vm0, %v1420_v50  ;;  %2756 = vmatprep.mubr.msk.f32.mxu1 %vm325_vm0, %v1975_v31  ;;  %v1431_v50 = vld [vmem:[%s3380_s29 + $0x870] sm:$0xff]  ;;  %v1436_v42 = vld [vmem:[%s3380_s29 + $0x898] sm:$0xff] }
 0x1a9   : > { %v1986_v31 = vld [vmem:[%s3380_s29 + $0xb90] sm:$0xff]  ;;  %v1991_v52 = vld [vmem:[%s3380_s29 + $0xbb8] sm:$0xff] }
 0x1aa   : > { %v4290_v46 = vpop.f32.mrb[22].mxu0  ;;  %v4292_v20 = vpop.f32.mrb[22].mxu1 }
 0x1ab   : > { %v714_v53 = vpop.f32.mrb[23].mxu0  ;;  %v1269_v3 = vpop.f32.mrb[23].mxu1  ;;  %1861 = vmatmul.mubr.f32.gmra.mrb[78].mxu0 %v1419_v43  ;;  %2416 = vmatmul.mubr.f32.gmra.mrb[78].mxu1 %v1974_v45 }
 0x1ac   : > { %2732 = vmatprep.mubr.msk.f32.mxu0 %vm325_vm0, %v1424_v17  ;;  %2757 = vmatprep.mubr.msk.f32.mxu1 %vm325_vm0, %v1979_v60  ;;  %v1435_v3 = vld [vmem:[%s3380_s29 + $0x890] sm:$0xff] }
 0x1ae   : > { %v4302_v62 = vpop.f32.mrb[24].mxu0  ;;  %v4304_v29 = vpop.f32.mrb[24].mxu1 }
 0x1af   : > { %v719_v5 = vpop.f32.mrb[25].mxu0  ;;  %v1274_v12 = vpop.f32.mrb[25].mxu1  ;;  %1866 = vmatmul.mubr.f32.gmra.mrb[80].mxu0 %v1423_v18  ;;  %2421 = vmatmul.mubr.f32.gmra.mrb[80].mxu1 %v1978_v54  ;;  %v1990_v18 = vld [vmem:[%s3380_s29 + $0xbb0] sm:$0xff]  ;;  %v1440_v54 = vld [vmem:[%s3380_s29 + $0x8b8] sm:$0xff] }
 0x1b0   : > { %2733 = vmatprep.mubr.msk.f32.mxu0 %vm325_vm0, %v1428_v59  ;;  %2758 = vmatprep.mubr.msk.f32.mxu1 %vm325_vm0, %v1983_v61  ;;  %v1995_v59 = vld [vmem:[%s3380_s29 + $0xbd8] sm:$0xff] }
 0x1b2   : > { %v4314_v41 = vpop.f32.mrb[26].mxu0  ;;  %v4316_v11 = vpop.f32.mrb[26].mxu1 }
 0x1b3   : > { %v724_v28 = vpop.f32.mrb[27].mxu0  ;;  %v1279_v47 = vpop.f32.mrb[27].mxu1  ;;  %1871 = vmatmul.mubr.f32.gmra.mrb[82].mxu0 %v1427_v38  ;;  %2426 = vmatmul.mubr.f32.gmra.mrb[82].mxu1 %v1982_v15 }
 0x1b4   : > { %2734 = vmatprep.mubr.msk.f32.mxu0 %vm325_vm0, %v1432_v16  ;;  %2759 = vmatprep.mubr.msk.f32.mxu1 %vm325_vm0, %v1987_v19  ;;  %v1439_v16 = vld [vmem:[%s3380_s29 + $0x8b0] sm:$0xff]  ;;  %v1444_v28 = vld [vmem:[%s3380_s29 + $0x8d8] sm:$0xff] }
 0x1b5   : > { %v1994_v19 = vld [vmem:[%s3380_s29 + $0xbd0] sm:$0xff]  ;;  %v1999_v47 = vld [vmem:[%s3380_s29 + $0xbf8] sm:$0xff] }
 0x1b6   : > { %v4326_v43 = vpop.f32.mrb[28].mxu0  ;;  %v4328_v45 = vpop.f32.mrb[28].mxu1 }
 0x1b7   : > { %v729_v60 = vpop.f32.mrb[29].mxu0  ;;  %v1284_v53 = vpop.f32.mrb[29].mxu1  ;;  %1876 = vmatmul.mubr.f32.gmra.mrb[84].mxu0 %v1431_v50  ;;  %2431 = vmatmul.mubr.f32.gmra.mrb[84].mxu1 %v1986_v31 }
 0x1b8   : > { %2735 = vmatprep.mubr.msk.f32.mxu0 %vm325_vm0, %v1436_v42  ;;  %2760 = vmatprep.mubr.msk.f32.mxu1 %vm325_vm0, %v1991_v52  ;;  %v1443_v53 = vld [vmem:[%s3380_s29 + $0x8d0] sm:$0xff] }
 0x1ba   : > { %v4338_v61 = vpop.f32.mrb[30].mxu0  ;;  %v4340_v5 = vpop.f32.mrb[30].mxu1 }
 0x1bb   : > { %v734_v38 = vpop.f32.mrb[31].mxu0  ;;  %v1289_v15 = vpop.f32.mrb[31].mxu1  ;;  %1881 = vmatmul.mubr.f32.gmra.mrb[86].mxu0 %v1435_v3  ;;  %2436 = vmatmul.mubr.f32.gmra.mrb[86].mxu1 %v1990_v18  ;;  %v1998_v3 = vld [vmem:[%s3380_s29 + $0xbf0] sm:$0xff]  ;;  %v1448_v18 = vld [vmem:[%s3380_s29 + $0x8f8] sm:$0xff] }
 0x1bc   : > { %2736 = vmatprep.mubr.msk.f32.mxu0 %vm325_vm0, %v1440_v54  ;;  %2761 = vmatprep.mubr.msk.f32.mxu1 %vm325_vm0, %v1995_v59  ;;  %v2003_v54 = vld [vmem:[%s3380_s29 + $0xc18] sm:$0xff] }
 0x1bd   : > { %v2011_v15 = vld [vmem:[%s3380_s29 + $0xc58] sm:$0xff] }
 0x1be   : > { %v4350_v50 = vpop.f32.mrb[32].mxu0  ;;  %v4352_v31 = vpop.f32.mrb[32].mxu1 }
 0x1bf   : > { %v739_v52 = vpop.f32.mrb[33].mxu0  ;;  %v1294_v60 = vpop.f32.mrb[33].mxu1  ;;  %1886 = vmatmul.mubr.f32.gmra.mrb[88].mxu0 %v1439_v16  ;;  %2441 = vmatmul.mubr.f32.gmra.mrb[88].mxu1 %v1994_v19 }
 0x1c0   : > { %2737 = vmatprep.mubr.msk.f32.mxu0 %vm325_vm0, %v1444_v28  ;;  %2762 = vmatprep.mubr.msk.f32.mxu1 %vm325_vm0, %v1999_v47  ;;  %v1447_v28 = vld [vmem:[%s3380_s29 + $0x8f0] sm:$0xff]  ;;  %v1452_v52 = vld [vmem:[%s3380_s29 + $0x918] sm:$0xff] }
 0x1c1   : > { %v2002_v47 = vld [vmem:[%s3380_s29 + $0xc10] sm:$0xff]  ;;  %v2007_v60 = vld [vmem:[%s3380_s29 + $0xc38] sm:$0xff] }
 0x1c2   : > { %v4362_v59 = vpop.f32.mrb[34].mxu0  ;;  %v4364_v38 = vpop.f32.mrb[34].mxu1 }
 0x1c3   : > { %v744_v16 = vpop.f32.mrb[35].mxu0  ;;  %v1299_v19 = vpop.f32.mrb[35].mxu1  ;;  %1891 = vmatmul.mubr.f32.gmra.mrb[90].mxu0 %v1443_v53  ;;  %2446 = vmatmul.mubr.f32.gmra.mrb[90].mxu1 %v1998_v3  ;;  %v2015_v53 = vld [vmem:[%s3380_s29 + $0xc78] sm:$0xff] }
 0x1c4   : > { %2738 = vmatprep.mubr.msk.f32.mxu0 %vm325_vm0, %v1448_v18  ;;  %2763 = vmatprep.mubr.msk.f32.mxu1 %vm325_vm0, %v2003_v54  ;;  %v1451_v18 = vld [vmem:[%s3380_s29 + $0x910] sm:$0xff]  ;;  %v1456_v19 = vld [vmem:[%s3380_s29 + $0x938] sm:$0xff] }
 0x1c5   : > { %v2006_v54 = vld [vmem:[%s3380_s29 + $0xc30] sm:$0xff] }
 0x1c6   : > { %v4374_v42 = vpop.f32.mrb[36].mxu0  ;;  %v4376_v12 = vpop.f32.mrb[36].mxu1 }
 0x1c7   : > { %v749_v3 = vpop.f32.mrb[37].mxu0  ;;  %v1304_v16 = vpop.f32.mrb[37].mxu1  ;;  %1896 = vmatmul.mubr.f32.gmra.mrb[92].mxu0 %v1447_v28  ;;  %2451 = vmatmul.mubr.f32.gmra.mrb[92].mxu1 %v2002_v47 }
 0x1c8   : > { %2739 = vmatprep.mubr.msk.f32.mxu0 %vm325_vm0, %v1452_v52  ;;  %2764 = vmatprep.mubr.msk.f32.mxu1 %vm325_vm0, %v2007_v60  ;;  %v1455_v52 = vld [vmem:[%s3380_s29 + $0x930] sm:$0xff]  ;;  %v1460_v16 = vld [vmem:[%s3380_s29 + $0x958] sm:$0xff] }
 0x1c9   : > { %v2010_v60 = vld [vmem:[%s3380_s29 + $0xc50] sm:$0xff] }
 0x1ca   : > { %v4386_v17 = vpop.f32.mrb[38].mxu0  ;;  %v4388_v27 = vpop.f32.mrb[38].mxu1 }
 0x1cb   : > { %v754_v47 = vpop.f32.mrb[39].mxu0  ;;  %v1309_v3 = vpop.f32.mrb[39].mxu1  ;;  %1901 = vmatmul.mubr.f32.gmra.mrb[94].mxu0 %v1451_v18  ;;  %2456 = vmatmul.mubr.f32.gmra.mrb[94].mxu1 %v2006_v54  ;;  %v2014_v54 = vld [vmem:[%s3380_s29 + $0xc70] sm:$0xff] }
 0x1cc   : > { %2740 = vmatprep.mubr.msk.f32.mxu0 %vm325_vm0, %v1456_v19  ;;  %2765 = vmatprep.mubr.msk.f32.mxu1 %vm325_vm0, %v2011_v15  ;;  %v1459_v15 = vld [vmem:[%s3380_s29 + $0x950] sm:$0xff]  ;;  %s3295_s29 = smul.u32 200, %s4624_s13 }
 0x1ce   : > { %v4398_v32 = vpop.f32.mrb[40].mxu0  ;;  %v4400_v51 = vpop.f32.mrb[40].mxu1  ;;  %s4445_s13 = scalar_lea.vmem %s4598_s3, %s3295_s29 }
 0x1cf   : > { %v759_v3 = vpop.f32.mrb[41].mxu0  ;;  %v1314_v18 = vpop.f32.mrb[41].mxu1  ;;  %1906 = vmatmul.mubr.f32.gmra.mrb[96].mxu0 %v1455_v52  ;;  %2461 = vmatmul.mubr.f32.gmra.mrb[96].mxu1 %v2010_v60 }
 0x1d0   : > { %2741 = vmatprep.mubr.msk.f32.mxu0 %vm325_vm0, %v1460_v16  ;;  %2766 = vmatprep.mubr.msk.f32.mxu1 %vm325_vm0, %v2015_v53 }
 0x1d2   : > { %v4408_v19 = vpop.f32.mrb[42].mxu0  ;;  %v4410_v28 = vpop.f32.mrb[42].mxu1 }
 0x1d3   : > { %v764_v25 = vpop.f32.mrb[43].mxu0  ;;  %v1319_v35 = vpop.f32.mrb[43].mxu1  ;;  %1911 = vmatmul.mubr.f32.gmra.mrb[98].mxu0 %v1459_v15  ;;  %2466 = vmatmul.mubr.f32.gmra.mrb[98].mxu1 %v2014_v54 }
 0x1d6   : > { %v4414_v3 = vpop.f32.mrb[44].mxu0  ;;  %v4416_v52 = vpop.f32.mrb[44].mxu1 }
 0x1d7   : > { %v769_v60 = vpop.f32.mrb[45].mxu0  ;;  %v1324_v16 = vpop.f32.mrb[45].mxu1 }
 0x1da   : > { %v4420_v18 = vpop.f32.mrb[46].mxu0  ;;  %v4422_v47 = vpop.f32.mrb[46].mxu1 }
 0x1db   : > { %v774_v35 = vpop.f32.mrb[47].mxu0  ;;  %v1329_v15 = vpop.f32.mrb[47].mxu1 }
 0x1dc   : > { %v4436_v35 = vld [vmem:[%s4597_s2] ss:$0 sm:$0xff] }
 0x1de   : > { %v4426_v54 = vpop.f32.mrb[48].mxu0  ;;  %v4428_v37 = vpop.f32.mrb[48].mxu1 }
 0x1df   : > { %v779_v53 = vpop.f32.mrb[49].mxu0  ;;  %v1334_v60 = vpop.f32.mrb[49].mxu1 }
 0x246   : > { %v1792_v16 = vpop.f32.mrb[50].mxu0  ;;  %v2347_v7 = vpop.f32.mrb[50].mxu1 }
 0x247   : > { %v2471_v40 = vmax.f32 %v1792_v16, %v2347_v7  ;;  %v1794_v9 = vpop.f32.mrb[51].mxu0  ;;  %v2349_v6 = vpop.f32.mrb[51].mxu1 }
 0x249   : > { %v2496_v15 = vmax.f32 %v1336_v57, %v2471_v40 }
 0x24a   : > { %v1797_v25 = vpop.f32.mrb[52].mxu0  ;;  %v2352_v55 = vpop.f32.mrb[52].mxu1 }
 0x24b   : > { %v2528_v53 = vadd.f32 %v4436_v35, %v2496_v15  ;;  %v2472_v60 = vmax.f32 %v1797_v25, %v2352_v55  ;;  %v1799_v26 = vpop.f32.mrb[53].mxu0  ;;  %v2354_v2 = vpop.f32.mrb[53].mxu1  ;;  %v4600_v25 = vmax.f32 %v4182_v14, %v4184_v4 }
 0x24d   : > { %v2553_v6 = vmax.f32 %v2528_v53, 0.0  ;;  %v2497_v30 = vmax.f32 %v4599_v56, %v2472_v60 }
 0x24e   : > { %v1802_v57 = vpop.f32.mrb[54].mxu0  ;;  %v2357_v9 = vpop.f32.mrb[54].mxu1 }
 0x24f   : > { %2579 = vst.msk [vmem:[%s4445_s13] sm:$0xff] %vm2578_vm1, %v2553_v6  ;;  %v2529_v55 = vadd.f32 %v4436_v35, %v2497_v30  ;;  %v2473_v2 = vmax.f32 %v1802_v57, %v2357_v9  ;;  %v1804_v40 = vpop.f32.mrb[55].mxu0  ;;  %v2359_v7 = vpop.f32.mrb[55].mxu1  ;;  %v4601_v30 = vmax.f32 %v4194_v24, %v4196_v0 }
 0x251   : > { %v2554_v26 = vmax.f32 %v2529_v55, 0.0  ;;  %v2498_v16 = vmax.f32 %v4600_v25, %v2473_v2 }
 0x252   : > { %v1807_v15 = vpop.f32.mrb[56].mxu0  ;;  %v2362_v53 = vpop.f32.mrb[56].mxu1 }
 0x253   : > { %2580 = vst.msk [vmem:[%s4445_s13 + $0x8] sm:$0xff] %vm2578_vm1, %v2554_v26  ;;  %v2530_v63 = vadd.f32 %v4436_v35, %v2498_v16  ;;  %v2474_v1 = vmax.f32 %v1807_v15, %v2362_v53  ;;  %v1809_v60 = vpop.f32.mrb[57].mxu0  ;;  %v2364_v6 = vpop.f32.mrb[57].mxu1  ;;  %v4602_v26 = vmax.f32 %v4206_v21, %v4208_v33 }
 0x254   : > { %v4603_v60 = vmax.f32 %v4218_v39, %v4220_v13 }
 0x255   : > { %v2555_v56 = vmax.f32 %v2530_v63, 0.0  ;;  %v2499_v57 = vmax.f32 %v4601_v30, %v2474_v1 }
 0x256   : > { %v1812_v9 = vpop.f32.mrb[58].mxu0  ;;  %v2367_v55 = vpop.f32.mrb[58].mxu1 }
 0x257   : > { %2581 = vst.msk [vmem:[%s4445_s13 + $0x10] sm:$0xff] %vm2578_vm1, %v2555_v56  ;;  %v2531_v14 = vadd.f32 %v4436_v35, %v2499_v57  ;;  %v2475_v4 = vmax.f32 %v1812_v9, %v2367_v55  ;;  %v1814_v2 = vpop.f32.mrb[59].mxu0  ;;  %v2369_v40 = vpop.f32.mrb[59].mxu1 }
 0x259   : > { %v2556_v7 = vmax.f32 %v2531_v14, 0.0  ;;  %v2500_v25 = vmax.f32 %v4602_v26, %v2475_v4  ;;  %v4604_v14 = vmax.f32 %v4230_v48, %v4232_v49 }
 0x25a   : > { %v1817_v16 = vpop.f32.mrb[60].mxu0  ;;  %v2372_v15 = vpop.f32.mrb[60].mxu1 }
 0x25b   : > { %2582 = vst.msk [vmem:[%s4445_s13 + $0x18] sm:$0xff] %vm2578_vm1, %v2556_v7  ;;  %v2532_v24 = vadd.f32 %v4436_v35, %v2500_v25  ;;  %v2476_v0 = vmax.f32 %v1817_v16, %v2372_v15  ;;  %v1819_v53 = vpop.f32.mrb[61].mxu0  ;;  %v2374_v63 = vpop.f32.mrb[61].mxu1  ;;  %v4605_v16 = vmax.f32 %v4242_v23, %v4244_v58 }
 0x25d   : > { %v2557_v1 = vmax.f32 %v2532_v24, 0.0  ;;  %v2501_v6 = vmax.f32 %v4603_v60, %v2476_v0  ;;  %v4606_v60 = vmax.f32 %v4254_v8, %v4256_v10 }
 0x25e   : > { %v1822_v56 = vpop.f32.mrb[62].mxu0  ;;  %v2377_v30 = vpop.f32.mrb[62].mxu1 }
 0x25f   : > { %2583 = vst.msk [vmem:[%s4445_s13 + $0x20] sm:$0xff] %vm2578_vm1, %v2557_v1  ;;  %v2533_v21 = vadd.f32 %v4436_v35, %v2501_v6  ;;  %v2477_v33 = vmax.f32 %v1822_v56, %v2377_v30  ;;  %v1824_v57 = vpop.f32.mrb[63].mxu0  ;;  %v2379_v9 = vpop.f32.mrb[63].mxu1 }
 0x260   : > { %v4607_v9 = vmax.f32 %v4266_v22, %v4268_v44 }
 0x261   : > { %v2558_v55 = vmax.f32 %v2533_v21, 0.0  ;;  %v2502_v4 = vmax.f32 %v4604_v14, %v2477_v33 }
 0x262   : > { %v1827_v2 = vpop.f32.mrb[64].mxu0  ;;  %v2382_v40 = vpop.f32.mrb[64].mxu1 }
 0x263   : > { %2584 = vst.msk [vmem:[%s4445_s13 + $0x28] sm:$0xff] %vm2578_vm1, %v2558_v55  ;;  %v2534_v39 = vadd.f32 %v4436_v35, %v2502_v4  ;;  %v2478_v13 = vmax.f32 %v1827_v2, %v2382_v40  ;;  %v1829_v7 = vpop.f32.mrb[65].mxu0  ;;  %v2384_v26 = vpop.f32.mrb[65].mxu1 }
 0x265   : > { %v2559_v25 = vmax.f32 %v2534_v39, 0.0  ;;  %v2503_v15 = vmax.f32 %v4605_v16, %v2478_v13  ;;  %v4608_v13 = vmax.f32 %v4278_v34, %v4280_v36 }
 0x266   : > { %v1832_v24 = vpop.f32.mrb[66].mxu0  ;;  %v2387_v0 = vpop.f32.mrb[66].mxu1 }
 0x267   : > { %2585 = vst.msk [vmem:[%s4445_s13 + $0x30] sm:$0xff] %vm2578_vm1, %v2559_v25  ;;  %v2535_v48 = vadd.f32 %v4436_v35, %v2503_v15  ;;  %v2479_v49 = vmax.f32 %v1832_v24, %v2387_v0  ;;  %v1834_v53 = vpop.f32.mrb[67].mxu0  ;;  %v2389_v63 = vpop.f32.mrb[67].mxu1  ;;  %v4609_v0 = vmax.f32 %v4290_v46, %v4292_v20 }
 0x269   : > { %v2560_v1 = vmax.f32 %v2535_v48, 0.0  ;;  %v2504_v6 = vmax.f32 %v4606_v60, %v2479_v49 }
 0x26a   : > { %v1837_v56 = vpop.f32.mrb[68].mxu0  ;;  %v2392_v30 = vpop.f32.mrb[68].mxu1 }
 0x26b   : > { %2586 = vst.msk [vmem:[%s4445_s13 + $0x38] sm:$0xff] %vm2578_vm1, %v2560_v1  ;;  %v2536_v23 = vadd.f32 %v4436_v35, %v2504_v6  ;;  %v2480_v58 = vmax.f32 %v1837_v56, %v2392_v30  ;;  %v1839_v21 = vpop.f32.mrb[69].mxu0  ;;  %v2394_v33 = vpop.f32.mrb[69].mxu1  ;;  %v4610_v6 = vmax.f32 %v4302_v62, %v4304_v29 }
 0x26d   : > { %v2561_v57 = vmax.f32 %v2536_v23, 0.0  ;;  %v2505_v55 = vmax.f32 %v4607_v9, %v2480_v58 }
 0x26e   : > { %v1842_v14 = vpop.f32.mrb[70].mxu0  ;;  %v2397_v4 = vpop.f32.mrb[70].mxu1 }
 0x26f   : > { %2587 = vst.msk [vmem:[%s4445_s13 + $0x40] sm:$0xff] %vm2578_vm1, %v2561_v57  ;;  %v2537_v8 = vadd.f32 %v4436_v35, %v2505_v55  ;;  %v2481_v10 = vmax.f32 %v1842_v14, %v2397_v4  ;;  %v1844_v2 = vpop.f32.mrb[71].mxu0  ;;  %v2399_v40 = vpop.f32.mrb[71].mxu1  ;;  %v4611_v57 = vmax.f32 %v4314_v41, %v4316_v11 }
 0x270   : > { %v4612_v2 = vmax.f32 %v4326_v43, %v4328_v45 }
 0x271   : > { %v2562_v39 = vmax.f32 %v2537_v8, 0.0  ;;  %v2506_v7 = vmax.f32 %v4608_v13, %v2481_v10 }
 0x272   : > { %v1847_v26 = vpop.f32.mrb[72].mxu0  ;;  %v2402_v25 = vpop.f32.mrb[72].mxu1 }
 0x273   : > { %2588 = vst.msk [vmem:[%s4445_s13 + $0x48] sm:$0xff] %vm2578_vm1, %v2562_v39  ;;  %v2538_v22 = vadd.f32 %v4436_v35, %v2506_v7  ;;  %v2482_v44 = vmax.f32 %v1847_v26, %v2402_v25  ;;  %v1849_v16 = vpop.f32.mrb[73].mxu0  ;;  %v2404_v15 = vpop.f32.mrb[73].mxu1 }
 0x275   : > { %v2563_v24 = vmax.f32 %v2538_v22, 0.0  ;;  %v2507_v48 = vmax.f32 %v4609_v0, %v2482_v44  ;;  %v4613_v22 = vmax.f32 %v4338_v61, %v4340_v5 }
 0x276   : > { %v1852_v49 = vpop.f32.mrb[74].mxu0  ;;  %v2407_v53 = vpop.f32.mrb[74].mxu1 }
 0x277   : > { %2589 = vst.msk [vmem:[%s4445_s13 + $0x50] sm:$0xff] %vm2578_vm1, %v2563_v24  ;;  %v2539_v34 = vadd.f32 %v4436_v35, %v2507_v48  ;;  %v2483_v36 = vmax.f32 %v1852_v49, %v2407_v53  ;;  %v1854_v63 = vpop.f32.mrb[75].mxu0  ;;  %v2409_v1 = vpop.f32.mrb[75].mxu1  ;;  %v4614_v49 = vmax.f32 %v4350_v50, %v4352_v31 }
 0x279   : > { %v2564_v60 = vmax.f32 %v2539_v34, 0.0  ;;  %v2508_v56 = vmax.f32 %v4610_v6, %v2483_v36  ;;  %v4615_v6 = vmax.f32 %v4362_v59, %v4364_v38 }
 0x27a   : > { %v1857_v30 = vpop.f32.mrb[76].mxu0  ;;  %v2412_v23 = vpop.f32.mrb[76].mxu1 }
 0x27b   : > { %2590 = vst.msk [vmem:[%s4445_s13 + $0x58] sm:$0xff] %vm2578_vm1, %v2564_v60  ;;  %v2540_v46 = vadd.f32 %v4436_v35, %v2508_v56  ;;  %v2484_v20 = vmax.f32 %v1857_v30, %v2412_v23  ;;  %v1859_v58 = vpop.f32.mrb[77].mxu0  ;;  %v2414_v21 = vpop.f32.mrb[77].mxu1 }
 0x27c   : > { %v4616_v21 = vmax.f32 %v4374_v42, %v4376_v12 }
 0x27d   : > { %v2565_v33 = vmax.f32 %v2540_v46, 0.0  ;;  %v2509_v9 = vmax.f32 %v4611_v57, %v2484_v20 }
 0x27e   : > { %v1862_v55 = vpop.f32.mrb[78].mxu0  ;;  %v2417_v14 = vpop.f32.mrb[78].mxu1 }
 0x27f   : > { %2591 = vst.msk [vmem:[%s4445_s13 + $0x60] sm:$0xff] %vm2578_vm1, %v2565_v33  ;;  %v2541_v62 = vadd.f32 %v4436_v35, %v2509_v9  ;;  %v2485_v29 = vmax.f32 %v1862_v55, %v2417_v14  ;;  %v1864_v4 = vpop.f32.mrb[79].mxu0  ;;  %v2419_v8 = vpop.f32.mrb[79].mxu1 }
 0x281   : > { %v2566_v10 = vmax.f32 %v2541_v62, 0.0  ;;  %v2510_v40 = vmax.f32 %v4612_v2, %v2485_v29  ;;  %v4617_v29 = vmax.f32 %v4386_v17, %v4388_v27 }
 0x282   : > { %v1867_v39 = vpop.f32.mrb[80].mxu0  ;;  %v2422_v13 = vpop.f32.mrb[80].mxu1 }
 0x283   : > { %2592 = vst.msk [vmem:[%s4445_s13 + $0x68] sm:$0xff] %vm2578_vm1, %v2566_v10  ;;  %v2542_v41 = vadd.f32 %v4436_v35, %v2510_v40  ;;  %v2486_v11 = vmax.f32 %v1867_v39, %v2422_v13  ;;  %v1869_v7 = vpop.f32.mrb[81].mxu0  ;;  %v2424_v26 = vpop.f32.mrb[81].mxu1  ;;  %v4618_v13 = vmax.f32 %v4398_v32, %v4400_v51 }
 0x285   : > { %v2567_v25 = vmax.f32 %v2542_v41, 0.0  ;;  %v2511_v44 = vmax.f32 %v4613_v22, %v2486_v11 }
 0x286   : > { %v1872_v16 = vpop.f32.mrb[82].mxu0  ;;  %v2427_v15 = vpop.f32.mrb[82].mxu1 }
 0x287   : > { %2593 = vst.msk [vmem:[%s4445_s13 + $0x70] sm:$0xff] %vm2578_vm1, %v2567_v25  ;;  %v2543_v43 = vadd.f32 %v4436_v35, %v2511_v44  ;;  %v2487_v45 = vmax.f32 %v1872_v16, %v2427_v15  ;;  %v1874_v24 = vpop.f32.mrb[83].mxu0  ;;  %v2429_v0 = vpop.f32.mrb[83].mxu1  ;;  %v4619_v44 = vmax.f32 %v4408_v19, %v4410_v28 }
 0x289   : > { %v2568_v48 = vmax.f32 %v2543_v43, 0.0  ;;  %v2512_v53 = vmax.f32 %v4614_v49, %v2487_v45 }
 0x28a   : > { %v1877_v34 = vpop.f32.mrb[84].mxu0  ;;  %v2432_v36 = vpop.f32.mrb[84].mxu1 }
 0x28b   : > { %2594 = vst.msk [vmem:[%s4445_s13 + $0x78] sm:$0xff] %vm2578_vm1, %v2568_v48  ;;  %v2544_v61 = vadd.f32 %v4436_v35, %v2512_v53  ;;  %v2488_v5 = vmax.f32 %v1877_v34, %v2432_v36  ;;  %v1879_v63 = vpop.f32.mrb[85].mxu0  ;;  %v2434_v1 = vpop.f32.mrb[85].mxu1  ;;  %v4620_v48 = vmax.f32 %v4414_v3, %v4416_v52 }
 0x28c   : > { %v4621_v63 = vmax.f32 %v4420_v18, %v4422_v47 }
 0x28d   : > { %v2569_v60 = vmax.f32 %v2544_v61, 0.0  ;;  %v2513_v56 = vmax.f32 %v4615_v6, %v2488_v5 }
 0x28e   : > { %v1882_v30 = vpop.f32.mrb[86].mxu0  ;;  %v2437_v23 = vpop.f32.mrb[86].mxu1 }
 0x28f   : > { %2595 = vst.msk [vmem:[%s4445_s13 + $0x80] sm:$0xff] %vm2578_vm1, %v2569_v60  ;;  %v2545_v50 = vadd.f32 %v4436_v35, %v2513_v56  ;;  %v2489_v31 = vmax.f32 %v1882_v30, %v2437_v23  ;;  %v1884_v46 = vpop.f32.mrb[87].mxu0  ;;  %v2439_v20 = vpop.f32.mrb[87].mxu1 }
 0x291   : > { %v2570_v58 = vmax.f32 %v2545_v50, 0.0  ;;  %v2514_v33 = vmax.f32 %v4616_v21, %v2489_v31  ;;  %v4622_v50 = vmax.f32 %v4426_v54, %v4428_v37 }
 0x292   : > { %v1887_v57 = vpop.f32.mrb[88].mxu0  ;;  %v2442_v9 = vpop.f32.mrb[88].mxu1 }
 0x293   : > { %2596 = vst.msk [vmem:[%s4445_s13 + $0x88] sm:$0xff] %vm2578_vm1, %v2570_v58  ;;  %v2546_v59 = vadd.f32 %v4436_v35, %v2514_v33  ;;  %v2490_v38 = vmax.f32 %v1887_v57, %v2442_v9  ;;  %v1889_v55 = vpop.f32.mrb[89].mxu0  ;;  %v2444_v14 = vpop.f32.mrb[89].mxu1 }
 0x295   : > { %v2571_v62 = vmax.f32 %v2546_v59, 0.0  ;;  %v2515_v4 = vmax.f32 %v4617_v29, %v2490_v38 }
 0x296   : > { %v1892_v8 = vpop.f32.mrb[90].mxu0  ;;  %v2447_v10 = vpop.f32.mrb[90].mxu1 }
 0x297   : > { %2597 = vst.msk [vmem:[%s4445_s13 + $0x90] sm:$0xff] %vm2578_vm1, %v2571_v62  ;;  %v2547_v12 = vadd.f32 %v4436_v35, %v2515_v4  ;;  %v2491_v42 = vmax.f32 %v1892_v8, %v2447_v10  ;;  %v1894_v2 = vpop.f32.mrb[91].mxu0  ;;  %v2449_v40 = vpop.f32.mrb[91].mxu1 }
 0x299   : > { %v2572_v39 = vmax.f32 %v2547_v12, 0.0  ;;  %v2516_v41 = vmax.f32 %v4618_v13, %v2491_v42 }
 0x29a   : > { %v1897_v11 = vpop.f32.mrb[92].mxu0  ;;  %v2452_v7 = vpop.f32.mrb[92].mxu1 }
 0x29b   : > { %2598 = vst.msk [vmem:[%s4445_s13 + $0x98] sm:$0xff] %vm2578_vm1, %v2572_v39  ;;  %v2548_v27 = vadd.f32 %v4436_v35, %v2516_v41  ;;  %v2492_v17 = vmax.f32 %v1897_v11, %v2452_v7  ;;  %v1899_v26 = vpop.f32.mrb[93].mxu0  ;;  %v2454_v25 = vpop.f32.mrb[93].mxu1 }
 0x29d   : > { %v2573_v22 = vmax.f32 %v2548_v27, 0.0  ;;  %v2517_v16 = vmax.f32 %v4619_v44, %v2492_v17 }
 0x29e   : > { %v1902_v15 = vpop.f32.mrb[94].mxu0  ;;  %v2457_v43 = vpop.f32.mrb[94].mxu1 }
 0x29f   : > { %2599 = vst.msk [vmem:[%s4445_s13 + $0xa0] sm:$0xff] %vm2578_vm1, %v2573_v22  ;;  %v2549_v51 = vadd.f32 %v4436_v35, %v2517_v16  ;;  %v2493_v32 = vmax.f32 %v1902_v15, %v2457_v43  ;;  %v1904_v45 = vpop.f32.mrb[95].mxu0  ;;  %v2459_v24 = vpop.f32.mrb[95].mxu1 }
 0x2a1   : > { %v2574_v0 = vmax.f32 %v2549_v51, 0.0  ;;  %v2518_v49 = vmax.f32 %v4620_v48, %v2493_v32 }
 0x2a2   : > { %v1907_v53 = vpop.f32.mrb[96].mxu0  ;;  %v2462_v34 = vpop.f32.mrb[96].mxu1 }
 0x2a3   : > { %2600 = vst.msk [vmem:[%s4445_s13 + $0xa8] sm:$0xff] %vm2578_vm1, %v2574_v0  ;;  %v2550_v28 = vadd.f32 %v4436_v35, %v2518_v49  ;;  %v2494_v19 = vmax.f32 %v1907_v53, %v2462_v34  ;;  %v1909_v36 = vpop.f32.mrb[97].mxu0  ;;  %v2464_v61 = vpop.f32.mrb[97].mxu1 }
 0x2a5   : > { %v2575_v5 = vmax.f32 %v2550_v28, 0.0  ;;  %v2519_v1 = vmax.f32 %v4621_v63, %v2494_v19 }
 0x2a6   : > { %v1912_v60 = vpop.f32.mrb[98].mxu0  ;;  %v2467_v6 = vpop.f32.mrb[98].mxu1 }
 0x2a7   : > { %2601 = vst.msk [vmem:[%s4445_s13 + $0xb0] sm:$0xff] %vm2578_vm1, %v2575_v5  ;;  %v2551_v3 = vadd.f32 %v4436_v35, %v2519_v1  ;;  %v2495_v52 = vmax.f32 %v1912_v60, %v2467_v6  ;;  %v1914_v56 = vpop.f32.mrb[99].mxu0  ;;  %v2469_v30 = vpop.f32.mrb[99].mxu1 }
 0x2a9   : > { %v2576_v23 = vmax.f32 %v2551_v3, 0.0  ;;  %v2520_v31 = vmax.f32 %v4622_v50, %v2495_v52 }
 0x2ab   : > { %2602 = vst.msk [vmem:[%s4445_s13 + $0xb8] sm:$0xff] %vm2578_vm1, %v2576_v23  ;;  %v2552_v46 = vadd.f32 %v4436_v35, %v2520_v31 }
 0x2ad   : > { %v2577_v47 = vmax.f32 %v2552_v46, 0.0 }
 0x2af   : > { %2604 = vst.msk [vmem:[%s4445_s13 + $0xc0] sm:$0xf] %vm2603_vm2, %v2577_v47 }
 0x2b0 PF: > { %s13_s12 = sadd.s32 1, %s3311_s12  }
 0x2b1   : > { %p10_p4 = scmp.ge.s32.totalorder %s13_s12, 4  }
 0x2b3   :  { %12 = sbr.rel (!%p10_p4) target bundleno = 1 (0x1), region = 62 }

// kernel: cnn_jammer_forward.3
= control target key start
LH: loop header
LB: loop body
LE: loop exit
PB: predicated region body
PF: predicated region fallthrough
CT: control target
= control target key end

     0   :  { %v2372_v43 = vmov 1983009808   ;;  %v432_v45 = vlaneseq  ;;  %s3673_s0 = inlined_call_operand.vmem [shape: f32[2,3136], index: 0, kind: input, shape index: {}]   ;;  %s3674_s1 = inlined_call_operand.vmem [shape: f32[3136,6], index: 1, kind: input, shape index: {}]   ;;  %s3675_s2 = inlined_call_operand.vmem [shape: f32[1,6], index: 2, kind: input, shape index: {}]   ;;  %s3676_s3 = inlined_call_operand.hbm [shape: f32[2,6], index: 3, kind: output, shape index: {}]  }
   0x1   :  { %v38_v0 = vld [vmem:[%s3674_s1 + $0x80] sm:$0xff]  ;;  %v39_v1 = vld [vmem:[%s3674_s1 + $0x88] sm:$0xff]  ;;  %v40_v11 = vld [vmem:[%s3674_s1 + $0x90] sm:$0xff]  ;;  %v430_v44 = vunpack.c.l.s4 %v2372_v43 }
   0x2   :  { %v22_v2 = vld [vmem:[%s3674_s1] sm:$0xff]  ;;  %v1941_v3 = vpack.c.bf16 %v39_v1, %v38_v0  ;;  %v23_v4 = vld [vmem:[%s3674_s1 + $0x8] sm:$0xff]  ;;  %v41_v13 = vld [vmem:[%s3674_s1 + $0x98] sm:$0xff]  ;;  %v433_v60 = vshrl.u32 %v432_v45, 7 }
   0x3   :  { %v70_v5 = vld [vmem:[%s3674_s1 + $0x180] sm:$0xff]  ;;  %v71_v6 = vld [vmem:[%s3674_s1 + $0x188] sm:$0xff]  ;;  %v1943_v7 = vpack.c.bf16 %v23_v4, %v22_v2  ;;  %v24_v14 = vld [vmem:[%s3674_s1 + $0x10] sm:$0xff]  ;;  %v1945_v16 = vpack.c.bf16 %v41_v13, %v40_v11  ;;  %v431_v59 = vunpack.c.0.s8 %v430_v44 }
   0x4   :  { %v1973_v8 = vpack.c.bf16 %v71_v6, %v70_v5  ;;  %v54_v9 = vld [vmem:[%s3674_s1 + $0x100] sm:$0xff]  ;;  %v55_v10 = vld [vmem:[%s3674_s1 + $0x108] sm:$0xff]  ;;  %1942 = vmatprep.subr.bf16.mxu0 %v1941_v3  ;;  %v25_v15 = vld [vmem:[%s3674_s1 + $0x18] sm:$0xff] }
   0x5   :  { %v1975_v12 = vpack.c.bf16 %v55_v10, %v54_v9  ;;  %1944 = vmatpush3.bf16.msra.mxu0 %v1943_v7  ;;  %v1947_v17 = vpack.c.bf16 %v25_v15, %v24_v14  ;;  %v72_v18 = vld [vmem:[%s3674_s1 + $0x190] sm:$0xff]  ;;  %v73_v19 = vld [vmem:[%s3674_s1 + $0x198] sm:$0xff]  ;;  %v42_v23 = vld [vmem:[%s3674_s1 + $0xa0] sm:$0xff]  ;;  %v2541_v10 = vsub.s32 %v431_v59, %v433_v60 }
   0x6   :  { %1974 = vmatprep.subr.bf16.mxu1 %v1973_v8  ;;  %v56_v20 = vld [vmem:[%s3674_s1 + $0x110] sm:$0xff]  ;;  %v1977_v21 = vpack.c.bf16 %v73_v19, %v72_v18  ;;  %v57_v22 = vld [vmem:[%s3674_s1 + $0x118] sm:$0xff]  ;;  %v43_v24 = vld [vmem:[%s3674_s1 + $0xa8] sm:$0xff]  ;;  %1946 = vmatprep.subr.bf16.mxu0 %v1945_v16 }
   0x7   :  { %1976 = vmatpush3.bf16.msra.mxu1 %v1975_v12  ;;  %v1979_v25 = vpack.c.bf16 %v57_v22, %v56_v20  ;;  %v1949_v26 = vpack.c.bf16 %v43_v24, %v42_v23  ;;  %v26_v27 = vld [vmem:[%s3674_s1 + $0x20] sm:$0xff]  ;;  %v27_v28 = vld [vmem:[%s3674_s1 + $0x28] sm:$0xff]  ;;  %v44_v35 = vld [vmem:[%s3674_s1 + $0xb0] sm:$0xff] }
   0x8   :  { %v74_v29 = vld [vmem:[%s3674_s1 + $0x1a0] sm:$0xff]  ;;  %1978 = vmatprep.subr.bf16.mxu1 %v1977_v21  ;;  %v75_v30 = vld [vmem:[%s3674_s1 + $0x1a8] sm:$0xff]  ;;  %v1951_v33 = vpack.c.bf16 %v27_v28, %v26_v27  ;;  %v45_v36 = vld [vmem:[%s3674_s1 + $0xb8] sm:$0xff] }
   0x9   :  { %v58_v31 = vld [vmem:[%s3674_s1 + $0x120] sm:$0xff]  ;;  %v59_v32 = vld [vmem:[%s3674_s1 + $0x128] sm:$0xff]  ;;  %1948 = vmatpush3.bf16.msra.mxu0 %v1947_v17  ;;  %v1981_v34 = vpack.c.bf16 %v75_v30, %v74_v29  ;;  %v28_v37 = vld [vmem:[%s3674_s1 + $0x30] sm:$0xff]  ;;  %v1953_v39 = vpack.c.bf16 %v45_v36, %v44_v35 }
   0xa   :  { %1950 = vmatprep.subr.bf16.mxu0 %v1949_v26  ;;  %v1983_v38 = vpack.c.bf16 %v59_v32, %v58_v31  ;;  %v29_v40 = vld [vmem:[%s3674_s1 + $0x38] sm:$0xff]  ;;  %v76_v41 = vld [vmem:[%s3674_s1 + $0x1b0] sm:$0xff]  ;;  %v46_v49 = vld [vmem:[%s3674_s1 + $0xc0] sm:$0xff] }
   0xb   :  { %1980 = vmatpush3.bf16.msra.mxu1 %v1979_v25  ;;  %v77_v42 = vld [vmem:[%s3674_s1 + $0x1b8] sm:$0xff]  ;;  %v60_v47 = vld [vmem:[%s3674_s1 + $0x130] sm:$0xff]  ;;  %v47_v50 = vld [vmem:[%s3674_s1 + $0xc8] sm:$0xff]  ;;  %v1955_v51 = vpack.c.bf16 %v29_v40, %v28_v37 }
   0xc   :  { %1982 = vmatprep.subr.bf16.mxu1 %v1981_v34  ;;  %v1985_v46 = vpack.c.bf16 %v77_v42, %v76_v41  ;;  %v61_v48 = vld [vmem:[%s3674_s1 + $0x138] sm:$0xff]  ;;  %v78_v52 = vld [vmem:[%s3674_s1 + $0x1c0] sm:$0xff]  ;;  %v79_v53 = vld [vmem:[%s3674_s1 + $0x1c8] sm:$0xff]  ;;  %v1957_v55 = vpack.c.bf16 %v47_v50, %v46_v49 }
   0xd   :  { %1952 = vmatpush3.bf16.msra.mxu0 %v1951_v33  ;;  %v1987_v54 = vpack.c.bf16 %v61_v48, %v60_v47  ;;  %v30_v56 = vld [vmem:[%s3674_s1 + $0x40] sm:$0xff]  ;;  %v31_v57 = vld [vmem:[%s3674_s1 + $0x48] sm:$0xff]  ;;  %v1989_v61 = vpack.c.bf16 %v79_v53, %v78_v52  ;;  %v48_v63 = vld [vmem:[%s3674_s1 + $0xd0] sm:$0xff] }
   0xe   :  { %1954 = vmatprep.subr.bf16.mxu0 %v1953_v39  ;;  %v62_v58 = vld [vmem:[%s3674_s1 + $0x140] sm:$0xff]  ;;  %v63_v62 = vld [vmem:[%s3674_s1 + $0x148] sm:$0xff]  ;;  %v49_v0 = vld [vmem:[%s3674_s1 + $0xd8] sm:$0xff]  ;;  %v1959_v3 = vpack.c.bf16 %v31_v57, %v30_v56 }
   0xf   :  { %1984 = vmatpush3.bf16.msra.mxu1 %v1983_v38  ;;  %v80_v1 = vld [vmem:[%s3674_s1 + $0x1d0] sm:$0xff]  ;;  %v81_v2 = vld [vmem:[%s3674_s1 + $0x1d8] sm:$0xff]  ;;  %v1991_v5 = vpack.c.bf16 %v63_v62, %v62_v58  ;;  %v1961_v6 = vpack.c.bf16 %v49_v0, %v48_v63  ;;  %v50_v12 = vld [vmem:[%s3674_s1 + $0xe0] sm:$0xff] }
  0x10   :  { %1986 = vmatprep.subr.bf16.mxu1 %v1985_v46  ;;  %v32_v4 = vld [vmem:[%s3674_s1 + $0x50] sm:$0xff]  ;;  %v33_v7 = vld [vmem:[%s3674_s1 + $0x58] sm:$0xff]  ;;  %v1993_v11 = vpack.c.bf16 %v81_v2, %v80_v1  ;;  %v51_v13 = vld [vmem:[%s3674_s1 + $0xe8] sm:$0xff] }
  0x11   :  { %1956 = vmatpush3.bf16.msra.mxu0 %v1955_v51  ;;  %v64_v8 = vld [vmem:[%s3674_s1 + $0x150] sm:$0xff]  ;;  %v65_v9 = vld [vmem:[%s3674_s1 + $0x158] sm:$0xff]  ;;  %v82_v14 = vld [vmem:[%s3674_s1 + $0x1e0] sm:$0xff]  ;;  %v1963_v16 = vpack.c.bf16 %v33_v7, %v32_v4  ;;  %v1965_v19 = vpack.c.bf16 %v51_v13, %v50_v12 }
  0x12   :  { %1958 = vmatprep.subr.bf16.mxu0 %v1957_v55  ;;  %v83_v15 = vld [vmem:[%s3674_s1 + $0x1e8] sm:$0xff]  ;;  %v1995_v17 = vpack.c.bf16 %v65_v9, %v64_v8  ;;  %v15_v18 = vld [vmem:[%s3673_s0] sm:$0xff]  ;;  %v52_v27 = vld [vmem:[%s3674_s1 + $0xf0] sm:$0xff] }
  0x13   :  { %1988 = vmatpush3.bf16.msra.mxu1 %v1987_v54  ;;  %v34_v20 = vld [vmem:[%s3674_s1 + $0x60] sm:$0xff]  ;;  %v35_v21 = vld [vmem:[%s3674_s1 + $0x68] sm:$0xff]  ;;  %v435_v23 = vrot.slane %v15_v18, %v2541_v10  ;;  %v428_v24 = vcombine.high %v15_v18, %v15_v18  ;;  %v1997_v25 = vpack.c.bf16 %v83_v15, %v82_v14  ;;  %v53_v28 = vld [vmem:[%s3674_s1 + $0xf8] sm:$0xff] }
  0x14   :  { %1990 = vmatprep.subr.bf16.mxu1 %v1989_v61  ;;  %v66_v22 = vld [vmem:[%s3674_s1 + $0x160] sm:$0xff]  ;;  %v67_v26 = vld [vmem:[%s3674_s1 + $0x168] sm:$0xff]  ;;  %v84_v29 = vld [vmem:[%s3674_s1 + $0x1f0] sm:$0xff]  ;;  %v1967_v33 = vpack.c.bf16 %v35_v21, %v34_v20  ;;  %v1969_v35 = vpack.c.bf16 %v53_v28, %v52_v27 }
  0x15   :  { %1960 = vmatpush3.bf16.msra.mxu0 %v1959_v3  ;;  %v85_v30 = vld [vmem:[%s3674_s1 + $0x1f8] sm:$0xff]  ;;  %v443_v31 = vcombine.high %v435_v23, %v435_v23  ;;  %v442_v32 = vrot.slane %v428_v24, %v2541_v10  ;;  %v1999_v34 = vpack.c.bf16 %v67_v26, %v66_v22  ;;  %v36_v36 = vld [vmem:[%s3674_s1 + $0x70] sm:$0xff]  ;;  %v102_v42 = vld [vmem:[%s3674_s1 + $0x280] sm:$0xff] }
  0x16   :  { %1962 = vmatprep.subr.bf16.mxu0 %v1961_v6  ;;  %v37_v37 = vld [vmem:[%s3674_s1 + $0x78] sm:$0xff]  ;;  %v68_v38 = vld [vmem:[%s3674_s1 + $0x170] sm:$0xff]  ;;  %v2001_v40 = vpack.c.bf16 %v85_v30, %v84_v29  ;;  %v103_v43 = vld [vmem:[%s3674_s1 + $0x288] sm:$0xff] }
  0x17   :  { %1992 = vmatpush3.bf16.msra.mxu1 %v1991_v5  ;;  %v444_v39 = vcombine.high %v442_v32, %v442_v32  ;;  %628 = vmatprep.mubr.f32.mxu0 %v443_v31  ;;  %v69_v41 = vld [vmem:[%s3674_s1 + $0x178] sm:$0xff]  ;;  %v134_v44 = vld [vmem:[%s3674_s1 + $0x380] sm:$0xff]  ;;  %v135_v45 = vld [vmem:[%s3674_s1 + $0x388] sm:$0xff]  ;;  %v1971_v46 = vpack.c.bf16 %v37_v37, %v36_v36  ;;  %v2005_v48 = vpack.c.bf16 %v103_v43, %v102_v42 }
  0x18   :  { %1994 = vmatprep.subr.bf16.mxu1 %v1993_v11  ;;  %v2003_v47 = vpack.c.bf16 %v69_v41, %v68_v38  ;;  %v86_v49 = vld [vmem:[%s3674_s1 + $0x200] sm:$0xff]  ;;  %v87_v50 = vld [vmem:[%s3674_s1 + $0x208] sm:$0xff]  ;;  %v2037_v52 = vpack.c.bf16 %v135_v45, %v134_v44  ;;  %v104_v54 = vld [vmem:[%s3674_s1 + $0x290] sm:$0xff] }
  0x19   :  { %1964 = vmatpush3.bf16.msra.mxu0 %v1963_v16  ;;  %698 = vmatprep.mubr.f32.mxu1 %v444_v39  ;;  %v118_v51 = vld [vmem:[%s3674_s1 + $0x300] sm:$0xff]  ;;  %v119_v53 = vld [vmem:[%s3674_s1 + $0x308] sm:$0xff]  ;;  %v105_v55 = vld [vmem:[%s3674_s1 + $0x298] sm:$0xff]  ;;  %v2007_v58 = vpack.c.bf16 %v87_v50, %v86_v49 }
  0x1a   :  { %1966 = vmatprep.subr.bf16.mxu0 %v1965_v19  ;;  %v136_v56 = vld [vmem:[%s3674_s1 + $0x390] sm:$0xff]  ;;  %v137_v57 = vld [vmem:[%s3674_s1 + $0x398] sm:$0xff]  ;;  %v2039_v59 = vpack.c.bf16 %v119_v53, %v118_v51  ;;  %v2009_v60 = vpack.c.bf16 %v105_v55, %v104_v54  ;;  %v106_v2 = vld [vmem:[%s3674_s1 + $0x2a0] sm:$0xff] }
  0x1b   :  { %1996 = vmatpush3.bf16.msra.mxu1 %v1995_v17  ;;  %v88_v61 = vld [vmem:[%s3674_s1 + $0x210] sm:$0xff]  ;;  %v89_v62 = vld [vmem:[%s3674_s1 + $0x218] sm:$0xff]  ;;  %v2041_v0 = vpack.c.bf16 %v137_v57, %v136_v56  ;;  %v107_v3 = vld [vmem:[%s3674_s1 + $0x2a8] sm:$0xff] }
  0x1c   :  { %1998 = vmatprep.subr.bf16.mxu1 %v1997_v25  ;;  %v120_v63 = vld [vmem:[%s3674_s1 + $0x310] sm:$0xff]  ;;  %v121_v1 = vld [vmem:[%s3674_s1 + $0x318] sm:$0xff]  ;;  %v138_v4 = vld [vmem:[%s3674_s1 + $0x3a0] sm:$0xff]  ;;  %v2011_v6 = vpack.c.bf16 %v89_v62, %v88_v61  ;;  %v2013_v8 = vpack.c.bf16 %v107_v3, %v106_v2 }
  0x1d   :  { %1968 = vmatpush3.bf16.msra.mxu0 %v1967_v33  ;;  %v139_v5 = vld [vmem:[%s3674_s1 + $0x3a8] sm:$0xff]  ;;  %v2043_v7 = vpack.c.bf16 %v121_v1, %v120_v63  ;;  %v90_v9 = vld [vmem:[%s3674_s1 + $0x220] sm:$0xff]  ;;  %v108_v15 = vld [vmem:[%s3674_s1 + $0x2b0] sm:$0xff] }
  0x1e   :  { %1970 = vmatprep.subr.bf16.mxu0 %v1969_v35  ;;  %v91_v11 = vld [vmem:[%s3674_s1 + $0x228] sm:$0xff]  ;;  %v122_v12 = vld [vmem:[%s3674_s1 + $0x320] sm:$0xff]  ;;  %v2045_v13 = vpack.c.bf16 %v139_v5, %v138_v4  ;;  %v109_v16 = vld [vmem:[%s3674_s1 + $0x2b8] sm:$0xff] }
  0x1f   :  { %2000 = vmatpush3.bf16.msra.mxu1 %v1999_v34  ;;  %v123_v14 = vld [vmem:[%s3674_s1 + $0x328] sm:$0xff]  ;;  %v140_v17 = vld [vmem:[%s3674_s1 + $0x3b0] sm:$0xff]  ;;  %v141_v18 = vld [vmem:[%s3674_s1 + $0x3b8] sm:$0xff]  ;;  %v2015_v19 = vpack.c.bf16 %v91_v11, %v90_v9  ;;  %v2017_v22 = vpack.c.bf16 %v109_v16, %v108_v15 }
  0x20   :  { %2002 = vmatprep.subr.bf16.mxu1 %v2001_v40  ;;  %v92_v20 = vld [vmem:[%s3674_s1 + $0x230] sm:$0xff]  ;;  %v2047_v21 = vpack.c.bf16 %v123_v14, %v122_v12  ;;  %v125_v25 = vld [vmem:[%s3674_s1 + $0x338] sm:$0xff]  ;;  %v2049_v26 = vpack.c.bf16 %v141_v18, %v140_v17  ;;  %v110_v27 = vld [vmem:[%s3674_s1 + $0x2c0] sm:$0xff] }
  0x21   :  { %1972 = vmatpush3.bf16.msra.mxu0 %v1971_v46  ;;  %v124_v24 = vld [vmem:[%s3674_s1 + $0x330] sm:$0xff]  ;;  %v111_v28 = vld [vmem:[%s3674_s1 + $0x2c8] sm:$0xff]  ;;  %v142_v30 = vld [vmem:[%s3674_s1 + $0x3c0] sm:$0xff] }
  0x22   :  { %2006 = vmatprep.subr.bf16.mxu0 %v2005_v48  ;;  %v16_v29 = vld [vmem:[%s3673_s0 + $0x8] sm:$0xff]  ;;  %v2051_v35 = vpack.c.bf16 %v125_v25, %v124_v24  ;;  %v2021_v36 = vpack.c.bf16 %v111_v28, %v110_v27  ;;  %v94_v37 = vld [vmem:[%s3674_s1 + $0x240] sm:$0xff]  ;;  %v112_v44 = vld [vmem:[%s3674_s1 + $0x2d0] sm:$0xff] }
  0x23   :  { %2004 = vmatpush3.bf16.msra.mxu1 %v2003_v47  ;;  %v143_v31 = vld [vmem:[%s3674_s1 + $0x3c8] sm:$0xff]  ;;  %v445_v33 = vcombine.high %v16_v29, %v16_v29  ;;  %v126_v39 = vld [vmem:[%s3674_s1 + $0x340] sm:$0xff]  ;;  %v113_v45 = vld [vmem:[%s3674_s1 + $0x2d8] sm:$0xff] }
  0x24   :  { %2038 = vmatprep.subr.bf16.mxu1 %v2037_v52  ;;  %629 = vmatmul.mubr.f32.vlgmr.msra.gmra.mrb[0].mxu0 %v435_v23  ;;  %v93_v23 = vld [vmem:[%s3674_s1 + $0x238] sm:$0xff]  ;;  %v95_v38 = vld [vmem:[%s3674_s1 + $0x248] sm:$0xff]  ;;  %v2053_v42 = vpack.c.bf16 %v143_v31, %v142_v30  ;;  %v144_v46 = vld [vmem:[%s3674_s1 + $0x3d0] sm:$0xff]  ;;  %v2025_v51 = vpack.c.bf16 %v113_v45, %v112_v44 }
  0x25   :  { %2008 = vmatpush3.bf16.msra.mxu0 %v2007_v58  ;;  %v2019_v34 = vpack.c.bf16 %v93_v23, %v92_v20  ;;  %v2722_v41 = vrot.slane %v445_v33, %v2541_v10  ;;  %v127_v43 = vld [vmem:[%s3674_s1 + $0x348] sm:$0xff]  ;;  %v145_v47 = vld [vmem:[%s3674_s1 + $0x3d8] sm:$0xff]  ;;  %v2023_v49 = vpack.c.bf16 %v95_v38, %v94_v37  ;;  %v96_v52 = vld [vmem:[%s3674_s1 + $0x250] sm:$0xff] }
  0x26   :  { %699 = vmatmul.mubr.f32.vlgmr.msra.gmra.mrb[0].mxu1 %v442_v32  ;;  %2010 = vmatprep.subr.bf16.mxu0 %v2009_v60  ;;  %v2708_v32 = vrot.slane %v16_v29, %v2541_v10  ;;  %v2055_v50 = vpack.c.bf16 %v127_v43, %v126_v39  ;;  %v97_v53 = vld [vmem:[%s3674_s1 + $0x258] sm:$0xff]  ;;  %v128_v54 = vld [vmem:[%s3674_s1 + $0x350] sm:$0xff]  ;;  %v2057_v55 = vpack.c.bf16 %v145_v47, %v144_v46  ;;  %v114_v57 = vld [vmem:[%s3674_s1 + $0x2e0] sm:$0xff] }
  0x27   :  { %2040 = vmatpush3.bf16.msra.mxu1 %v2039_v59  ;;  %v461_v48 = vcombine.high %v2722_v41, %v2722_v41  ;;  %v129_v56 = vld [vmem:[%s3674_s1 + $0x358] sm:$0xff]  ;;  %v115_v58 = vld [vmem:[%s3674_s1 + $0x2e8] sm:$0xff]  ;;  %v146_v59 = vld [vmem:[%s3674_s1 + $0x3e0] sm:$0xff]  ;;  %v2027_v61 = vpack.c.bf16 %v97_v53, %v96_v52 }
  0x28   :  { %2042 = vmatprep.subr.bf16.mxu1 %v2041_v0  ;;  %v460_v40 = vcombine.high %v2708_v32, %v2708_v32  ;;  %v147_v60 = vld [vmem:[%s3674_s1 + $0x3e8] sm:$0xff]  ;;  %v2059_v62 = vpack.c.bf16 %v129_v56, %v128_v54  ;;  %v2029_v63 = vpack.c.bf16 %v115_v58, %v114_v57  ;;  %v98_v0 = vld [vmem:[%s3674_s1 + $0x260] sm:$0xff]  ;;  %v116_v5 = vld [vmem:[%s3674_s1 + $0x2f0] sm:$0xff] }
  0x29   :  { %2012 = vmatpush3.bf16.msra.mxu0 %v2011_v6  ;;  %838 = vmatprep.mubr.f32.mxu1 %v461_v48  ;;  %v99_v1 = vld [vmem:[%s3674_s1 + $0x268] sm:$0xff]  ;;  %v130_v2 = vld [vmem:[%s3674_s1 + $0x360] sm:$0xff]  ;;  %v2061_v3 = vpack.c.bf16 %v147_v60, %v146_v59  ;;  %v117_v6 = vld [vmem:[%s3674_s1 + $0x2f8] sm:$0xff] }
  0x2a   :  { %2014 = vmatprep.subr.bf16.mxu0 %v2013_v8  ;;  %768 = vmatprep.mubr.f32.mxu0 %v460_v40  ;;  %v131_v4 = vld [vmem:[%s3674_s1 + $0x368] sm:$0xff]  ;;  %v149_v8 = vld [vmem:[%s3674_s1 + $0x3f8] sm:$0xff]  ;;  %v2031_v9 = vpack.c.bf16 %v99_v1, %v98_v0  ;;  %v2033_v12 = vpack.c.bf16 %v117_v6, %v116_v5  ;;  %v132_v15 = vld [vmem:[%s3674_s1 + $0x370] sm:$0xff] }
  0x2b   :  { %2044 = vmatpush3.bf16.msra.mxu1 %v2043_v7  ;;  %v148_v7 = vld [vmem:[%s3674_s1 + $0x3f0] sm:$0xff]  ;;  %v2063_v11 = vpack.c.bf16 %v131_v4, %v130_v2  ;;  %v101_v14 = vld [vmem:[%s3674_s1 + $0x278] sm:$0xff]  ;;  %v166_v18 = vld [vmem:[%s3674_s1 + $0x480] sm:$0xff] }
  0x2c   :  { %2046 = vmatprep.subr.bf16.mxu1 %v2045_v13  ;;  %v100_v13 = vld [vmem:[%s3674_s1 + $0x270] sm:$0xff]  ;;  %v2065_v16 = vpack.c.bf16 %v149_v8, %v148_v7  ;;  %v133_v17 = vld [vmem:[%s3674_s1 + $0x378] sm:$0xff]  ;;  %v198_v20 = vld [vmem:[%s3674_s1 + $0x580] sm:$0xff] }
  0x2d   :  { %2016 = vmatpush3.bf16.msra.mxu0 %v2015_v19  ;;  %v167_v19 = vld [vmem:[%s3674_s1 + $0x488] sm:$0xff]  ;;  %v150_v23 = vld [vmem:[%s3674_s1 + $0x400] sm:$0xff]  ;;  %v2067_v24 = vpack.c.bf16 %v133_v17, %v132_v15  ;;  %v168_v30 = vld [vmem:[%s3674_s1 + $0x490] sm:$0xff] }
  0x2e   :  { %2018 = vmatprep.subr.bf16.mxu0 %v2017_v22  ;;  %v2035_v22 = vpack.c.bf16 %v101_v14, %v100_v13  ;;  %v2069_v25 = vpack.c.bf16 %v167_v19, %v166_v18  ;;  %v182_v27 = vld [vmem:[%s3674_s1 + $0x500] sm:$0xff]  ;;  %v183_v28 = vld [vmem:[%s3674_s1 + $0x508] sm:$0xff]  ;;  %v169_v31 = vld [vmem:[%s3674_s1 + $0x498] sm:$0xff] }
  0x2f   :  { %2048 = vmatpush3.bf16.msra.mxu1 %v2047_v21  ;;  %v199_v21 = vld [vmem:[%s3674_s1 + $0x588] sm:$0xff]  ;;  %v200_v33 = vld [vmem:[%s3674_s1 + $0x590] sm:$0xff]  ;;  %v2073_v38 = vpack.c.bf16 %v169_v31, %v168_v30  ;;  %v153_v40 = vld [vmem:[%s3674_s1 + $0x418] sm:$0xff] }
  0x30   :  { %2050 = vmatprep.subr.bf16.mxu1 %v2049_v26  ;;  %v151_v26 = vld [vmem:[%s3674_s1 + $0x408] sm:$0xff]  ;;  %v2101_v29 = vpack.c.bf16 %v199_v21, %v198_v20  ;;  %v17_v37 = vld [vmem:[%s3673_s0 + $0x10] sm:$0xff]  ;;  %v185_v46 = vld [vmem:[%s3674_s1 + $0x518] sm:$0xff] }
  0x31   :  { %2020 = vmatpush3.bf16.msra.mxu0 %v2019_v34  ;;  %v201_v34 = vld [vmem:[%s3674_s1 + $0x598] sm:$0xff]  ;;  %v152_v39 = vld [vmem:[%s3674_s1 + $0x410] sm:$0xff]  ;;  %v2850_v43 = vrot.slane %v17_v37, %v2541_v10  ;;  %v462_v44 = vcombine.high %v17_v37, %v17_v37  ;;  %v170_v47 = vld [vmem:[%s3674_s1 + $0x4a0] sm:$0xff] }
  0x32   :  { %2022 = vmatprep.subr.bf16.mxu0 %v2021_v36  ;;  %v2103_v36 = vpack.c.bf16 %v183_v28, %v182_v27  ;;  %v2105_v45 = vpack.c.bf16 %v201_v34, %v200_v33  ;;  %v171_v48 = vld [vmem:[%s3674_s1 + $0x4a8] sm:$0xff]  ;;  %v2075_v53 = vpack.c.bf16 %v153_v40, %v152_v39  ;;  %v186_v57 = vld [vmem:[%s3674_s1 + $0x520] sm:$0xff]  ;;  %v172_v60 = vld [vmem:[%s3674_s1 + $0x4b0] sm:$0xff] }
  0x33   :  { %2052 = vmatpush3.bf16.msra.mxu1 %v2051_v35  ;;  %v2071_v35 = vpack.c.bf16 %v151_v26, %v150_v23  ;;  %v2871_v52 = vrot.slane %v462_v44, %v2541_v10  ;;  %v2077_v54 = vpack.c.bf16 %v171_v48, %v170_v47  ;;  %v155_v56 = vld [vmem:[%s3674_s1 + $0x428] sm:$0xff]  ;;  %v157_v4 = vld [vmem:[%s3674_s1 + $0x438] sm:$0xff]  ;;  %v188_v5 = vld [vmem:[%s3674_s1 + $0x530] sm:$0xff] }
  0x34   :  { %2054 = vmatprep.subr.bf16.mxu1 %v2053_v42  ;;  %v184_v42 = vld [vmem:[%s3674_s1 + $0x510] sm:$0xff]  ;;  %v187_v59 = vld [vmem:[%s3674_s1 + $0x528] sm:$0xff]  ;;  %v189_v7 = vld [vmem:[%s3674_s1 + $0x538] sm:$0xff] }
  0x35   :  { %2024 = vmatpush3.bf16.msra.mxu0 %v2023_v49  ;;  %v202_v49 = vld [vmem:[%s3674_s1 + $0x5a0] sm:$0xff]  ;;  %v2111_v1 = vpack.c.bf16 %v187_v59, %v186_v57  ;;  %v2115_v14 = vpack.c.bf16 %v189_v7, %v188_v5  ;;  %v159_v17 = vld [vmem:[%s3674_s1 + $0x448] sm:$0xff]  ;;  %v176_v21 = vld [vmem:[%s3674_s1 + $0x4d0] sm:$0xff] }
  0x36   :  { %2026 = vmatprep.subr.bf16.mxu0 %v2025_v51  ;;  %v477_v51 = vcombine.high %v2850_v43, %v2850_v43  ;;  %v174_v8 = vld [vmem:[%s3674_s1 + $0x4c0] sm:$0xff]  ;;  %v191_v20 = vld [vmem:[%s3674_s1 + $0x548] sm:$0xff]  ;;  %v208_v23 = vld [vmem:[%s3674_s1 + $0x5d0] sm:$0xff] }
  0x37   :  { %2056 = vmatpush3.bf16.msra.mxu1 %v2055_v50  ;;  %v203_v50 = vld [vmem:[%s3674_s1 + $0x5a8] sm:$0xff]  ;;  %v190_v18 = vld [vmem:[%s3674_s1 + $0x540] sm:$0xff]  ;;  %v160_v28 = vld [vmem:[%s3674_s1 + $0x450] sm:$0xff] }
  0x38   :  { %2058 = vmatprep.subr.bf16.mxu1 %v2057_v55  ;;  %v154_v55 = vld [vmem:[%s3674_s1 + $0x420] sm:$0xff]  ;;  %v2109_v58 = vpack.c.bf16 %v203_v50, %v202_v49  ;;  %v2119_v26 = vpack.c.bf16 %v191_v20, %v190_v18  ;;  %v192_v30 = vld [vmem:[%s3674_s1 + $0x550] sm:$0xff]  ;;  %v193_v33 = vld [vmem:[%s3674_s1 + $0x558] sm:$0xff] }
  0x39   :  { %2028 = vmatpush3.bf16.msra.mxu0 %v2027_v61  ;;  %v173_v61 = vld [vmem:[%s3674_s1 + $0x4b8] sm:$0xff]  ;;  %v2079_v0 = vpack.c.bf16 %v155_v56, %v154_v55  ;;  %v178_v34 = vld [vmem:[%s3674_s1 + $0x4e0] sm:$0xff]  ;;  %v211_v37 = vld [vmem:[%s3674_s1 + $0x5e8] sm:$0xff]  ;;  %v2123_v39 = vpack.c.bf16 %v193_v33, %v192_v30 }
  0x3a   :  { %2030 = vmatprep.subr.bf16.mxu0 %v2029_v63  ;;  %v205_v63 = vld [vmem:[%s3674_s1 + $0x5b8] sm:$0xff]  ;;  %v2081_v2 = vpack.c.bf16 %v173_v61, %v172_v60  ;;  %v163_v44 = vld [vmem:[%s3674_s1 + $0x468] sm:$0xff]  ;;  %v180_v48 = vld [vmem:[%s3674_s1 + $0x4f0] sm:$0xff] }
  0x3b   :  { %2060 = vmatpush3.bf16.msra.mxu1 %v2059_v62  ;;  %v204_v62 = vld [vmem:[%s3674_s1 + $0x5b0] sm:$0xff]  ;;  %v195_v47 = vld [vmem:[%s3674_s1 + $0x568] sm:$0xff]  ;;  %v181_v49 = vld [vmem:[%s3674_s1 + $0x4f8] sm:$0xff] }
  0x3c   :  { %2062 = vmatprep.subr.bf16.mxu1 %v2061_v3  ;;  %v156_v3 = vld [vmem:[%s3674_s1 + $0x430] sm:$0xff]  ;;  %v2113_v6 = vpack.c.bf16 %v205_v63, %v204_v62  ;;  %v2097_v55 = vpack.c.bf16 %v181_v49, %v180_v48  ;;  %v165_v57 = vld [vmem:[%s3674_s1 + $0x478] sm:$0xff]  ;;  %v230_v60 = vld [vmem:[%s3674_s1 + $0x680] sm:$0xff] }
  0x3d   :  { %2032 = vmatpush3.bf16.msra.mxu0 %v2031_v9  ;;  %v175_v9 = vld [vmem:[%s3674_s1 + $0x4c8] sm:$0xff]  ;;  %v2083_v13 = vpack.c.bf16 %v157_v4, %v156_v3  ;;  %v212_v50 = vld [vmem:[%s3674_s1 + $0x5f0] sm:$0xff]  ;;  %v197_v59 = vld [vmem:[%s3674_s1 + $0x578] sm:$0xff] }
  0x3e   :  { %2034 = vmatprep.subr.bf16.mxu0 %v2033_v12  ;;  %v207_v12 = vld [vmem:[%s3674_s1 + $0x5c8] sm:$0xff]  ;;  %v2085_v15 = vpack.c.bf16 %v175_v9, %v174_v8  ;;  %v164_v56 = vld [vmem:[%s3674_s1 + $0x470] sm:$0xff]  ;;  %v262_v62 = vld [vmem:[%s3674_s1 + $0x780] sm:$0xff] }
  0x3f   :  { %2064 = vmatpush3.bf16.msra.mxu1 %v2063_v11  ;;  %v206_v11 = vld [vmem:[%s3674_s1 + $0x5c0] sm:$0xff]  ;;  %v231_v61 = vld [vmem:[%s3674_s1 + $0x688] sm:$0xff]  ;;  %v232_v9 = vld [vmem:[%s3674_s1 + $0x690] sm:$0xff] }
  0x40   :  { %2066 = vmatprep.subr.bf16.mxu1 %v2065_v16  ;;  %v158_v16 = vld [vmem:[%s3674_s1 + $0x440] sm:$0xff]  ;;  %v2117_v19 = vpack.c.bf16 %v207_v12, %v206_v11  ;;  %v263_v63 = vld [vmem:[%s3674_s1 + $0x788] sm:$0xff]  ;;  %v2133_v3 = vpack.c.bf16 %v231_v61, %v230_v60  ;;  %v233_v11 = vld [vmem:[%s3674_s1 + $0x698] sm:$0xff] }
  0x41   :  { %2036 = vmatpush3.bf16.msra.mxu0 %v2035_v22  ;;  %v177_v22 = vld [vmem:[%s3674_s1 + $0x4d8] sm:$0xff]  ;;  %v214_v4 = vld [vmem:[%s3674_s1 + $0x600] sm:$0xff]  ;;  %v215_v5 = vld [vmem:[%s3674_s1 + $0x608] sm:$0xff]  ;;  %v2165_v7 = vpack.c.bf16 %v263_v63, %v262_v62  ;;  %v2137_v18 = vpack.c.bf16 %v233_v11, %v232_v9 }
  0x42   :  { %2070 = vmatprep.subr.bf16.mxu0 %v2069_v25  ;;  %v2087_v25 = vpack.c.bf16 %v159_v17, %v158_v16  ;;  %v2089_v27 = vpack.c.bf16 %v177_v22, %v176_v21  ;;  %v247_v8 = vld [vmem:[%s3674_s1 + $0x708] sm:$0xff]  ;;  %v2135_v16 = vpack.c.bf16 %v215_v5, %v214_v4  ;;  %v217_v20 = vld [vmem:[%s3674_s1 + $0x618] sm:$0xff]  ;;  %v248_v21 = vld [vmem:[%s3674_s1 + $0x710] sm:$0xff] }
  0x43   :  { %2068 = vmatpush3.bf16.msra.mxu1 %v2067_v24  ;;  %v209_v24 = vld [vmem:[%s3674_s1 + $0x5d8] sm:$0xff]  ;;  %v252_v48 = vld [vmem:[%s3674_s1 + $0x730] sm:$0xff]  ;;  %v255_v61 = vld [vmem:[%s3674_s1 + $0x748] sm:$0xff] }
  0x44   :  { %2102 = vmatprep.subr.bf16.mxu1 %v2101_v29  ;;  %769 = vmatmul.mubr.f32.vlgmr.msra.gmra.mrb[2].mxu0 %v2708_v32  ;;  %v2107_v32 = vpack.c.bf16 %v185_v46, %v184_v42  ;;  %v161_v29 = vld [vmem:[%s3674_s1 + $0x458] sm:$0xff]  ;;  %v2121_v31 = vpack.c.bf16 %v209_v24, %v208_v23  ;;  %v162_v42 = vld [vmem:[%s3674_s1 + $0x460] sm:$0xff]  ;;  %v240_v62 = vld [vmem:[%s3674_s1 + $0x6d0] sm:$0xff] }
  0x45   :  { %2072 = vmatpush3.bf16.msra.mxu0 %v2071_v35  ;;  %908 = vmatprep.mubr.f32.mxu0 %v477_v51  ;;  %v179_v35 = vld [vmem:[%s3674_s1 + $0x4e8] sm:$0xff]  ;;  %v213_v51 = vld [vmem:[%s3674_s1 + $0x5f8] sm:$0xff]  ;;  %v234_v24 = vld [vmem:[%s3674_s1 + $0x6a0] sm:$0xff] }
  0x46   :  { %839 = vmatmul.mubr.f32.vlgmr.msra.gmra.mrb[2].mxu1 %v2722_v41  ;;  %2074 = vmatprep.subr.bf16.mxu0 %v2073_v38  ;;  %v478_v41 = vcombine.high %v2871_v52, %v2871_v52  ;;  %v2091_v38 = vpack.c.bf16 %v161_v29, %v160_v28  ;;  %v2093_v40 = vpack.c.bf16 %v179_v35, %v178_v34  ;;  %v249_v23 = vld [vmem:[%s3674_s1 + $0x718] sm:$0xff]  ;;  %v267_v28 = vld [vmem:[%s3674_s1 + $0x7a8] sm:$0xff]  ;;  %v250_v35 = vld [vmem:[%s3674_s1 + $0x720] sm:$0xff] }
  0x47   :  { %2104 = vmatpush3.bf16.msra.mxu1 %v2103_v36  ;;  %v210_v36 = vld [vmem:[%s3674_s1 + $0x5e0] sm:$0xff]  ;;  %v219_v34 = vld [vmem:[%s3674_s1 + $0x628] sm:$0xff]  ;;  %v241_v63 = vld [vmem:[%s3674_s1 + $0x6d8] sm:$0xff] }
  0x48   :  { %2106 = vmatprep.subr.bf16.mxu1 %v2105_v45  ;;  %978 = vmatprep.mubr.f32.mxu1 %v478_v41  ;;  %v194_v45 = vld [vmem:[%s3674_s1 + $0x560] sm:$0xff]  ;;  %v2125_v46 = vpack.c.bf16 %v211_v37, %v210_v36  ;;  %v196_v41 = vld [vmem:[%s3674_s1 + $0x570] sm:$0xff]  ;;  %v2153_v4 = vpack.c.bf16 %v241_v63, %v240_v62  ;;  %v257_v9 = vld [vmem:[%s3674_s1 + $0x758] sm:$0xff] }
  0x49   :  { %2076 = vmatpush3.bf16.msra.mxu0 %v2075_v53  ;;  %v2095_v53 = vpack.c.bf16 %v163_v44, %v162_v42  ;;  %v236_v37 = vld [vmem:[%s3674_s1 + $0x6b0] sm:$0xff]  ;;  %v242_v11 = vld [vmem:[%s3674_s1 + $0x6e0] sm:$0xff] }
  0x4a   :  { %2078 = vmatprep.subr.bf16.mxu0 %v2077_v54  ;;  %v2127_v54 = vpack.c.bf16 %v195_v47, %v194_v45  ;;  %v221_v47 = vld [vmem:[%s3674_s1 + $0x638] sm:$0xff]  ;;  %v224_v5 = vld [vmem:[%s3674_s1 + $0x650] sm:$0xff] }
  0x4b   :  { %2108 = vmatpush3.bf16.msra.mxu1 %v2107_v32  ;;  %v18_v32 = vld [vmem:[%s3673_s0 + $0x18] sm:$0xff]  ;;  %v312_v62 = vld [vmem:[%s3674_s1 + $0x910] sm:$0xff] }
  0x4c   :  { %2110 = vmatprep.subr.bf16.mxu1 %v2109_v58  ;;  %v2129_v58 = vpack.c.bf16 %v213_v51, %v212_v50  ;;  %v3042_v12 = vrot.slane %v18_v32, %v2541_v10  ;;  %v253_v50 = vld [vmem:[%s3674_s1 + $0x738] sm:$0xff]  ;;  %v238_v51 = vld [vmem:[%s3674_s1 + $0x6c0] sm:$0xff] }
  0x4d   :  { %2080 = vmatpush3.bf16.msra.mxu0 %v2079_v0  ;;  %v479_v0 = vcombine.high %v18_v32, %v18_v32  ;;  %v270_v32 = vld [vmem:[%s3674_s1 + $0x7c0] sm:$0xff] }
  0x4e   :  { %2082 = vmatprep.subr.bf16.mxu0 %v2081_v2  ;;  %v2131_v2 = vpack.c.bf16 %v197_v59, %v196_v41  ;;  %v222_v41 = vld [vmem:[%s3674_s1 + $0x640] sm:$0xff] }
  0x4f   :  { %2112 = vmatpush3.bf16.msra.mxu1 %v2111_v1  ;;  %v2099_v1 = vpack.c.bf16 %v165_v57, %v164_v56  ;;  %v2179_v56 = vpack.c.bf16 %v253_v50, %v252_v48  ;;  %v254_v59 = vld [vmem:[%s3674_s1 + $0x740] sm:$0xff]  ;;  %v279_v48 = vld [vmem:[%s3674_s1 + $0x808] sm:$0xff] }
  0x50   :  { %2114 = vmatprep.subr.bf16.mxu1 %v2113_v6  ;;  %v246_v6 = vld [vmem:[%s3674_s1 + $0x700] sm:$0xff] }
  0x51   :  { %2084 = vmatpush3.bf16.msra.mxu0 %v2083_v13  ;;  %v264_v13 = vld [vmem:[%s3674_s1 + $0x790] sm:$0xff]  ;;  %v2167_v17 = vpack.c.bf16 %v247_v8, %v246_v6  ;;  %v225_v6 = vld [vmem:[%s3674_s1 + $0x658] sm:$0xff] }
  0x52   :  { %2086 = vmatprep.subr.bf16.mxu0 %v2085_v15  ;;  %v3051_v15 = vrot.slane %v479_v0, %v2541_v10  ;;  %v272_v0 = vld [vmem:[%s3674_s1 + $0x7d0] sm:$0xff] }
  0x53   :  { %2116 = vmatpush3.bf16.msra.mxu1 %v2115_v14  ;;  %v265_v14 = vld [vmem:[%s3674_s1 + $0x798] sm:$0xff] }
  0x54   :  { %2118 = vmatprep.subr.bf16.mxu1 %v2117_v19  ;;  %v216_v19 = vld [vmem:[%s3674_s1 + $0x610] sm:$0xff]  ;;  %v2169_v22 = vpack.c.bf16 %v265_v14, %v264_v13  ;;  %v495_v29 = vcombine.high %v3051_v15, %v3051_v15  ;;  %v243_v13 = vld [vmem:[%s3674_s1 + $0x6e8] sm:$0xff]  ;;  %v274_v14 = vld [vmem:[%s3674_s1 + $0x7e0] sm:$0xff] }
  0x55   :  { %2088 = vmatpush3.bf16.msra.mxu0 %v2087_v25  ;;  %v235_v25 = vld [vmem:[%s3674_s1 + $0x6a8] sm:$0xff]  ;;  %v2139_v30 = vpack.c.bf16 %v217_v20, %v216_v19  ;;  %v2157_v19 = vpack.c.bf16 %v243_v13, %v242_v11  ;;  %v226_v20 = vld [vmem:[%s3674_s1 + $0x660] sm:$0xff] }
  0x56   :  { %2090 = vmatprep.subr.bf16.mxu0 %v2089_v27  ;;  %v266_v27 = vld [vmem:[%s3674_s1 + $0x7a0] sm:$0xff]  ;;  %v2141_v33 = vpack.c.bf16 %v235_v25, %v234_v24  ;;  %v259_v24 = vld [vmem:[%s3674_s1 + $0x768] sm:$0xff]  ;;  %v244_v25 = vld [vmem:[%s3674_s1 + $0x6f0] sm:$0xff] }
  0x57   :  { %2120 = vmatpush3.bf16.msra.mxu1 %v2119_v26  ;;  %v494_v26 = vcombine.high %v3042_v12, %v3042_v12  ;;  %v2173_v36 = vpack.c.bf16 %v267_v28, %v266_v27  ;;  %v276_v27 = vld [vmem:[%s3674_s1 + $0x7f0] sm:$0xff]  ;;  %v277_v28 = vld [vmem:[%s3674_s1 + $0x7f8] sm:$0xff]  ;;  %v283_v11 = vld [vmem:[%s3674_s1 + $0x828] sm:$0xff] }
  0x58   :  { %2122 = vmatprep.subr.bf16.mxu1 %v2121_v31  ;;  %v2171_v31 = vpack.c.bf16 %v249_v23, %v248_v21  ;;  %v227_v21 = vld [vmem:[%s3674_s1 + $0x668] sm:$0xff]  ;;  %v314_v13 = vld [vmem:[%s3674_s1 + $0x920] sm:$0xff] }
  0x59   :  { %2092 = vmatpush3.bf16.msra.mxu0 %v2091_v38  ;;  %v237_v38 = vld [vmem:[%s3674_s1 + $0x6b8] sm:$0xff] }
  0x5a   :  { %2094 = vmatprep.subr.bf16.mxu0 %v2093_v40  ;;  %v269_v40 = vld [vmem:[%s3674_s1 + $0x7b8] sm:$0xff]  ;;  %v2145_v45 = vpack.c.bf16 %v237_v38, %v236_v37  ;;  %v294_v37 = vld [vmem:[%s3674_s1 + $0x880] sm:$0xff]  ;;  %v295_v38 = vld [vmem:[%s3674_s1 + $0x888] sm:$0xff] }
  0x5b   :  { %2124 = vmatpush3.bf16.msra.mxu1 %v2123_v39  ;;  %v268_v39 = vld [vmem:[%s3674_s1 + $0x7b0] sm:$0xff] }
  0x5c   :  { %2126 = vmatprep.subr.bf16.mxu1 %v2125_v46  ;;  %v220_v46 = vld [vmem:[%s3674_s1 + $0x630] sm:$0xff]  ;;  %v2177_v49 = vpack.c.bf16 %v269_v40, %v268_v39  ;;  %v326_v39 = vld [vmem:[%s3674_s1 + $0x980] sm:$0xff]  ;;  %v327_v40 = vld [vmem:[%s3674_s1 + $0x988] sm:$0xff] }
  0x5d   :  { %2096 = vmatpush3.bf16.msra.mxu0 %v2095_v53  ;;  %v239_v53 = vld [vmem:[%s3674_s1 + $0x6c8] sm:$0xff]  ;;  %v2229_v50 = vpack.c.bf16 %v327_v40, %v326_v39 }
  0x5e   :  { %2098 = vmatprep.subr.bf16.mxu0 %v2097_v55  ;;  %v2147_v55 = vpack.c.bf16 %v221_v47, %v220_v46  ;;  %v2149_v57 = vpack.c.bf16 %v239_v53, %v238_v51  ;;  %v2197_v46 = vpack.c.bf16 %v295_v38, %v294_v37  ;;  %v278_v47 = vld [vmem:[%s3674_s1 + $0x800] sm:$0xff]  ;;  %v311_v51 = vld [vmem:[%s3674_s1 + $0x908] sm:$0xff]  ;;  %v296_v53 = vld [vmem:[%s3674_s1 + $0x890] sm:$0xff] }
  0x5f   :  { %2128 = vmatpush3.bf16.msra.mxu1 %v2127_v54  ;;  %v271_v54 = vld [vmem:[%s3674_s1 + $0x7c8] sm:$0xff] }
  0x60   :  { %2130 = vmatprep.subr.bf16.mxu1 %v2129_v58  ;;  %v223_v58 = vld [vmem:[%s3674_s1 + $0x648] sm:$0xff]  ;;  %v2181_v60 = vpack.c.bf16 %v271_v54, %v270_v32  ;;  %v297_v32 = vld [vmem:[%s3674_s1 + $0x898] sm:$0xff] }
  0x61   :  { %2100 = vmatpush3.bf16.msra.mxu0 %v2099_v1  ;;  %v273_v1 = vld [vmem:[%s3674_s1 + $0x7d8] sm:$0xff] }
  0x62   :  { %2134 = vmatprep.subr.bf16.mxu0 %v2133_v3  ;;  %v2183_v3 = vpack.c.bf16 %v255_v61, %v254_v59  ;;  %v2185_v8 = vpack.c.bf16 %v273_v1, %v272_v0  ;;  %v2201_v59 = vpack.c.bf16 %v297_v32, %v296_v53  ;;  %v281_v61 = vld [vmem:[%s3674_s1 + $0x818] sm:$0xff]  ;;  %v298_v1 = vld [vmem:[%s3674_s1 + $0x8a0] sm:$0xff] }
  0x63   :  { %2132 = vmatpush3.bf16.msra.mxu1 %v2131_v2  ;;  %v2151_v2 = vpack.c.bf16 %v223_v58, %v222_v41  ;;  %v2199_v41 = vpack.c.bf16 %v279_v48, %v278_v47  ;;  %v313_v0 = vld [vmem:[%s3674_s1 + $0x918] sm:$0xff] }
  0x64   :  { %2166 = vmatprep.subr.bf16.mxu1 %v2165_v7  ;;  %909 = vmatmul.mubr.f32.vlgmr.msra.gmra.mrb[4].mxu0 %v2850_v43  ;;  %v218_v43 = vld [vmem:[%s3674_s1 + $0x620] sm:$0xff]  ;;  %v256_v7 = vld [vmem:[%s3674_s1 + $0x750] sm:$0xff] }
  0x65   :  { %2136 = vmatpush3.bf16.msra.mxu0 %v2135_v16  ;;  %1048 = vmatprep.mubr.f32.mxu0 %v494_v26  ;;  %v2143_v42 = vpack.c.bf16 %v219_v34, %v218_v43  ;;  %v275_v16 = vld [vmem:[%s3674_s1 + $0x7e8] sm:$0xff]  ;;  %v245_v26 = vld [vmem:[%s3674_s1 + $0x6f8] sm:$0xff]  ;;  %v228_v43 = vld [vmem:[%s3674_s1 + $0x670] sm:$0xff] }
  0x66   :  { %979 = vmatmul.mubr.f32.vlgmr.msra.gmra.mrb[4].mxu1 %v2871_v52  ;;  %2138 = vmatprep.subr.bf16.mxu0 %v2137_v18  ;;  %v251_v52 = vld [vmem:[%s3674_s1 + $0x728] sm:$0xff]  ;;  %v2187_v18 = vpack.c.bf16 %v257_v9, %v256_v7  ;;  %v2189_v23 = vpack.c.bf16 %v275_v16, %v274_v14  ;;  %v229_v34 = vld [vmem:[%s3674_s1 + $0x678] sm:$0xff] }
  0x67   :  { %2168 = vmatpush3.bf16.msra.mxu1 %v2167_v17  ;;  %1118 = vmatprep.mubr.f32.mxu1 %v495_v29  ;;  %v2175_v44 = vpack.c.bf16 %v251_v52, %v250_v35  ;;  %v2155_v17 = vpack.c.bf16 %v225_v6, %v224_v5  ;;  %v2159_v29 = vpack.c.bf16 %v227_v21, %v226_v20  ;;  %v260_v35 = vld [vmem:[%s3674_s1 + $0x770] sm:$0xff]  ;;  %v261_v52 = vld [vmem:[%s3674_s1 + $0x778] sm:$0xff]  ;;  %v331_v5 = vld [vmem:[%s3674_s1 + $0x9a8] sm:$0xff] }
  0x68   :  { %2170 = vmatprep.subr.bf16.mxu1 %v2169_v22  ;;  %v258_v22 = vld [vmem:[%s3674_s1 + $0x760] sm:$0xff] }
  0x69   :  { %2140 = vmatpush3.bf16.msra.mxu0 %v2139_v30  ;;  %v19_v30 = vld [vmem:[%s3673_s0 + $0x20] sm:$0xff] }
  0x6a   :  { %2142 = vmatprep.subr.bf16.mxu0 %v2141_v33  ;;  %v2161_v33 = vpack.c.bf16 %v245_v26, %v244_v25  ;;  %v3249_v54 = vrot.slane %v19_v30, %v2541_v10 }
  0x6b   :  { %2172 = vmatpush3.bf16.msra.mxu1 %v2171_v31  ;;  %v2191_v31 = vpack.c.bf16 %v259_v24, %v258_v22 }
  0x6c   :  { %2174 = vmatprep.subr.bf16.mxu1 %v2173_v36  ;;  %v2193_v36 = vpack.c.bf16 %v277_v28, %v276_v27 }
  0x6d   :  { %2144 = vmatpush3.bf16.msra.mxu0 %v2143_v42  ;;  %v496_v42 = vcombine.high %v19_v30, %v19_v30 }
  0x6e   :  { %2146 = vmatprep.subr.bf16.mxu0 %v2145_v45  ;;  %v2195_v45 = vpack.c.bf16 %v261_v52, %v260_v35 }
  0x6f   :  { %2176 = vmatpush3.bf16.msra.mxu1 %v2175_v44  ;;  %v2163_v44 = vpack.c.bf16 %v229_v34, %v228_v43 }
  0x70   :  { %2178 = vmatprep.subr.bf16.mxu1 %v2177_v49  ;;  %v310_v49 = vld [vmem:[%s3674_s1 + $0x900] sm:$0xff] }
  0x71   :  { %2148 = vmatpush3.bf16.msra.mxu0 %v2147_v55  ;;  %v328_v55 = vld [vmem:[%s3674_s1 + $0x990] sm:$0xff]  ;;  %v2231_v58 = vpack.c.bf16 %v311_v51, %v310_v49 }
  0x72   :  { %2150 = vmatprep.subr.bf16.mxu0 %v2149_v57  ;;  %v3258_v57 = vrot.slane %v496_v42, %v2541_v10 }
  0x73   :  { %2180 = vmatpush3.bf16.msra.mxu1 %v2179_v56  ;;  %v329_v56 = vld [vmem:[%s3674_s1 + $0x998] sm:$0xff] }
  0x74   :  { %2182 = vmatprep.subr.bf16.mxu1 %v2181_v60  ;;  %v280_v60 = vld [vmem:[%s3674_s1 + $0x810] sm:$0xff]  ;;  %v2233_v63 = vpack.c.bf16 %v329_v56, %v328_v55  ;;  %v512_v6 = vcombine.high %v3258_v57, %v3258_v57 }
  0x75   :  { %2152 = vmatpush3.bf16.msra.mxu0 %v2151_v2  ;;  %v299_v2 = vld [vmem:[%s3674_s1 + $0x8a8] sm:$0xff]  ;;  %v2203_v7 = vpack.c.bf16 %v281_v61, %v280_v60 }
  0x76   :  { %2154 = vmatprep.subr.bf16.mxu0 %v2153_v4  ;;  %v330_v4 = vld [vmem:[%s3674_s1 + $0x9a0] sm:$0xff]  ;;  %v2205_v9 = vpack.c.bf16 %v299_v2, %v298_v1 }
  0x77   :  { %2184 = vmatpush3.bf16.msra.mxu1 %v2183_v3  ;;  %v511_v3 = vcombine.high %v3249_v54, %v3249_v54 }
  0x78   :  { %2186 = vmatprep.subr.bf16.mxu1 %v2185_v8  ;;  %v282_v8 = vld [vmem:[%s3674_s1 + $0x820] sm:$0xff] }
  0x79   :  { %2156 = vmatpush3.bf16.msra.mxu0 %v2155_v17 }
  0x7a   :  { %2158 = vmatprep.subr.bf16.mxu0 %v2157_v19 }
  0x7b   :  { %2188 = vmatpush3.bf16.msra.mxu1 %v2187_v18 }
  0x7c   :  { %2190 = vmatprep.subr.bf16.mxu1 %v2189_v23 }
  0x7d   :  { %2160 = vmatpush3.bf16.msra.mxu0 %v2159_v29 }
  0x7e   :  { %2162 = vmatprep.subr.bf16.mxu0 %v2161_v33 }
  0x7f   :  { %2192 = vmatpush3.bf16.msra.mxu1 %v2191_v31 }
  0x80   :  { %2194 = vmatprep.subr.bf16.mxu1 %v2193_v36 }
  0x81   :  { %2164 = vmatpush3.bf16.msra.mxu0 %v2163_v44 }
  0x82   :  { %2198 = vmatprep.subr.bf16.mxu0 %v2197_v46 }
  0x83   :  { %2196 = vmatpush3.bf16.msra.mxu1 %v2195_v45 }
  0x84   :  { %2230 = vmatprep.subr.bf16.mxu1 %v2229_v50  ;;  %1049 = vmatmul.mubr.f32.vlgmr.msra.gmra.mrb[6].mxu0 %v3042_v12  ;;  %v2235_v12 = vpack.c.bf16 %v313_v0, %v312_v62 }
  0x85   :  { %2200 = vmatpush3.bf16.msra.mxu0 %v2199_v41 }
  0x86   :  { %1119 = vmatmul.mubr.f32.vlgmr.msra.gmra.mrb[6].mxu1 %v3051_v15  ;;  %2202 = vmatprep.subr.bf16.mxu0 %v2201_v59 }
  0x87   :  { %2232 = vmatpush3.bf16.msra.mxu1 %v2231_v58 }
  0x88   :  { %8 = vsyncpa [#allocation3], 0  ;;  %2234 = vmatprep.subr.bf16.mxu1 %v2233_v63  ;;  %v2237_v15 = vpack.c.bf16 %v331_v5, %v330_v4  ;;  %v315_v14 = vld [vmem:[%s3674_s1 + $0x928] sm:$0xff]  ;;  %v300_v16 = vld [vmem:[%s3674_s1 + $0x8b0] sm:$0xff]  ;;  %1188 = vmatprep.mubr.f32.mxu0 %v511_v3  ;;  %v2207_v20 = vpack.c.bf16 %v283_v11, %v282_v8  ;;  %vm2374_vm0 = vmmov 0   ;;  %vm561_vm1 = vcmask 523264  }
  0x89   :  { %v301_v17 = vld [vmem:[%s3674_s1 + $0x8b8] sm:$0xff]  ;;  %v332_v18 = vld [vmem:[%s3674_s1 + $0x9b0] sm:$0xff]  ;;  %1258 = vmatprep.mubr.f32.mxu1 %v512_v6  ;;  %2204 = vmatpush3.bf16.msra.mxu0 %v2203_v7  ;;  %v2239_v21 = vpack.c.bf16 %v315_v14, %v314_v13  ;;  %v302_v28 = vld [vmem:[%s3674_s1 + $0x8c0] sm:$0xff]  ;;  %vm1474_vm2 = vcmask 41984  }
  0x8a   :  { %v333_v19 = vld [vmem:[%s3674_s1 + $0x9b8] sm:$0xff]  ;;  %2206 = vmatprep.subr.bf16.mxu0 %v2205_v9  ;;  %v2209_v22 = vpack.c.bf16 %v301_v17, %v300_v16  ;;  %v284_v23 = vld [vmem:[%s3674_s1 + $0x830] sm:$0xff]  ;;  %v303_v29 = vld [vmem:[%s3674_s1 + $0x8c8] sm:$0xff] }
  0x8b   :  { %2236 = vmatpush3.bf16.msra.mxu1 %v2235_v12  ;;  %v285_v24 = vld [vmem:[%s3674_s1 + $0x838] sm:$0xff]  ;;  %v316_v25 = vld [vmem:[%s3674_s1 + $0x930] sm:$0xff]  ;;  %v2241_v26 = vpack.c.bf16 %v333_v19, %v332_v18  ;;  %v334_v30 = vld [vmem:[%s3674_s1 + $0x9c0] sm:$0xff]  ;;  %v2213_v34 = vpack.c.bf16 %v303_v29, %v302_v28 }
  0x8c   :  { %2238 = vmatprep.subr.bf16.mxu1 %v2237_v15  ;;  %v317_v27 = vld [vmem:[%s3674_s1 + $0x938] sm:$0xff]  ;;  %v335_v31 = vld [vmem:[%s3674_s1 + $0x9c8] sm:$0xff]  ;;  %v2211_v33 = vpack.c.bf16 %v285_v24, %v284_v23  ;;  %v286_v35 = vld [vmem:[%s3674_s1 + $0x840] sm:$0xff] }
  0x8d   :  { %2208 = vmatpush3.bf16.msra.mxu0 %v2207_v20  ;;  %v2243_v43 = vpack.c.bf16 %v317_v27, %v316_v25  ;;  %v287_v36 = vld [vmem:[%s3674_s1 + $0x848] sm:$0xff]  ;;  %v318_v52 = vld [vmem:[%s3674_s1 + $0x940] sm:$0xff]  ;;  %v2245_v37 = vpack.c.bf16 %v335_v31, %v334_v30  ;;  %v304_v39 = vld [vmem:[%s3674_s1 + $0x8d0] sm:$0xff] }
  0x8e   :  { %2210 = vmatprep.subr.bf16.mxu0 %v2209_v22  ;;  %v319_v38 = vld [vmem:[%s3674_s1 + $0x948] sm:$0xff]  ;;  %v305_v40 = vld [vmem:[%s3674_s1 + $0x8d8] sm:$0xff]  ;;  %v336_v42 = vld [vmem:[%s3674_s1 + $0x9d0] sm:$0xff]  ;;  %v2215_v45 = vpack.c.bf16 %v287_v36, %v286_v35 }
  0x8f   :  { %2240 = vmatpush3.bf16.msra.mxu1 %v2239_v21  ;;  %v337_v44 = vld [vmem:[%s3674_s1 + $0x9d8] sm:$0xff]  ;;  %v2247_v46 = vpack.c.bf16 %v319_v38, %v318_v52  ;;  %v2217_v47 = vpack.c.bf16 %v305_v40, %v304_v39  ;;  %v288_v48 = vld [vmem:[%s3674_s1 + $0x850] sm:$0xff]  ;;  %v306_v32 = vld [vmem:[%s3674_s1 + $0x8e0] sm:$0xff] }
  0x90   :  { %2242 = vmatprep.subr.bf16.mxu1 %v2241_v26  ;;  %v289_v49 = vld [vmem:[%s3674_s1 + $0x858] sm:$0xff]  ;;  %v320_v50 = vld [vmem:[%s3674_s1 + $0x950] sm:$0xff]  ;;  %v2249_v51 = vpack.c.bf16 %v337_v44, %v336_v42  ;;  %v307_v55 = vld [vmem:[%s3674_s1 + $0x8e8] sm:$0xff] }
  0x91   :  { %2212 = vmatpush3.bf16.msra.mxu0 %v2211_v33  ;;  %v321_v53 = vld [vmem:[%s3674_s1 + $0x958] sm:$0xff]  ;;  %v338_v56 = vld [vmem:[%s3674_s1 + $0x9e0] sm:$0xff]  ;;  %v339_v41 = vld [vmem:[%s3674_s1 + $0x9e8] sm:$0xff]  ;;  %v2219_v58 = vpack.c.bf16 %v289_v49, %v288_v48  ;;  %v2221_v60 = vpack.c.bf16 %v307_v55, %v306_v32 }
  0x92   :  { %2214 = vmatprep.subr.bf16.mxu0 %v2213_v34  ;;  %v2251_v59 = vpack.c.bf16 %v321_v53, %v320_v50  ;;  %v290_v61 = vld [vmem:[%s3674_s1 + $0x860] sm:$0xff]  ;;  %v291_v62 = vld [vmem:[%s3674_s1 + $0x868] sm:$0xff]  ;;  %v2253_v0 = vpack.c.bf16 %v339_v41, %v338_v56  ;;  %v308_v2 = vld [vmem:[%s3674_s1 + $0x8f0] sm:$0xff] }
  0x93   :  { %2244 = vmatpush3.bf16.msra.mxu1 %v2243_v43  ;;  %v322_v63 = vld [vmem:[%s3674_s1 + $0x960] sm:$0xff]  ;;  %v323_v1 = vld [vmem:[%s3674_s1 + $0x968] sm:$0xff]  ;;  %v309_v3 = vld [vmem:[%s3674_s1 + $0x8f8] sm:$0xff]  ;;  %v2223_v6 = vpack.c.bf16 %v291_v62, %v290_v61 }
  0x94   :  { %2246 = vmatprep.subr.bf16.mxu1 %v2245_v37  ;;  %v340_v4 = vld [vmem:[%s3674_s1 + $0x9f0] sm:$0xff]  ;;  %v341_v5 = vld [vmem:[%s3674_s1 + $0x9f8] sm:$0xff]  ;;  %v20_v7 = vld [vmem:[%s3673_s0 + $0x28] sm:$0xff]  ;;  %v2255_v8 = vpack.c.bf16 %v323_v1, %v322_v63  ;;  %v2225_v12 = vpack.c.bf16 %v309_v3, %v308_v2 }
  0x95   :  { %2216 = vmatpush3.bf16.msra.mxu0 %v2215_v45  ;;  %v292_v9 = vld [vmem:[%s3674_s1 + $0x870] sm:$0xff]  ;;  %v293_v11 = vld [vmem:[%s3674_s1 + $0x878] sm:$0xff]  ;;  %v2257_v15 = vpack.c.bf16 %v341_v5, %v340_v4  ;;  %v358_v16 = vld [vmem:[%s3674_s1 + $0xa80] sm:$0xff]  ;;  %v513_v20 = vcombine.high %v20_v7, %v20_v7  ;;  %v3456_v31 = vrot.slane %v20_v7, %v2541_v10 }
  0x96   :  { %2218 = vmatprep.subr.bf16.mxu0 %v2217_v47  ;;  %v324_v13 = vld [vmem:[%s3674_s1 + $0x970] sm:$0xff]  ;;  %v325_v14 = vld [vmem:[%s3674_s1 + $0x978] sm:$0xff]  ;;  %v359_v17 = vld [vmem:[%s3674_s1 + $0xa88] sm:$0xff]  ;;  %v2227_v21 = vpack.c.bf16 %v293_v11, %v292_v9 }
  0x97   :  { %2248 = vmatpush3.bf16.msra.mxu1 %v2247_v46  ;;  %v390_v18 = vld [vmem:[%s3674_s1 + $0xb80] sm:$0xff]  ;;  %v391_v19 = vld [vmem:[%s3674_s1 + $0xb88] sm:$0xff]  ;;  %v2259_v22 = vpack.c.bf16 %v325_v14, %v324_v13  ;;  %v2261_v23 = vpack.c.bf16 %v359_v17, %v358_v16  ;;  %v360_v29 = vld [vmem:[%s3674_s1 + $0xa90] sm:$0xff]  ;;  %v3465_v34 = vrot.slane %v513_v20, %v2541_v10  ;;  %v528_v45 = vcombine.high %v3456_v31, %v3456_v31 }
  0x98   :  { %2250 = vmatprep.subr.bf16.mxu1 %v2249_v51  ;;  %v342_v24 = vld [vmem:[%s3674_s1 + $0xa00] sm:$0xff]  ;;  %v343_v25 = vld [vmem:[%s3674_s1 + $0xa08] sm:$0xff]  ;;  %v2293_v27 = vpack.c.bf16 %v391_v19, %v390_v18  ;;  %v361_v30 = vld [vmem:[%s3674_s1 + $0xa98] sm:$0xff] }
  0x99   :  { %2220 = vmatpush3.bf16.msra.mxu0 %v2219_v58  ;;  %v374_v26 = vld [vmem:[%s3674_s1 + $0xb00] sm:$0xff]  ;;  %v375_v28 = vld [vmem:[%s3674_s1 + $0xb08] sm:$0xff]  ;;  %v392_v33 = vld [vmem:[%s3674_s1 + $0xb90] sm:$0xff]  ;;  %v2263_v35 = vpack.c.bf16 %v343_v25, %v342_v24  ;;  %v2265_v52 = vpack.c.bf16 %v361_v30, %v360_v29  ;;  %v529_v48 = vcombine.high %v3465_v34, %v3465_v34 }
  0x9a   :  { %2222 = vmatprep.subr.bf16.mxu0 %v2221_v60  ;;  %v393_v43 = vld [vmem:[%s3674_s1 + $0xb98] sm:$0xff]  ;;  %v2295_v36 = vpack.c.bf16 %v375_v28, %v374_v26  ;;  %v344_v37 = vld [vmem:[%s3674_s1 + $0xa10] sm:$0xff]  ;;  %v362_v42 = vld [vmem:[%s3674_s1 + $0xaa0] sm:$0xff] }
  0x9b   :  { %2252 = vmatpush3.bf16.msra.mxu1 %v2251_v59  ;;  %v345_v38 = vld [vmem:[%s3674_s1 + $0xa18] sm:$0xff]  ;;  %v376_v39 = vld [vmem:[%s3674_s1 + $0xb10] sm:$0xff]  ;;  %v2297_v10 = vpack.c.bf16 %v393_v43, %v392_v33  ;;  %v363_v44 = vld [vmem:[%s3674_s1 + $0xaa8] sm:$0xff] }
  0x9c   :  { %2254 = vmatprep.subr.bf16.mxu1 %v2253_v0  ;;  %v377_v40 = vld [vmem:[%s3674_s1 + $0xb18] sm:$0xff]  ;;  %v394_v46 = vld [vmem:[%s3674_s1 + $0xba0] sm:$0xff]  ;;  %v395_v47 = vld [vmem:[%s3674_s1 + $0xba8] sm:$0xff]  ;;  %v2267_v49 = vpack.c.bf16 %v345_v38, %v344_v37  ;;  %v2269_v51 = vpack.c.bf16 %v363_v44, %v362_v42 }
  0x9d   :  { %2224 = vmatpush3.bf16.msra.mxu0 %v2223_v6  ;;  %v2299_v50 = vpack.c.bf16 %v377_v40, %v376_v39  ;;  %v347_v53 = vld [vmem:[%s3674_s1 + $0xa28] sm:$0xff]  ;;  %v378_v32 = vld [vmem:[%s3674_s1 + $0xb20] sm:$0xff]  ;;  %v2301_v55 = vpack.c.bf16 %v395_v47, %v394_v46  ;;  %v364_v56 = vld [vmem:[%s3674_s1 + $0xab0] sm:$0xff] }
  0x9e   :  { %2226 = vmatprep.subr.bf16.mxu0 %v2225_v12  ;;  %v365_v41 = vld [vmem:[%s3674_s1 + $0xab8] sm:$0xff]  ;;  %v396_v58 = vld [vmem:[%s3674_s1 + $0xbb0] sm:$0xff]  ;;  %v366_v4 = vld [vmem:[%s3674_s1 + $0xac0] sm:$0xff] }
  0x9f   :  { %2256 = vmatpush3.bf16.msra.mxu1 %v2255_v8  ;;  %v397_v59 = vld [vmem:[%s3674_s1 + $0xbb8] sm:$0xff]  ;;  %v2273_v62 = vpack.c.bf16 %v365_v41, %v364_v56  ;;  %v348_v63 = vld [vmem:[%s3674_s1 + $0xa30] sm:$0xff]  ;;  %v367_v5 = vld [vmem:[%s3674_s1 + $0xac8] sm:$0xff] }
  0xa0   :  { %2258 = vmatprep.subr.bf16.mxu1 %v2257_v15  ;;  %v349_v0 = vld [vmem:[%s3674_s1 + $0xa38] sm:$0xff]  ;;  %v380_v1 = vld [vmem:[%s3674_s1 + $0xb30] sm:$0xff]  ;;  %v2305_v2 = vpack.c.bf16 %v397_v59, %v396_v58  ;;  %v398_v6 = vld [vmem:[%s3674_s1 + $0xbc0] sm:$0xff]  ;;  %v2277_v9 = vpack.c.bf16 %v367_v5, %v366_v4  ;;  %v2373_v59 = vmov 0.0|0.0  }
  0xa1   :  { %2228 = vmatpush3.bf16.msra.mxu0 %v2227_v21  ;;  %v381_v3 = vld [vmem:[%s3674_s1 + $0xb38] sm:$0xff]  ;;  %v399_v7 = vld [vmem:[%s3674_s1 + $0xbc8] sm:$0xff]  ;;  %v2275_v8 = vpack.c.bf16 %v349_v0, %v348_v63  ;;  %v350_v11 = vld [vmem:[%s3674_s1 + $0xa40] sm:$0xff] }
  0xa2   :  { %2262 = vmatprep.subr.bf16.mxu0 %v2261_v23  ;;  %v2307_v12 = vpack.c.bf16 %v381_v3, %v380_v1  ;;  %v351_v13 = vld [vmem:[%s3674_s1 + $0xa48] sm:$0xff]  ;;  %v382_v15 = vld [vmem:[%s3674_s1 + $0xb40] sm:$0xff]  ;;  %v2309_v14 = vpack.c.bf16 %v399_v7, %v398_v6  ;;  %v368_v17 = vld [vmem:[%s3674_s1 + $0xad0] sm:$0xff]  ;;  %v2375_v1 = vmov 0.0  }
  0xa3   :  { %2260 = vmatpush3.bf16.msra.mxu1 %v2259_v22  ;;  %v383_v16 = vld [vmem:[%s3674_s1 + $0xb48] sm:$0xff]  ;;  %v369_v18 = vld [vmem:[%s3674_s1 + $0xad8] sm:$0xff]  ;;  %v400_v19 = vld [vmem:[%s3674_s1 + $0xbd0] sm:$0xff]  ;;  %v2279_v21 = vpack.c.bf16 %v351_v13, %v350_v11 }
  0xa4   :  { %2294 = vmatprep.subr.bf16.mxu1 %v2293_v27  ;;  %1189 = vmatmul.mubr.f32.vlgmr.msra.gmra.mrb[8].mxu0 %v3249_v54  ;;  %v346_v54 = vld [vmem:[%s3674_s1 + $0xa20] sm:$0xff]  ;;  %v401_v20 = vld [vmem:[%s3674_s1 + $0xbd8] sm:$0xff]  ;;  %v2311_v22 = vpack.c.bf16 %v383_v16, %v382_v15  ;;  %v2281_v23 = vpack.c.bf16 %v369_v18, %v368_v17  ;;  %v352_v24 = vld [vmem:[%s3674_s1 + $0xa50] sm:$0xff] }
  0xa5   :  { %2264 = vmatpush3.bf16.msra.mxu0 %v2263_v35  ;;  %1328 = vmatprep.mubr.f32.mxu0 %v528_v45  ;;  %v2271_v60 = vpack.c.bf16 %v347_v53, %v346_v54  ;;  %v353_v25 = vld [vmem:[%s3674_s1 + $0xa58] sm:$0xff]  ;;  %v384_v26 = vld [vmem:[%s3674_s1 + $0xb50] sm:$0xff]  ;;  %v2313_v27 = vpack.c.bf16 %v401_v20, %v400_v19  ;;  %v370_v29 = vld [vmem:[%s3674_s1 + $0xae0] sm:$0xff] }
  0xa6   :  { %1259 = vmatmul.mubr.f32.vlgmr.msra.gmra.mrb[8].mxu1 %v3258_v57  ;;  %2266 = vmatprep.subr.bf16.mxu0 %v2265_v52  ;;  %v379_v57 = vld [vmem:[%s3674_s1 + $0xb28] sm:$0xff]  ;;  %v385_v28 = vld [vmem:[%s3674_s1 + $0xb58] sm:$0xff]  ;;  %v402_v33 = vld [vmem:[%s3674_s1 + $0xbe0] sm:$0xff]  ;;  %v2283_v35 = vpack.c.bf16 %v353_v25, %v352_v24 }
  0xa7   :  { %2296 = vmatpush3.bf16.msra.mxu1 %v2295_v36  ;;  %1398 = vmatprep.mubr.f32.mxu1 %v529_v48  ;;  %v2303_v61 = vpack.c.bf16 %v379_v57, %v378_v32  ;;  %v371_v30 = vld [vmem:[%s3674_s1 + $0xae8] sm:$0xff]  ;;  %v2315_v36 = vpack.c.bf16 %v385_v28, %v384_v26  ;;  %v354_v37 = vld [vmem:[%s3674_s1 + $0xa60] sm:$0xff]  ;;  %v372_v42 = vld [vmem:[%s3674_s1 + $0xaf0] sm:$0xff] }
  0xa8   :  { %2298 = vmatprep.subr.bf16.mxu1 %v2297_v10  ;;  %v403_v43 = vld [vmem:[%s3674_s1 + $0xbe8] sm:$0xff]  ;;  %v2285_v52 = vpack.c.bf16 %v371_v30, %v370_v29  ;;  %v386_v39 = vld [vmem:[%s3674_s1 + $0xb60] sm:$0xff]  ;;  %v373_v44 = vld [vmem:[%s3674_s1 + $0xaf8] sm:$0xff] }
  0xa9   :  { %2268 = vmatpush3.bf16.msra.mxu0 %v2267_v49  ;;  %v355_v38 = vld [vmem:[%s3674_s1 + $0xa68] sm:$0xff]  ;;  %v2317_v10 = vpack.c.bf16 %v403_v43, %v402_v33  ;;  %v404_v45 = vld [vmem:[%s3674_s1 + $0xbf0] sm:$0xff]  ;;  %v405_v46 = vld [vmem:[%s3674_s1 + $0xbf8] sm:$0xff]  ;;  %v2289_v49 = vpack.c.bf16 %v373_v44, %v372_v42 }
  0xaa   :  { %2270 = vmatprep.subr.bf16.mxu0 %v2269_v51  ;;  %v387_v40 = vld [vmem:[%s3674_s1 + $0xb68] sm:$0xff]  ;;  %v2287_v47 = vpack.c.bf16 %v355_v38, %v354_v37  ;;  %v357_v51 = vld [vmem:[%s3674_s1 + $0xa78] sm:$0xff]  ;;  %v2321_v54 = vpack.c.bf16 %v405_v46, %v404_v45  ;;  %v388_v53 = vld [vmem:[%s3674_s1 + $0xb70] sm:$0xff] }
  0xab   :  { %2300 = vmatpush3.bf16.msra.mxu1 %v2299_v50  ;;  %v2319_v48 = vpack.c.bf16 %v387_v40, %v386_v39  ;;  %v356_v50 = vld [vmem:[%s3674_s1 + $0xa70] sm:$0xff]  ;;  %v389_v32 = vld [vmem:[%s3674_s1 + $0xb78] sm:$0xff]  ;;  %v406_v56 = vld [vmem:[%s3674_s1 + $0xc00] sm:$0xff] }
  0xac   :  { %2302 = vmatprep.subr.bf16.mxu1 %v2301_v55  ;;  %v2291_v55 = vpack.c.bf16 %v357_v51, %v356_v50  ;;  %v2323_v57 = vpack.c.bf16 %v389_v32, %v388_v53  ;;  %v407_v41 = vld [vmem:[%s3674_s1 + $0xc08] sm:$0xff]  ;;  %v410_v63 = vld [vmem:[%s3674_s1 + $0xc20] sm:$0xff]  ;;  %v1491_v4 = vld.sshfl [vmem:[%s3673_s0 + $0x30] sm:$0x3 pattern:$0x76325410] }
  0xad   :  { %2272 = vmatpush3.bf16.msra.mxu0 %v2271_v60  ;;  %v2326_v58 = vpack.c.bf16 %v407_v41, %v406_v56  ;;  %v408_v60 = vld [vmem:[%s3674_s1 + $0xc10] sm:$0xff]  ;;  %v411_v0 = vld [vmem:[%s3674_s1 + $0xc28] sm:$0xff]  ;;  %v1490_v6 = vld [vmem:[%s3675_s2] ss:$0 sm:$0xff]  ;;  %s2376_s0 = smov [#allocation2]  }
  0xae   :  { %2274 = vmatprep.subr.bf16.mxu0 %v2273_v62 }
  0xaf   :  { %2304 = vmatpush3.bf16.msra.mxu1 %v2303_v61  ;;  %v409_v61 = vld [vmem:[%s3674_s1 + $0xc18] sm:$0xff] }
  0xb0   :  { %2306 = vmatprep.subr.bf16.mxu1 %v2305_v2  ;;  %v2329_v62 = vpack.c.bf16 %v409_v61, %v408_v60  ;;  %v2332_v2 = vpack.c.bf16 %v411_v0, %v410_v63 }
  0xb1   :  { %2276 = vmatpush3.bf16.msra.mxu0 %v2275_v8 }
  0xb2   :  { %2278 = vmatprep.subr.bf16.mxu0 %v2277_v9 }
  0xb3   :  { %2308 = vmatpush3.bf16.msra.mxu1 %v2307_v12 }
  0xb4   :  { %2310 = vmatprep.subr.bf16.mxu1 %v2309_v14 }
  0xb5   :  { %2280 = vmatpush3.bf16.msra.mxu0 %v2279_v21 }
  0xb6   :  { %2282 = vmatprep.subr.bf16.mxu0 %v2281_v23 }
  0xb7   :  { %2312 = vmatpush3.bf16.msra.mxu1 %v2311_v22 }
  0xb8   :  { %2314 = vmatprep.subr.bf16.mxu1 %v2313_v27 }
  0xb9   :  { %2284 = vmatpush3.bf16.msra.mxu0 %v2283_v35 }
  0xba   :  { %2286 = vmatprep.subr.bf16.mxu0 %v2285_v52 }
  0xbb   :  { %2316 = vmatpush3.bf16.msra.mxu1 %v2315_v36 }
  0xbc   :  { %2318 = vmatprep.subr.bf16.mxu1 %v2317_v10 }
  0xbd   :  { %2288 = vmatpush3.bf16.msra.mxu0 %v2287_v47 }
  0xbe   :  { %2290 = vmatprep.subr.bf16.mxu0 %v2289_v49 }
  0xbf   :  { %2320 = vmatpush3.bf16.msra.mxu1 %v2319_v48 }
  0xc0   :  { %2322 = vmatprep.subr.bf16.mxu1 %v2321_v54 }
  0xc1   :  { %2292 = vmatpush3.bf16.msra.mxu0 %v2291_v55 }
  0xc2   :  { %2325 = vmatprep.subr.bf16.mxu0 %v2373_v59 }
  0xc3   :  { %2324 = vmatpush3.bf16.msra.mxu1 %v2323_v57 }
  0xc4   :  { %1329 = vmatmul.mubr.f32.vlgmr.msra.gmra.mrb[10].mxu0 %v3456_v31  ;;  %v412_v31 = vld [vmem:[%s3674_s1 + $0xc30] sm:$0xff] }
  0xc5   :  { %2327 = vmatpush3.bf16.msra.mxu0 %v2326_v58  ;;  %1938 = vmatprep.mubr.msk.f32.mxu0 %vm2374_vm0, %v2375_v1 }
  0xc6   :  { %1399 = vmatmul.mubr.f32.vlgmr.msra.gmra.mrb[10].mxu1 %v3465_v34  ;;  %2328 = vmatprep.subr.bf16.mxu0 %v2373_v59  ;;  %v413_v34 = vld [vmem:[%s3674_s1 + $0xc38] sm:$0xff]  ;;  %s1482_s1 = sshll.u32 %s2376_s0, 4  ;;  %s1483_s1 = int_to_ptr.vmem [resolvable:$true] %s1482_s1 }
  0xc7   :  { %v2335_v3 = vpack.c.bf16 %v413_v34, %v412_v31  ;;  %s2348_s2 = scalar_lea.vmem %s1483_s1, 32  ;;  %p2353_p1 = scmp.lt.s32.totalorder %s1483_s1, %s1483_s1 }
  0xc8   :  { %p2349_p0 = scmp.ne.s32.totalorder %s1483_s1, %s2348_s2  ;;  %p2354_p2 = scmp.lt.s32.totalorder %s2348_s2, %s2348_s2 }
  0xc9   :  { %2330 = vmatpush3.bf16.msra.mxu0 %v2329_v62 }
  0xca   :  { %2331 = vmatprep.subr.bf16.mxu0 %v2373_v59  ;;  %p2355_p3 = por %p2354_p2, %p2353_p1 }
  0xcc   :  { %p2356_p4 = pnand %p2355_p3, %p2349_p0 }
  0xcd   :  { %2333 = vmatpush3.bf16.msra.mxu0 %v2332_v2 }
  0xce   :  { %2334 = vmatprep.subr.bf16.mxu0 %v2373_v59 }
  0xd1   :  { %2336 = vmatpush3.bf16.msra.mxu0 %v2335_v3 }
  0xd4   :  { %1939 = vmatmul.mubr.msk.f32.vlgmr.msra.gmra.mrb[12].mxu0 %vm561_vm1, %v1491_v4 }
  0xf7   :  { %v1525_v5 = vpop.f32.mrb[0].mxu0 }
  0xf8   :  { %v1526_v7 = vpop.f32.mrb[1].mxu0 }
  0xf9   :  { %v1560_v8 = vpop.f32.mrb[0].mxu1  ;;  %v1527_v12 = vadd.f32 %v1526_v7, %v1525_v5 }
  0xfa   :  { %v1561_v9 = vpop.f32.mrb[1].mxu1 }
  0xfb   :  { %v1562_v11 = vadd.f32 %v1561_v9, %v1560_v8  ;;  %v631_v13 = vadd.f32 %v1527_v12, %v1490_v6 }
  0xfd   :  { %v701_v15 = vadd.f32 %v1562_v11, %v631_v13 }
 0x117   :  { %v1595_v14 = vpop.f32.mrb[2].mxu0 }
 0x118   :  { %v1596_v16 = vpop.f32.mrb[3].mxu0 }
 0x119   :  { %v1630_v17 = vpop.f32.mrb[2].mxu1  ;;  %v1597_v18 = vadd.f32 %v1596_v16, %v1595_v14 }
 0x11a   :  { %v1631_v19 = vpop.f32.mrb[3].mxu1 }
 0x11b   :  { %v1632_v20 = vadd.f32 %v1631_v19, %v1630_v17  ;;  %v771_v21 = vadd.f32 %v1597_v18, %v701_v15 }
 0x11d   :  { %v841_v22 = vadd.f32 %v1632_v20, %v771_v21 }
 0x137   :  { %v1665_v23 = vpop.f32.mrb[4].mxu0 }
 0x138   :  { %v1666_v24 = vpop.f32.mrb[5].mxu0 }
 0x139   :  { %v1700_v25 = vpop.f32.mrb[4].mxu1  ;;  %v1667_v26 = vadd.f32 %v1666_v24, %v1665_v23 }
 0x13a   :  { %v1701_v27 = vpop.f32.mrb[5].mxu1 }
 0x13b   :  { %v1702_v28 = vadd.f32 %v1701_v27, %v1700_v25  ;;  %v911_v29 = vadd.f32 %v1667_v26, %v841_v22 }
 0x13d   :  { %v981_v30 = vadd.f32 %v1702_v28, %v911_v29 }
 0x157   :  { %v1735_v33 = vpop.f32.mrb[6].mxu0 }
 0x158   :  { %v1736_v43 = vpop.f32.mrb[7].mxu0 }
 0x159   :  { %v1770_v35 = vpop.f32.mrb[6].mxu1  ;;  %v1737_v36 = vadd.f32 %v1736_v43, %v1735_v33 }
 0x15a   :  { %v1771_v52 = vpop.f32.mrb[7].mxu1 }
 0x15b   :  { %v1772_v37 = vadd.f32 %v1771_v52, %v1770_v35  ;;  %v1051_v38 = vadd.f32 %v1737_v36, %v981_v30 }
 0x15d   :  { %v1121_v39 = vadd.f32 %v1772_v37, %v1051_v38 }
 0x177   :  { %v1805_v10 = vpop.f32.mrb[8].mxu0 }
 0x178   :  { %v1806_v40 = vpop.f32.mrb[9].mxu0 }
 0x179   :  { %v1840_v42 = vpop.f32.mrb[8].mxu1  ;;  %v1807_v44 = vadd.f32 %v1806_v40, %v1805_v10 }
 0x17a   :  { %v1841_v45 = vpop.f32.mrb[9].mxu1 }
 0x17b   :  { %v1842_v46 = vadd.f32 %v1841_v45, %v1840_v42  ;;  %v1191_v47 = vadd.f32 %v1807_v44, %v1121_v39 }
 0x17d   :  { %v1261_v48 = vadd.f32 %v1842_v46, %v1191_v47 }
 0x197   :  { %v1875_v49 = vpop.f32.mrb[10].mxu0 }
 0x198   :  { %v1876_v50 = vpop.f32.mrb[11].mxu0 }
 0x199   :  { %v1910_v51 = vpop.f32.mrb[10].mxu1  ;;  %v1877_v54 = vadd.f32 %v1876_v50, %v1875_v49 }
 0x19a   :  { %v1911_v53 = vpop.f32.mrb[11].mxu1 }
 0x19b   :  { %v1912_v32 = vadd.f32 %v1911_v53, %v1910_v51  ;;  %v1331_v55 = vadd.f32 %v1877_v54, %v1261_v48 }
 0x19d   :  { %v1401_v57 = vadd.f32 %v1912_v32, %v1331_v55 }
 0x1a7   :  { %v1470_v56 = vpop.f32.mrb[12].mxu0 }
 0x1a8   :  { %v1471_v41 = vadd.f32 %v1470_v56, %v1401_v57  ;;  %v1940_v58 = vpop.f32.mrb[13].mxu0 }
 0x1aa   :  { %1475 = vst.msk [vmem:[#allocation2] sm:$0x3] %vm1474_vm2, %v1471_v41 }
 0x1ab   :  { %2359 = shalt.err (!%p2356_p4)
}
 0x1ac   :  { %s2360_s4 = scalar_lea.hbm %s3676_s3, 32 }
 0x1ad   :  { %p2361_p5 = scmp.ne.s32.totalorder %s3676_s3, %s2360_s4  ;;  %p2364_p6 = scmp.lt.u32.totalorder %s2360_s4, %s3676_s3 }
 0x1af   :  { %p2366_p7 = pnand %p2364_p6, %p2361_p5 }
 0x1b1   :  { %2369 = shalt.err (!%p2366_p7)
}
 0x1b2   :  { %1485 = dma.vmem_to_hbm [thread:$0]  %s1483_s1, 32, %s3676_s3, [#allocation3]  }
 0x1b3   :  { %2370 = dma.done.wait [#allocation3], 32  }
 0x1b4   :  { %2371 = vsyncadd [#allocation3], 4294967264 }
 0x1b5   :  { %1489 = vsyncpa [#allocation3], 1 }

</bundles_post_ra>
